<compile_context>
chip_gen: v6e
topology: v6e:2x2x1
jax: 0.10.0
libtpu: 0.0.40
codegen_flags: <defaults>
</compile_context>

<pallas_src>
import jax
import jax.numpy as jnp
from jax.experimental import pallas as pl
from jax.experimental.pallas import tpu as pltpu


_VMEM = pl.BlockSpec(memory_space=pltpu.MemorySpace.VMEM)
_SMEM = pl.BlockSpec(memory_space=pltpu.MemorySpace.SMEM)


# --------------------------------------------------------------------------
# Kernel 1/2 : action1 / action2 head, whole batch in one invocation.
#   emb_cat = Bilinear(cand_desc, ctx) + Linear1(cand_desc) + Linear2(ctx)
#   logit   = MLP(emb_cat)            (E -> E -> E -> 1, ReLU)
#   prob    = softmax(logit) + 1e-8   (over candidates)
# The cand_desc-side contractions (bilinear left half + Linear1) are
# parameter-only and precomputed at init into xw3 / lin1.
# --------------------------------------------------------------------------
def _head12_kernel(ctx_ref, xw3_ref, lin1_ref, bb_ref, w2t_ref, m1t_ref,
                   m2t_ref, b2_ref, m3_ref, b3_ref, prob_ref):
    # ctx : (bs, E) f32; xw3 : (NC, E, E) f32 [n,k,j]; lin1 : (NC, E) f32
    ctx = ctx_ref[...]

    # bilinear right contraction: bil[b,n,k] = sum_j xw3[n,k,j] * ctx[b,j]
    # (broadcast-multiply + lane reduce; ~bs*NC*E*E MACs on the VPU/XLU)
    bil = jnp.sum(xw3_ref[...][None, :, :, :] * ctx[:, None, None, :],
                  axis=-1)                                       # (bs, NC, E)

    # Linear2(ctx), computed once per batch row (bf16 MXU operands, f32 acc)
    lin2 = jnp.dot(ctx.astype(jnp.bfloat16), w2t_ref[...],
                   preferred_element_type=jnp.float32)           # (bs, E)

    emb = (bil + lin1_ref[...][None, :, :] + lin2[:, None, :]
           + bb_ref[...][None, :, :])                            # (bs, NC, E)

    # MLP head: E -> E -> E -> 1 (last layer as an elementwise mul + lane sum)
    h = jnp.maximum(jnp.dot(emb.astype(jnp.bfloat16), m1t_ref[...],
                            preferred_element_type=jnp.float32), 0.0)
    h = jnp.maximum(jnp.dot(h.astype(jnp.bfloat16), m2t_ref[...],
                            preferred_element_type=jnp.float32)
                    + b2_ref[...][None, :, :], 0.0)
    logit = jnp.sum(h * m3_ref[...][None, :, :], axis=-1) + b3_ref[0, 0]  # (bs, NC)

    # softmax over candidates (+1e-8, matching the torch module)
    mx = jnp.max(logit, axis=-1, keepdims=True)
    e = jnp.exp(logit - mx)
    inv = pl.reciprocal(jnp.sum(e, axis=-1, keepdims=True), approx=True)
    prob_ref[...] = e * inv + 1e-8


def action_head_12(ctx_emb, p):
    """ctx_emb: (bs, E) f32 -> probs (bs, NC) f32."""
    bs, E = ctx_emb.shape
    NC = p["xw3"].shape[0]
    flops = 2 * bs * (NC * E * E + E * E + 2 * NC * E * E + NC * E)
    bytes_acc = (4 * (bs * E + NC * E * E + NC * E + 3 * E + 1 + bs * NC)
                 + 2 * 3 * E * E)
    return pl.pallas_call(
        _head12_kernel,
        out_shape=jax.ShapeDtypeStruct((bs, NC), jnp.float32),
        in_specs=[_VMEM] * 9 + [_SMEM],
        out_specs=_VMEM,
        cost_estimate=pl.CostEstimate(flops=flops, transcendentals=bs * NC,
                                      bytes_accessed=bytes_acc),
    )(ctx_emb, p["xw3"], p["lin1"], p["bb"], p["w2t"], p["m1t"], p["m2t"],
      p["b2"], p["m3"], p["b3"])


# --------------------------------------------------------------------------
# Kernel 3 : action3 head (attachment-point selection), whole batch at once.
#   emb_cat = Bilinear(emb_second, att_emb) + Linear(emb_second) + Linear(att_emb)
#   logit   = MLP(emb_cat)            (E -> E//2 -> 1, ReLU)
#   prob    = softmax over attachment points + 1e-8
# Bilinear is done as two broadcast-multiply + lane-reduce steps (contract the
# es side first: bs*2E*2E*E MACs, then the A side: bs*A*2E*E MACs).
# --------------------------------------------------------------------------
def _head3_kernel(es_ref, ce_ref, w3_ref, bb_ref, w1t_ref, w2t_ref,
                  m1t_ref, m2_ref, b2_ref, prob_ref):
    # es : (bs, 2E) f32; ce : (bs, A, 2E) f32; w3 : (E, 2E, 2E) f32 [k, j, i]
    es = es_ref[...]
    ce = ce_ref[...]

    # step 1: esw[b,k,j] = sum_i W[k,i,j] * es[b,i]
    esw = jnp.sum(w3_ref[...][None, :, :, :] * es[:, None, None, :],
                  axis=-1)                                       # (bs, E, 2E)
    # step 2: bil[b,a,k] = sum_j esw[b,k,j] * ce[b,a,j]
    bil = jnp.sum(ce[:, :, None, :] * esw[:, None, :, :], axis=-1)  # (bs, A, E)

    lin1 = jnp.dot(es.astype(jnp.bfloat16), w1t_ref[...],
                   preferred_element_type=jnp.float32)           # (bs, E)
    lin2 = jnp.dot(ce.astype(jnp.bfloat16), w2t_ref[...],
                   preferred_element_type=jnp.float32)           # (bs, A, E)
    emb = bil + bb_ref[...][None, :, :] + lin1[:, None, :] + lin2

    # MLP head: E -> E//2 -> 1
    h = jnp.maximum(jnp.dot(emb.astype(jnp.bfloat16), m1t_ref[...],
                            preferred_element_type=jnp.float32), 0.0)
    logit = jnp.sum(h * m2_ref[...][None, :, :], axis=-1) + b2_ref[0, 0]  # (bs, A)

    mx = jnp.max(logit, axis=-1, keepdims=True)
    e = jnp.exp(logit - mx)
    inv = pl.reciprocal(jnp.sum(e, axis=-1, keepdims=True), approx=True)
    prob_ref[...] = e * inv + 1e-8


def action_head_3(emb_second, cand_att_emb, p):
    """emb_second: (bs, 2E), cand_att_emb: (bs, A, 2E) -> probs (bs, A)."""
    bs, TwoE = emb_second.shape
    A = cand_att_emb.shape[1]
    E = TwoE // 2
    flops = 2 * bs * (E * TwoE * TwoE + A * E * TwoE + TwoE * E
                      + A * TwoE * E + A * E * (E // 2) + A * (E // 2))
    bytes_acc = (4 * (bs * TwoE + bs * A * TwoE + E * TwoE * TwoE + E
                      + E // 2 + 1 + bs * A)
                 + 2 * (2 * TwoE * E + E * (E // 2)))
    return pl.pallas_call(
        _head3_kernel,
        out_shape=jax.ShapeDtypeStruct((bs, A), jnp.float32),
        in_specs=[_VMEM] * 8 + [_SMEM],
        out_specs=_VMEM,
        cost_estimate=pl.CostEstimate(flops=flops, transcendentals=bs * A,
                                      bytes_accessed=bytes_acc),
    )(emb_second, cand_att_emb, p["w3"], p["bb"], p["w1t"], p["w2t"],
      p["m1t"], p["m2"], p["b2"])


# --------------------------------------------------------------------------
# Glue: gumbel softmax + full SFSPolicy.forward.  As in the torch module, the
# gumbel noise is applied to the probabilities (g_ratio=1e-3), the "hard"
# output is the one-hot argmax, and the padded log-prob entries are zeros.
# --------------------------------------------------------------------------
def gumbel_softmax(key, logits, tau=1.0, hard=False, g_ratio=1e-3):
    g = jax.random.gumbel(key, logits.shape, dtype=logits.dtype)
    y_soft = jax.nn.softmax((logits + g * g_ratio) / tau, axis=-1)
    if hard:
        idx = jnp.argmax(y_soft, axis=-1)
        return jax.nn.one_hot(idx, logits.shape[-1], dtype=logits.dtype)
    return y_soft


def sfs_policy_forward(params, graph_emb, coreCand_graph_emb, fragCand_graph_emb,
                       fragCand_att_node_emb, key, tau=1.0, max_action=60):
    bs = graph_emb.shape[0]
    k1, k2, k3 = jax.random.split(key, 3)

    # ---------------- action 1: pick core motif ----------------
    ac_first_prob = action_head_12(graph_emb, params["a1"])          # (bs, n_core)
    log_ac_first_prob = jnp.log(ac_first_prob)
    ac_first_hot = gumbel_softmax(k1, ac_first_prob, tau, hard=True)
    emb_first = ac_first_hot @ coreCand_graph_emb                    # (bs, E)
    ac_first = jnp.argmax(ac_first_hot, axis=-1)

    # ---------------- action 2: pick fragment motif ----------------
    ac_second_prob = action_head_12(emb_first, params["a2"])         # (bs, n_frag)
    log_ac_second_prob = jnp.log(ac_second_prob)
    ac_second_hot = gumbel_softmax(k2, ac_second_prob, tau, hard=True)
    emb_second = ac_second_hot @ fragCand_graph_emb                  # (bs, 2E)
    ac_second = jnp.argmax(ac_second_hot, axis=-1)

    # ---------------- action 3: pick attachment point ----------------
    # TODO(synk): DGL masked_select over ragged per-fragment attachment counts
    # is replaced by a fixed attachment count A per fragment (uniform A keeps
    # the gather rectangular); semantics are identical for uniform A.
    ac3_cand_emb = fragCand_att_node_emb[ac_second]                  # (bs, A, 2E)
    prob3 = action_head_3(emb_second, ac3_cand_emb, params["a3"])    # (bs, A)
    A = prob3.shape[1]
    log_prob3 = jnp.log(prob3)
    ac_third_hot = gumbel_softmax(k3, prob3, tau, hard=True)
    ac_third = jnp.argmax(ac_third_hot, axis=-1)
    pad = jnp.zeros((bs, max_action - A), prob3.dtype)
    ac_third_prob = jnp.concatenate([prob3, pad], axis=1)
    log_ac_third_prob = jnp.concatenate([log_prob3, pad], axis=1)    # zero pad (as torch)

    ac = jnp.stack([ac_first, ac_second, ac_third], axis=1)
    ac_prob = jnp.concatenate([ac_first_prob, ac_second_prob, ac_third_prob], axis=1)
    log_ac_prob = jnp.concatenate(
        [log_ac_first_prob, log_ac_second_prob, log_ac_third_prob], axis=1)
    return ac, (ac_prob, log_ac_prob), (ac_first_prob, ac_second_hot, ac_third_prob)


# --------------------------------------------------------------------------
# Deterministic parameter initialization (shapes follow SFSPolicy.__init__).
# The candidate-descriptor side of action1/2 (bilinear left contraction and
# Linear1) is parameter-only, so it is precomputed HERE, once, in f32.
# Small MXU-feeding weights are stored bf16; VPU-side weights stay f32.
# --------------------------------------------------------------------------
def init_params(key, core_desc, frag_desc, E=32):
    D = core_desc.shape[1]
    k1, k2, k3 = jax.random.split(key, 3)

    def nrm(k, shape, scale):
        return jax.random.normal(k, shape, jnp.float32) * scale

    def action12_params(k, cand_desc):
        sub = jax.random.split(k, 9)
        Wb = nrm(sub[0], (E, D, E), 1.0 / jnp.sqrt(D))   # nn.Bilinear(D, E, E).weight
        W1 = nrm(sub[2], (E, D), 1.0 / jnp.sqrt(D))      # nn.Linear(D, E, bias=False)
        # hoisted parameter-only precompute (off the forward critical path):
        #   xw3[n,k,j] = sum_i cand[n,i] Wb[k,i,j] ;  lin1[n,k] = sum_i cand[n,i] W1[k,i]
        xw3 = jnp.einsum('ni,kij->nkj', cand_desc, Wb)               # (NC, E, E)
        lin1 = cand_desc @ W1.T                                       # (NC, E)
        return dict(
            xw3=xw3, lin1=lin1,
            bb=nrm(sub[1], (1, E), 0.02),
            w2t=nrm(sub[3], (E, E), 1.0 / jnp.sqrt(E)).T.astype(jnp.bfloat16),
            m1t=nrm(sub[4], (E, E), 1.0 / jnp.sqrt(E)).T.astype(jnp.bfloat16),
            m2t=nrm(sub[5], (E, E), 1.0 / jnp.sqrt(E)).T.astype(jnp.bfloat16),
            b2=nrm(sub[6], (1, E), 0.02),
            m3=nrm(sub[7], (1, E), 1.0 / jnp.sqrt(E)),
            b3=nrm(sub[8], (1, 1), 0.02),
        )

    def action3_params(k):
        sub = jax.random.split(k, 7)
        Wb = nrm(sub[0], (E, 2 * E, 2 * E), 1.0 / jnp.sqrt(2 * E))   # Bilinear(2E,2E,E)
        return dict(
            w3=jnp.transpose(Wb, (0, 2, 1)),     # [k, j, i]: es-contraction on lanes
            bb=nrm(sub[1], (1, E), 0.02),
            w1t=nrm(sub[2], (E, 2 * E), 1.0 / jnp.sqrt(2 * E)).T.astype(jnp.bfloat16),
            w2t=nrm(sub[3], (E, 2 * E), 1.0 / jnp.sqrt(2 * E)).T.astype(jnp.bfloat16),
            m1t=nrm(sub[4], (E // 2, E), 1.0 / jnp.sqrt(E)).T.astype(jnp.bfloat16),
            m2=nrm(sub[5], (1, E // 2), 1.0 / jnp.sqrt(E // 2)),
            b2=nrm(sub[6], (1, 1), 0.02),
        )

    return dict(a1=action12_params(k1, core_desc),
                a2=action12_params(k2, frag_desc),
                a3=action3_params(k3))


if __name__ == "__main__":
    key = jax.random.PRNGKey(0)
    kp, kd1, kd2, kg, kc, kf, ka, kfwd = jax.random.split(key, 8)

    bs, E, D = 2, 32, 1024          # batch, emb_size, ECFP descriptor dim
    n_core, n_frag, A = 16, 16, 4   # candidate counts, attachment points/frag
    max_action = 60

    # synthetic ECFP fingerprints (0/1) for core / fragment candidates
    core_desc = jax.random.bernoulli(kd1, 0.3, (n_core, D)).astype(jnp.float32)
    frag_desc = jax.random.bernoulli(kd2, 0.3, (n_frag, D)).astype(jnp.float32)
    params = init_params(kp, core_desc, frag_desc, E=E)

    graph_emb = jax.random.normal(kg, (bs, E), jnp.float32)
    coreCand_graph_emb = jax.random.normal(kc, (n_core, E), jnp.float32)
    fragCand_graph_emb = jax.random.normal(kf, (n_frag, 2 * E), jnp.float32)
    fragCand_att_node_emb = jax.random.normal(ka, (n_frag, A, 2 * E), jnp.float32)

    ac, (ac_prob, log_ac_prob), (p1, hot2, p3) = sfs_policy_forward(
        params, graph_emb, coreCand_graph_emb, fragCand_graph_emb,
        fragCand_att_node_emb, kfwd, tau=1.0, max_action=max_action)

    jax.block_until_ready((ac, ac_prob, log_ac_prob, p1, hot2, p3))

    assert ac.shape == (bs, 3)
    assert ac_prob.shape == (bs, n_core + n_frag + max_action)
    assert log_ac_prob.shape == ac_prob.shape
    assert p1.shape == (bs, n_core) and hot2.shape == (bs, n_frag)
    assert p3.shape == (bs, max_action)
    # light sanity: softmax(+1e-8) rows sum to ~1 (approx reciprocal in kernel)
    assert bool(jnp.all(jnp.abs(jnp.sum(p1, axis=-1) - 1.0) < 5e-3))
    assert bool(jnp.all(jnp.abs(jnp.sum(p3[:, :A], axis=-1) - 1.0) < 5e-3))
    print("KERNEL_OK")
</pallas_src>

<mosaic_0001>
module attributes {stable_mosaic.version = 11 : i64} {
  func.func @_head12_kernel(%arg0: memref<2x32xf32, #tpu.memory_space<vmem>>, %arg1: memref<16x32x32xf32, #tpu.memory_space<vmem>>, %arg2: memref<16x32xf32, #tpu.memory_space<vmem>>, %arg3: memref<1x32xf32, #tpu.memory_space<vmem>>, %arg4: memref<32x32xbf16, #tpu.memory_space<vmem>>, %arg5: memref<32x32xbf16, #tpu.memory_space<vmem>>, %arg6: memref<32x32xbf16, #tpu.memory_space<vmem>>, %arg7: memref<1x32xf32, #tpu.memory_space<vmem>>, %arg8: memref<1x32xf32, #tpu.memory_space<vmem>>, %arg9: memref<1x1xf32, #tpu.memory_space<smem>>, %arg10: memref<2x16xf32, #tpu.memory_space<vmem>>) attributes {dimension_semantics = [], scalar_prefetch = 0 : i64, scratch_operands = 0 : i64, tpu.core_type = #tpu.core_type<tc>} {
    %c0 = arith.constant 0 : index
    %c0_0 = arith.constant 0 : index
    %0 = vector.load %arg0[%c0, %c0_0] : memref<2x32xf32, #tpu.memory_space<vmem>>, vector<2x32xf32>
    %c0_1 = arith.constant 0 : index
    %c0_2 = arith.constant 0 : index
    %c0_3 = arith.constant 0 : index
    %1 = vector.load %arg1[%c0_1, %c0_2, %c0_3] : memref<16x32x32xf32, #tpu.memory_space<vmem>>, vector<16x32x32xf32>
    %2 = vector.shape_cast %1 : vector<16x32x32xf32> to vector<1x16x32x32xf32>
    %3 = vector.shape_cast %0 : vector<2x32xf32> to vector<2x1x1x32xf32>
    %4 = vector.broadcast %2 : vector<1x16x32x32xf32> to vector<2x16x32x32xf32>
    %5 = vector.broadcast %3 : vector<2x1x1x32xf32> to vector<2x16x32x32xf32>
    %6 = arith.mulf %4, %5 : vector<2x16x32x32xf32>
    %cst = arith.constant dense<0.000000e+00> : vector<2x16x32xf32>
    %7 = vector.multi_reduction <add>, %6, %cst [3] : vector<2x16x32x32xf32> to vector<2x16x32xf32>
    %8 = arith.truncf %0 : vector<2x32xf32> to vector<2x32xbf16>
    %c0_4 = arith.constant 0 : index
    %c0_5 = arith.constant 0 : index
    %9 = vector.load %arg4[%c0_4, %c0_5] : memref<32x32xbf16, #tpu.memory_space<vmem>>, vector<32x32xbf16>
    %cst_6 = arith.constant dense<0.000000e+00> : vector<2x32xf32>
    %10 = tpu.matmul %8, %9, %cst_6 {dimension_numbers = #tpu.dot_dimension_numbers<[1], [0], [0], [1], [0, 0, 1, 1], [], []>} : vector<2x32xbf16>, vector<32x32xbf16>, vector<2x32xf32> -> vector<2x32xf32>
    %c0_7 = arith.constant 0 : index
    %c0_8 = arith.constant 0 : index
    %11 = vector.load %arg2[%c0_7, %c0_8] : memref<16x32xf32, #tpu.memory_space<vmem>>, vector<16x32xf32>
    %12 = vector.shape_cast %11 : vector<16x32xf32> to vector<1x16x32xf32>
    %13 = vector.broadcast %12 : vector<1x16x32xf32> to vector<2x16x32xf32>
    %14 = arith.addf %7, %13 : vector<2x16x32xf32>
    %15 = vector.shape_cast %10 : vector<2x32xf32> to vector<2x1x32xf32>
    %16 = vector.broadcast %15 : vector<2x1x32xf32> to vector<2x16x32xf32>
    %17 = arith.addf %14, %16 : vector<2x16x32xf32>
    %c0_9 = arith.constant 0 : index
    %c0_10 = arith.constant 0 : index
    %18 = vector.load %arg3[%c0_9, %c0_10] : memref<1x32xf32, #tpu.memory_space<vmem>>, vector<1x32xf32>
    %19 = vector.shape_cast %18 : vector<1x32xf32> to vector<1x1x32xf32>
    %20 = vector.broadcast %19 : vector<1x1x32xf32> to vector<2x16x32xf32>
    %21 = arith.addf %17, %20 : vector<2x16x32xf32>
    %22 = arith.truncf %21 : vector<2x16x32xf32> to vector<2x16x32xbf16>
    %c0_11 = arith.constant 0 : index
    %c0_12 = arith.constant 0 : index
    %23 = vector.load %arg5[%c0_11, %c0_12] : memref<32x32xbf16, #tpu.memory_space<vmem>>, vector<32x32xbf16>
    %cst_13 = arith.constant dense<0.000000e+00> : vector<2x16x32xf32>
    %24 = tpu.matmul %22, %23, %cst_13 {dimension_numbers = #tpu.dot_dimension_numbers<[2], [0], [0, 1], [1], [0, 0, 0, 1, 1, 1], [], []>} : vector<2x16x32xbf16>, vector<32x32xbf16>, vector<2x16x32xf32> -> vector<2x16x32xf32>
    %cst_14 = arith.constant 0.000000e+00 : f32
    %25 = vector.broadcast %cst_14 : f32 to vector<2x16x32xf32>
    %26 = arith.maximumf %24, %25 : vector<2x16x32xf32>
    %27 = arith.truncf %26 : vector<2x16x32xf32> to vector<2x16x32xbf16>
    %c0_15 = arith.constant 0 : index
    %c0_16 = arith.constant 0 : index
    %28 = vector.load %arg6[%c0_15, %c0_16] : memref<32x32xbf16, #tpu.memory_space<vmem>>, vector<32x32xbf16>
    %cst_17 = arith.constant dense<0.000000e+00> : vector<2x16x32xf32>
    %29 = tpu.matmul %27, %28, %cst_17 {dimension_numbers = #tpu.dot_dimension_numbers<[2], [0], [0, 1], [1], [0, 0, 0, 1, 1, 1], [], []>} : vector<2x16x32xbf16>, vector<32x32xbf16>, vector<2x16x32xf32> -> vector<2x16x32xf32>
    %c0_18 = arith.constant 0 : index
    %c0_19 = arith.constant 0 : index
    %30 = vector.load %arg7[%c0_18, %c0_19] : memref<1x32xf32, #tpu.memory_space<vmem>>, vector<1x32xf32>
    %31 = vector.shape_cast %30 : vector<1x32xf32> to vector<1x1x32xf32>
    %32 = vector.broadcast %31 : vector<1x1x32xf32> to vector<2x16x32xf32>
    %33 = arith.addf %29, %32 : vector<2x16x32xf32>
    %cst_20 = arith.constant 0.000000e+00 : f32
    %34 = vector.broadcast %cst_20 : f32 to vector<2x16x32xf32>
    %35 = arith.maximumf %33, %34 : vector<2x16x32xf32>
    %c0_21 = arith.constant 0 : index
    %c0_22 = arith.constant 0 : index
    %36 = vector.load %arg8[%c0_21, %c0_22] : memref<1x32xf32, #tpu.memory_space<vmem>>, vector<1x32xf32>
    %37 = vector.shape_cast %36 : vector<1x32xf32> to vector<1x1x32xf32>
    %38 = vector.broadcast %37 : vector<1x1x32xf32> to vector<2x16x32xf32>
    %39 = arith.mulf %35, %38 : vector<2x16x32xf32>
    %cst_23 = arith.constant dense<0.000000e+00> : vector<2x16xf32>
    %40 = vector.multi_reduction <add>, %39, %cst_23 [2] : vector<2x16x32xf32> to vector<2x16xf32>
    %c0_24 = arith.constant 0 : index
    %c0_25 = arith.constant 0 : index
    %41 = memref.load %arg9[%c0_24, %c0_25] : memref<1x1xf32, #tpu.memory_space<smem>>
    %42 = vector.broadcast %41 : f32 to vector<2x16xf32>
    %43 = arith.addf %40, %42 : vector<2x16xf32>
    %cst_26 = arith.constant dense<0xFF800000> : vector<2xf32>
    %44 = vector.multi_reduction <maximumf>, %43, %cst_26 [1] : vector<2x16xf32> to vector<2xf32>
    %45 = vector.shape_cast %44 : vector<2xf32> to vector<2x1xf32>
    %46 = vector.broadcast %45 : vector<2x1xf32> to vector<2x16xf32>
    %47 = arith.subf %43, %46 : vector<2x16xf32>
    %48 = math.exp %47 : vector<2x16xf32>
    %cst_27 = arith.constant dense<0.000000e+00> : vector<2xf32>
    %49 = vector.multi_reduction <add>, %48, %cst_27 [1] : vector<2x16xf32> to vector<2xf32>
    %50 = vector.shape_cast %49 : vector<2xf32> to vector<2x1xf32>
    %51 = tpu.reciprocal %50 {approx = true} : vector<2x1xf32> -> vector<2x1xf32>
    %52 = vector.broadcast %51 : vector<2x1xf32> to vector<2x16xf32>
    %53 = arith.mulf %48, %52 : vector<2x16xf32>
    %cst_28 = arith.constant 9.99999993E-9 : f32
    %54 = vector.broadcast %cst_28 : f32 to vector<2x16xf32>
    %55 = arith.addf %53, %54 : vector<2x16xf32>
    %c0_29 = arith.constant 0 : index
    %c0_30 = arith.constant 0 : index
    %56 = vector.load %arg10[%c0_29, %c0_30] : memref<2x16xf32, #tpu.memory_space<vmem>>, vector<2x16xf32>
    tpu.vector_store %arg10[%c0_29, %c0_30], %55 {strides = array<i32>} : memref<2x16xf32, #tpu.memory_space<vmem>>, vector<2x16xf32>,
    return
  }
}

</mosaic_0001>

<bundles_post_ra>
// kernel: tpu_custom_call.1
= control target key start
LH: loop header
LB: loop body
LE: loop exit
PB: predicated region body
PF: predicated region fallthrough
CT: control target
= control target key end

     0   :  { %16 = vsyncpa [#allocation4], 0  ;;  %s5725_s0 = inlined_call_operand.vmem [shape: f32[2,32], index: 0, kind: input, shape index: {}]   ;;  %s5726_s1 = inlined_call_operand.hbm [shape: f32[16,32,32], index: 1, kind: input, shape index: {}]   ;;  %s5727_s2 = inlined_call_operand.hbm [shape: f32[16,32], index: 2, kind: input, shape index: {}]   ;;  %s5728_s3 = inlined_call_operand.vmem [shape: f32[1,32], index: 3, kind: input, shape index: {}]   ;;  %s5729_s4 = inlined_call_operand.hbm [shape: bf16[32,32], index: 4, kind: input, shape index: {}]   ;;  %s5730_s5 = inlined_call_operand.hbm [shape: bf16[32,32], index: 5, kind: input, shape index: {}]   ;;  %s5731_s6 = inlined_call_operand.hbm [shape: bf16[32,32], index: 6, kind: input, shape index: {}]   ;;  %s5732_s7 = inlined_call_operand.vmem [shape: f32[1,32], index: 7, kind: input, shape index: {}]   ;;  %s5733_s8 = inlined_call_operand.vmem [shape: f32[1,32], index: 8, kind: input, shape index: {}]   ;;  %s5734_s9 = inlined_call_operand.<no memory space> [shape: f32[1,1], index: 9, kind: input, shape index: {}]   ;;  %s5735_s10 = inlined_call_operand.hbm [shape: f32[2,16], index: 10, kind: output, shape index: {}]  }
   0x1   :  { %17 = vsyncpa [#allocation7], 0 }
   0x2   :  { %18 = vsyncpa [#allocation10], 0 }
   0x3   :  { %19 = vsyncpa [#allocation5], 0  ;;  %s3481_s13 = smov [#allocation6]  }
   0x4   :  { %s39_s14 = sshll.u32 %s3481_s13, 4  ;;  %s40_s14 = int_to_ptr.vmem [resolvable:$true] %s39_s14 }
   0x5   :  { %s3361_s15 = scalar_lea.vmem %s40_s14, 256  ;;  %p3366_p1 = scmp.lt.s32.totalorder %s40_s14, %s40_s14 }
   0x6   :  { %p3362_p0 = scmp.ne.s32.totalorder %s40_s14, %s3361_s15  ;;  %p3367_p2 = scmp.lt.s32.totalorder %s3361_s15, %s3361_s15 }
   0x8   :  { %p3368_p3 = por %p3367_p2, %p3366_p1 }
   0xa   :  { %p3369_p4 = pnand %p3368_p3, %p3362_p0 }
   0xc   :  { %3372 = shalt.err (!%p3369_p4)
}
   0xd   :  { %s3482_s16 = smov 128   ;;  %s3483_s17 = smov 8  }
   0xe   :  { %45 = dma.hbm_to_vmem [thread:$0]  %s5727_s2, 256, %s40_s14, [#allocation7], %s3482_s16, %s3482_s16, %s3483_s17  }
   0xf   :  { %s3484_s20 = smov [#allocation9]   ;;  %s3485_s22 = smov [#allocation3]  }
  0x10   :  { %s65_s21 = sshll.u32 %s3484_s20, 4  ;;  %s27_s23 = sshll.u32 %s3485_s22, 4  ;;  %s66_s21 = int_to_ptr.vmem [resolvable:$true] %s65_s21  ;;  %s28_s23 = int_to_ptr.vmem [resolvable:$true] %s27_s23 }
  0x11   :  { %s3381_s24 = scalar_lea.vmem %s66_s21, 256  ;;  %p3386_p6 = scmp.lt.s32.totalorder %s66_s21, %s66_s21 }
  0x12   :  { %p3382_p5 = scmp.ne.s32.totalorder %s66_s21, %s3381_s24  ;;  %p3387_p7 = scmp.lt.s32.totalorder %s3381_s24, %s3381_s24 }
  0x14   :  { %p3388_p8 = por %p3387_p7, %p3386_p6 }
  0x16   :  { %p3389_p9 = pnand %p3388_p8, %p3382_p5 }
  0x18   :  { %3392 = shalt.err (!%p3389_p9)
}
  0x19   :  { %s3486_s25 = smov 64   ;;  %s3487_s26 = smov 4  }
  0x1a   :  { %71 = dma.hbm_to_vmem [thread:$0]  %s5730_s5, 256, %s66_s21, [#allocation10], %s3486_s25, %s3486_s25, %s3487_s26  }
  0x1b   :  { %s3401_s2 = scalar_lea.vmem %s28_s23, 8192  ;;  %p3406_p11 = scmp.lt.s32.totalorder %s28_s23, %s28_s23 }
  0x1c   :  { %p3402_p10 = scmp.ne.s32.totalorder %s28_s23, %s3401_s2  ;;  %p3407_p12 = scmp.lt.s32.totalorder %s3401_s2, %s3401_s2 }
  0x1e   :  { %p3408_p13 = por %p3407_p12, %p3406_p11 }
  0x20   :  { %p3409_p0 = pnand %p3408_p13, %p3402_p10 }
  0x22   :  { %3412 = shalt.err (!%p3409_p0)
}
  0x23   :  { %33 = dma.hbm_to_vmem [thread:$0]  %s5726_s1, 8192, %s28_s23, [#allocation4], %s3482_s16, %s3482_s16, %s3483_s17  }
  0x24   :  { %s3488_s11 = smov [#allocation8]   ;;  %s3489_s13 = smov [#allocation11]  }
  0x25   :  { %s53_s12 = sshll.u32 %s3488_s11, 4  ;;  %s77_s14 = sshll.u32 %s3489_s13, 4  ;;  %s54_s12 = int_to_ptr.vmem [resolvable:$true] %s53_s12  ;;  %s78_s14 = int_to_ptr.vmem [resolvable:$true] %s77_s14 }
  0x26   :  { %s3421_s15 = scalar_lea.vmem %s54_s12, 256  ;;  %p3426_p2 = scmp.lt.s32.totalorder %s54_s12, %s54_s12 }
  0x27   :  { %p3422_p1 = scmp.ne.s32.totalorder %s54_s12, %s3421_s15  ;;  %p3427_p3 = scmp.lt.s32.totalorder %s3421_s15, %s3421_s15 }
  0x29   :  { %p3428_p4 = por %p3427_p3, %p3426_p2 }
  0x2b   :  { %p3429_p5 = pnand %p3428_p4, %p3422_p1 }
  0x2d   :  { %3432 = shalt.err (!%p3429_p5)
}
  0x2e   :  { %59 = dma.hbm_to_vmem [thread:$0]  %s5729_s4, 256, %s54_s12, [#allocation7], %s3486_s25, %s3486_s25, %s3487_s26  }
  0x2f   :  { %s3441_s1 = scalar_lea.vmem %s78_s14, 256  ;;  %p3446_p7 = scmp.lt.s32.totalorder %s78_s14, %s78_s14 }
  0x30   :  { %p3442_p6 = scmp.ne.s32.totalorder %s78_s14, %s3441_s1  ;;  %p3447_p8 = scmp.lt.s32.totalorder %s3441_s1, %s3441_s1 }
  0x32   :  { %p3448_p9 = por %p3447_p8, %p3446_p7 }
  0x34   :  { %p3449_p10 = pnand %p3448_p9, %p3442_p6 }
  0x36   :  { %3452 = shalt.err (!%p3449_p10)
}
  0x37   :  { %83 = dma.hbm_to_vmem [thread:$0]  %s5731_s6, 256, %s78_s14, [#allocation10], %s3486_s25, %s3486_s25, %s3487_s26  }
  0x38   :  { %3473 = dma.done.wait [#allocation4], 8192  }
  0x39   :  { %3474 = vsyncadd [#allocation4], 4294959104 }
  0x3a   :  { %3475 = dma.done.wait [#allocation7], 512  }
  0x3b   :  { %3476 = vsyncadd [#allocation7], 4294966784 }
  0x3c   :  { %3477 = dma.done.wait [#allocation10], 512  }
  0x3d   :  { %3478 = vsyncadd [#allocation10], 4294966784  ;;  %v5736_v0 = vlaneseq  ;;  %v3490_v1 = vmov 1966171168   ;;  %v3491_v6 = vmov 0.0   ;;  %v3592_v10 = vld [vmem:[#allocation3 + $0x10] sm:$0xff] }
  0x3e   :  { %v173_v2 = vunpack.c.l.s4 %v3490_v1  ;;  %3297 = vmatprep.subr.bf16.mxu0 %v3491_v6  ;;  %v3583_v7 = vld [vmem:[%s5725_s0] sm:$0x3]  ;;  %v3598_v13 = vld [vmem:[#allocation3 + $0x18] sm:$0xff]  ;;  %v3600_v14 = vld [vmem:[#allocation3 + $0x8] sm:$0xff]  ;;  %vm332_vm0 = vcmask 261120   ;;  %vm3492_vm1 = vmmov 0  }
  0x3f   :  { %v3575_v3 = vshrl.u32 %v5736_v0, 7  ;;  %v3596_v12 = vld [vmem:[#allocation3] sm:$0xff]  ;;  %3301 = vmatprep.mubr.msk.bf16.mxu0 %vm3492_vm1, %v3491_v6  ;;  %v3613_v20 = vld [vmem:[#allocation3 + $0x28] sm:$0xff]  ;;  %v3625_v28 = vld [vmem:[#allocation3 + $0x38] sm:$0xff]  ;;  %v717_v50 = vpack.c.bf16 %v3583_v7, %v3583_v7  ;;  %vm2282_vm2 = vcmask 130112   ;;  %vm2289_vm3 = vcmask 195712  }
  0x40   :  { %v174_v4 = vunpack.c.0.s8 %v173_v2  ;;  %v3615_v21 = vld [vmem:[#allocation3 + $0x20] sm:$0xff]  ;;  %v3627_v29 = vld [vmem:[#allocation3 + $0x30] sm:$0xff]  ;;  %v3635_v34 = vld [vmem:[#allocation3 + $0x48] sm:$0xff]  ;;  %vm2296_vm4 = vcmask 261312   ;;  %vm2887_vm5 = vcmask 1041409   ;;  %vm2889_vm6 = vcmask 1042434  }
  0x41   :  { %5775 = vst [vmem:[#allocation17_spill] sm:$0xff] %v3575_v3  ;;  %v3590_v9 = vsub.s32 0, %v3575_v3  ;;  %v3637_v35 = vld [vmem:[#allocation3 + $0x40] sm:$0xff]  ;;  %v3337_v40 = vld [vmem:[#allocation8 + $0x8] sm:$0xff]   ;;  %v3647_v42 = vld [vmem:[#allocation3 + $0x50] sm:$0xff]  ;;  %vm2891_vm7 = vcmask 1043459  }
  0x42   :  { %v3578_v5 = vsub.s32 %v174_v4, %v3575_v3  ;;  %v3645_v41 = vld [vmem:[#allocation3 + $0x58] sm:$0xff]  ;;  %3298 = vmatpush3.bf16.msra.mxu0 %v3337_v40  ;;  %v3338_v43 = vld [vmem:[#allocation8] sm:$0xff]   ;;  %v3651_v46 = vld [vmem:[#allocation3 + $0x68] sm:$0xff]  ;;  %vm2893_vm8 = vcmask 1044484   ;;  %vm2895_vm9 = vcmask 1045509   ;;  %vm2897_vm10 = vcmask 1046534  }
  0x43   :  { %5776 = vst [vmem:[#allocation18_spill] sm:$0xff] %v3590_v9  ;;  %v3653_v47 = vld [vmem:[#allocation3 + $0x60] sm:$0xff]  ;;  %3299 = vmatprep.subr.bf16.mxu0 %v3491_v6  ;;  %v3667_v55 = vld [vmem:[#allocation3 + $0x78] sm:$0xff]  ;;  %v3669_v56 = vld [vmem:[#allocation3 + $0x70] sm:$0xff]  ;;  %vm2899_vm11 = vcmask 1047559   ;;  %vm3132_vm12 = vcmask 123904  }
  0x44   :  { %v3587_v8 = vrot.slane %v3583_v7, %v3578_v5  ;;  %v3678_v61 = vld [vmem:[#allocation3 + $0x88] sm:$0xff]  ;;  %v3680_v62 = vld [vmem:[#allocation3 + $0x80] sm:$0xff]  ;;  %v3688_v6 = vld [vmem:[#allocation3 + $0x98] sm:$0xff] }
  0x45   :  { %v3690_v7 = vld [vmem:[#allocation3 + $0x90] sm:$0xff] }
  0x46   :  { %v186_v11 = vrot.slane %v3587_v8, %v3578_v5  ;;  %3300 = vmatpush3.bf16.msra.mxu0 %v3338_v43 }
  0x48   :  { %v3603_v15 = vrot.slane %v186_v11, %v3590_v9 }
  0x49   :  { %3302 = vmatmul.mubr.msk.bf16.vlgmr.msra.gmra.mxu0 %vm332_vm0, %v717_v50 }
  0x4a   :  { %v206_v16 = vmul.f32 %v3603_v15, %v3592_v10  ;;  %v204_v17 = vmul.f32 %v3603_v15, %v3596_v12  ;;  %v207_v18 = vmul.f32 %v3603_v15, %v3598_v13  ;;  %v205_v19 = vmul.f32 %v3603_v15, %v3600_v14 }
  0x4b   :  { %v209_v26 = vmul.f32 %v3603_v15, %v3613_v20  ;;  %v208_v27 = vmul.f32 %v3603_v15, %v3615_v21  ;;  %v211_v30 = vmul.f32 %v3603_v15, %v3625_v28  ;;  %v210_v33 = vmul.f32 %v3603_v15, %v3627_v29 }
  0x4c   :  { %v339_v22 = vsel %vm332_vm0, %v206_v16, 0.0  ;;  %v333_v23 = vsel %vm332_vm0, %v204_v17, 0.0  ;;  %v342_v24 = vsel %vm332_vm0, %v207_v18, 0.0  ;;  %v336_v25 = vsel %vm332_vm0, %v205_v19, 0.0  ;;  %v3698_v19 = vld [vmem:[#allocation3 + $0xa8] sm:$0xff] }
  0x4d   :  { %340 = vadd.xlane.f32.xlu1 %v339_v22  ;;  %334 = vadd.xlane.f32.xlu0 %v333_v23  ;;  %v348_v31 = vsel %vm332_vm0, %v209_v26, 0.0  ;;  %v345_v32 = vsel %vm332_vm0, %v208_v27, 0.0  ;;  %v354_v36 = vsel %vm332_vm0, %v211_v30, 0.0  ;;  %v213_v37 = vmul.f32 %v3603_v15, %v3635_v34  ;;  %v3700_v22 = vld [vmem:[#allocation3 + $0xa0] sm:$0xff]  ;;  %v3708_v27 = vld [vmem:[#allocation3 + $0xb8] sm:$0xff]  ;;  %v3710_v30 = vld [vmem:[#allocation3 + $0xb0] sm:$0xff] }
  0x4e   :  { %v212_v38 = vmul.f32 %v3603_v15, %v3637_v35  ;;  %v351_v39 = vsel %vm332_vm0, %v210_v33, 0.0  ;;  %v215_v48 = vmul.f32 %v3603_v15, %v3645_v41  ;;  %v214_v49 = vmul.f32 %v3603_v15, %v3647_v42 }
  0x4f   :  { %v360_v44 = vsel %vm332_vm0, %v213_v37, 0.0  ;;  %v217_v53 = vmul.f32 %v3603_v15, %v3651_v46  ;;  %v216_v54 = vmul.f32 %v3603_v15, %v3653_v47  ;;  %v219_v59 = vmul.f32 %v3603_v15, %v3667_v55  ;;  %v3718_v37 = vld [vmem:[#allocation3 + $0xc8] sm:$0xff] }
  0x50   :  { %v357_v45 = vsel %vm332_vm0, %v212_v38, 0.0  ;;  %v366_v51 = vsel %vm332_vm0, %v215_v48, 0.0  ;;  %v363_v52 = vsel %vm332_vm0, %v214_v49, 0.0  ;;  %v218_v60 = vmul.f32 %v3603_v15, %v3669_v56  ;;  %v3720_v38 = vld [vmem:[#allocation3 + $0xc0] sm:$0xff]  ;;  %v3730_v48 = vld [vmem:[#allocation3 + $0xd0] sm:$0xff] }
  0x51   :  { %343 = vadd.xlane.f32.xlu1 %v342_v24  ;;  %337 = vadd.xlane.f32.xlu0 %v336_v25  ;;  %v372_v57 = vsel %vm332_vm0, %v217_v53, 0.0  ;;  %v369_v58 = vsel %vm332_vm0, %v216_v54, 0.0  ;;  %v378_v63 = vsel %vm332_vm0, %v219_v59, 0.0  ;;  %v221_v2 = vmul.f32 %v3603_v15, %v3678_v61  ;;  %v3738_v53 = vld [vmem:[#allocation3 + $0xe8] sm:$0xff]  ;;  %v3740_v54 = vld [vmem:[#allocation3 + $0xe0] sm:$0xff] }
  0x52   :  { %v375_v1 = vsel %vm332_vm0, %v218_v60, 0.0  ;;  %v220_v4 = vmul.f32 %v3603_v15, %v3680_v62  ;;  %v223_v17 = vmul.f32 %v3603_v15, %v3688_v6  ;;  %v222_v18 = vmul.f32 %v3603_v15, %v3690_v7 }
  0x53   :  { %v384_v11 = vsel %vm332_vm0, %v221_v2, 0.0  ;;  %v225_v25 = vmul.f32 %v3603_v15, %v3698_v19  ;;  %v224_v26 = vmul.f32 %v3603_v15, %v3700_v22  ;;  %v227_v33 = vmul.f32 %v3603_v15, %v3708_v27 }
  0x54   :  { %v381_v16 = vsel %vm332_vm0, %v220_v4, 0.0  ;;  %v390_v23 = vsel %vm332_vm0, %v223_v17, 0.0  ;;  %v387_v24 = vsel %vm332_vm0, %v222_v18, 0.0  ;;  %v229_v43 = vmul.f32 %v3603_v15, %v3718_v37  ;;  %v140_v17 = vld [vmem:[#allocation3 + $0x108] sm:$0xff]  ;;  %v139_v18 = vld [vmem:[#allocation3 + $0x100] sm:$0xff] }
  0x55   :  { %349 = vadd.xlane.f32.xlu1 %v348_v31  ;;  %346 = vadd.xlane.f32.xlu0 %v345_v32  ;;  %v396_v31 = vsel %vm332_vm0, %v225_v25, 0.0  ;;  %v393_v32 = vsel %vm332_vm0, %v224_v26, 0.0  ;;  %v233_v59 = vmul.f32 %v3603_v15, %v3738_v53  ;;  %v232_v60 = vmul.f32 %v3603_v15, %v3740_v54 }
  0x56   :  { %v408_v49 = vsel %vm332_vm0, %v229_v43, 0.0  ;;  %v237_v25 = vmul.f32 %v3603_v15, %v140_v17  ;;  %v236_v26 = vmul.f32 %v3603_v15, %v139_v18  ;;  %v144_v43 = vld [vmem:[#allocation3 + $0x128] sm:$0xff] }
  0x57   :  { %v420_v2 = vsel %vm332_vm0, %v233_v59, 0.0  ;;  %v417_v4 = vsel %vm332_vm0, %v232_v60, 0.0  ;;  %v3780_v59 = vld [vmem:[#allocation3 + $0x130] sm:$0xff] }
  0x59   :  { %355 = vadd.xlane.f32.xlu1 %v354_v36  ;;  %352 = vadd.xlane.f32.xlu0 %v351_v39  ;;  %v226_v36 = vmul.f32 %v3603_v15, %v3710_v30  ;;  %v402_v39 = vsel %vm332_vm0, %v227_v33, 0.0  ;;  %v432_v33 = vsel %vm332_vm0, %v237_v25, 0.0 }
  0x5b   :  { %v399_v40 = vsel %vm332_vm0, %v226_v36, 0.0  ;;  %v429_v36 = vsel %vm332_vm0, %v236_v26, 0.0 }
  0x5d   :  { %361 = vadd.xlane.f32.xlu1 %v360_v44  ;;  %358 = vadd.xlane.f32.xlu0 %v357_v45  ;;  %v228_v44 = vmul.f32 %v3603_v15, %v3720_v38  ;;  %v3728_v45 = vld [vmem:[#allocation3 + $0xd8] sm:$0xff] }
  0x5f   :  { %v405_v50 = vsel %vm332_vm0, %v228_v44, 0.0  ;;  %v143_v44 = vld [vmem:[#allocation3 + $0x120] sm:$0xff] }
  0x61   :  { %367 = vadd.xlane.f32.xlu1 %v366_v51  ;;  %364 = vadd.xlane.f32.xlu0 %v363_v52  ;;  %v231_v51 = vmul.f32 %v3603_v15, %v3728_v45  ;;  %v230_v52 = vmul.f32 %v3603_v15, %v3730_v48 }
  0x65   :  { %373 = vadd.xlane.f32.xlu1 %v372_v57  ;;  %370 = vadd.xlane.f32.xlu0 %v369_v58  ;;  %v414_v57 = vsel %vm332_vm0, %v231_v51, 0.0  ;;  %v411_v58 = vsel %vm332_vm0, %v230_v52, 0.0  ;;  %v241_v52 = vmul.f32 %v3603_v15, %v144_v43 }
  0x69   :  { %379 = vadd.xlane.f32.xlu1 %v378_v63  ;;  %376 = vadd.xlane.f32.xlu0 %v375_v1  ;;  %v3748_v63 = vld [vmem:[#allocation3 + $0xf8] sm:$0xff]  ;;  %v3750_v1 = vld [vmem:[#allocation3 + $0xf0] sm:$0xff] }
  0x6d   :  { %385 = vadd.xlane.f32.xlu1 %v384_v11  ;;  %382 = vadd.xlane.f32.xlu0 %v381_v16  ;;  %v235_v11 = vmul.f32 %v3603_v15, %v3748_v63  ;;  %v234_v16 = vmul.f32 %v3603_v15, %v3750_v1 }
  0x71   :  { %391 = vadd.xlane.f32.xlu1 %v390_v23  ;;  %388 = vadd.xlane.f32.xlu0 %v387_v24  ;;  %v426_v23 = vsel %vm332_vm0, %v235_v11, 0.0  ;;  %v423_v24 = vsel %vm332_vm0, %v234_v16, 0.0  ;;  %v3789_v16 = vld [vmem:[#allocation3 + $0x148] sm:$0xff] }
  0x72   :  { %v245_v26 = vmul.f32 %v3603_v15, %v3789_v16 }
  0x75   :  { %397 = vadd.xlane.f32.xlu1 %v396_v31  ;;  %394 = vadd.xlane.f32.xlu0 %v393_v32  ;;  %v3762_v31 = vld [vmem:[#allocation3 + $0x118] sm:$0xff]  ;;  %v3764_v32 = vld [vmem:[#allocation3 + $0x110] sm:$0xff] }
  0x79   :  { %403 = vadd.xlane.f32.xlu1 %v402_v39  ;;  %400 = vadd.xlane.f32.xlu0 %v399_v40  ;;  %v239_v39 = vmul.f32 %v3603_v15, %v3762_v31  ;;  %v238_v40 = vmul.f32 %v3603_v15, %v3764_v32 }
  0x7b   :  { %v435_v51 = vsel %vm332_vm0, %v238_v40, 0.0 }
  0x7d   :  { %409 = vadd.xlane.f32.xlu1 %v408_v49  ;;  %406 = vadd.xlane.f32.xlu0 %v405_v50  ;;  %v179_v49 = vcombine.high %v3587_v8, %v3587_v8  ;;  %v438_v50 = vsel %vm332_vm0, %v239_v39, 0.0  ;;  %v456_v39 = vsel %vm332_vm0, %v245_v26, 0.0 }
  0x7f   :  { %v193_v11 = vrot.slane %v179_v49, %v3578_v5 }
  0x81   :  { %415 = vadd.xlane.f32.xlu1 %v414_v57  ;;  %412 = vadd.xlane.f32.xlu0 %v411_v58  ;;  %v240_v57 = vmul.f32 %v3603_v15, %v143_v44  ;;  %v3778_v58 = vld [vmem:[#allocation3 + $0x138] sm:$0xff] }
  0x82   :  { %v243_v60 = vmul.f32 %v3603_v15, %v3778_v58 }
  0x83   :  { %v441_v8 = vsel %vm332_vm0, %v240_v57, 0.0 }
  0x85   :  { %421 = vadd.xlane.f32.xlu1 %v420_v2  ;;  %418 = vadd.xlane.f32.xlu0 %v417_v4  ;;  %v444_v2 = vsel %vm332_vm0, %v241_v52, 0.0  ;;  %v242_v4 = vmul.f32 %v3603_v15, %v3780_v59 }
  0x87   :  { %v447_v25 = vsel %vm332_vm0, %v242_v4, 0.0 }
  0x89   :  { %427 = vadd.xlane.f32.xlu1 %v426_v23  ;;  %424 = vadd.xlane.f32.xlu0 %v423_v24  ;;  %v3791_v23 = vld [vmem:[#allocation3 + $0x140] sm:$0xff]  ;;  %v450_v24 = vsel %vm332_vm0, %v243_v60, 0.0 }
  0x8d   :  { %433 = vadd.xlane.f32.xlu1 %v432_v33  ;;  %430 = vadd.xlane.f32.xlu0 %v429_v36  ;;  %v244_v33 = vmul.f32 %v3603_v15, %v3791_v23  ;;  %v3800_v36 = vrot.slane %v193_v11, %v3590_v9 }
  0x8f   :  { %v453_v40 = vsel %vm332_vm0, %v244_v33, 0.0  ;;  %v269_v49 = vmul.f32 %v3800_v36, %v3600_v14  ;;  %v273_v57 = vmul.f32 %v3800_v36, %v3613_v20  ;;  %v272_v60 = vmul.f32 %v3800_v36, %v3615_v21 }
  0x90   :  { %v305_v20 = vmul.f32 %v3800_v36, %v144_v43  ;;  %v304_v21 = vmul.f32 %v3800_v36, %v143_v44  ;;  %v3834_v43 = vld [vmem:[#allocation3 + $0x160] sm:$0xff] }
  0x91   :  { %439 = vadd.xlane.f32.xlu1 %v438_v50  ;;  %436 = vadd.xlane.f32.xlu0 %v435_v51  ;;  %v268_v50 = vmul.f32 %v3800_v36, %v3596_v12  ;;  %v528_v51 = vsel %vm332_vm0, %v269_v49, 0.0  ;;  %v537_v14 = vsel %vm332_vm0, %v272_v60, 0.0  ;;  %v301_v12 = vmul.f32 %v3800_v36, %v140_v17 }
  0x92   :  { %v636_v17 = vsel %vm332_vm0, %v305_v20, 0.0  ;;  %v270_v60 = vmul.f32 %v3800_v36, %v3592_v10  ;;  %v277_v10 = vmul.f32 %v3800_v36, %v3635_v34 }
  0x93   :  { %v525_v52 = vsel %vm332_vm0, %v268_v50, 0.0  ;;  %v624_v4 = vsel %vm332_vm0, %v301_v12, 0.0  ;;  %v248_v50 = vmul.f32 %v3603_v15, %v3834_v43  ;;  %v275_v12 = vmul.f32 %v3800_v36, %v3625_v28 }
  0x94   :  { %v552_v20 = vsel %vm332_vm0, %v277_v10, 0.0 }
  0x95   :  { %445 = vadd.xlane.f32.xlu1 %v444_v2  ;;  %442 = vadd.xlane.f32.xlu0 %v441_v8  ;;  %v540_v2 = vsel %vm332_vm0, %v273_v57, 0.0  ;;  %v300_v8 = vmul.f32 %v3800_v36, %v139_v18  ;;  %v633_v18 = vsel %vm332_vm0, %v304_v21, 0.0  ;;  %v271_v57 = vmul.f32 %v3800_v36, %v3598_v13 }
  0x96   :  { %v302_v21 = vmul.f32 %v3800_v36, %v3764_v32  ;;  %v309_v32 = vmul.f32 %v3800_v36, %v3789_v16  ;;  %v3888_v16 = vld [vmem:[#allocation3 + $0x188] sm:$0xff] }
  0x97   :  { %v621_v11 = vsel %vm332_vm0, %v300_v8, 0.0  ;;  %v274_v8 = vmul.f32 %v3800_v36, %v3627_v29  ;;  %v303_v29 = vmul.f32 %v3800_v36, %v3762_v31 }
  0x98   :  { %v627_v34 = vsel %vm332_vm0, %v302_v21, 0.0 }
  0x99   :  { %451 = vadd.xlane.f32.xlu1 %v450_v24  ;;  %448 = vadd.xlane.f32.xlu0 %v447_v25  ;;  %v3822_v24 = vld [vmem:[#allocation3 + $0x158] sm:$0xff]  ;;  %v3824_v25 = vld [vmem:[#allocation3 + $0x150] sm:$0xff]  ;;  %v543_v13 = vsel %vm332_vm0, %v274_v8, 0.0  ;;  %v278_v8 = vmul.f32 %v3800_v36, %v3647_v42 }
  0x9a   :  { %v247_v26 = vmul.f32 %v3603_v15, %v3822_v24  ;;  %v246_v33 = vmul.f32 %v3603_v15, %v3824_v25 }
  0x9c   :  { %v462_v44 = vsel %vm332_vm0, %v247_v26, 0.0 }
  0x9d   :  { %457 = vadd.xlane.f32.xlu1 %v456_v39  ;;  %454 = vadd.xlane.f32.xlu0 %v453_v40  ;;  %v3832_v39 = vld [vmem:[#allocation3 + $0x168] sm:$0xff]  ;;  %v459_v40 = vsel %vm332_vm0, %v246_v33, 0.0  ;;  %v308_v33 = vmul.f32 %v3800_v36, %v3791_v23 }
  0x9e   :  { %v249_v49 = vmul.f32 %v3603_v15, %v3832_v39 }
  0xa1   :  { %529 = vadd.xlane.f32.xlu1 %v528_v51  ;;  %526 = vadd.xlane.f32.xlu0 %v525_v52  ;;  %v468_v51 = vsel %vm332_vm0, %v249_v49, 0.0  ;;  %v465_v52 = vsel %vm332_vm0, %v248_v50, 0.0 }
  0xa5   :  { %541 = vadd.xlane.f32.xlu1 %v540_v2  ;;  %538 = vadd.xlane.f32.xlu0 %v537_v14  ;;  %v534_v2 = vsel %vm332_vm0, %v271_v57, 0.0  ;;  %v531_v14 = vsel %vm332_vm0, %v270_v60, 0.0  ;;  %v253_v57 = vmul.f32 %v3603_v15, %v3888_v16 }
  0xa9   :  { %625 = vadd.xlane.f32.xlu1 %v624_v4  ;;  %622 = vadd.xlane.f32.xlu0 %v621_v11  ;;  %v546_v4 = vsel %vm332_vm0, %v275_v12, 0.0  ;;  %v276_v11 = vmul.f32 %v3800_v36, %v3637_v35  ;;  %v307_v35 = vmul.f32 %v3800_v36, %v3778_v58  ;;  %v648_v58 = vsel %vm332_vm0, %v309_v32, 0.0  ;;  %v3936_v32 = vld [vmem:[#allocation3 + $0x190] sm:$0xff] }
  0xaa   :  { %v279_v12 = vmul.f32 %v3800_v36, %v3645_v41 }
  0xab   :  { %v549_v28 = vsel %vm332_vm0, %v276_v11, 0.0  ;;  %v642_v26 = vsel %vm332_vm0, %v307_v35, 0.0  ;;  %v555_v11 = vsel %vm332_vm0, %v278_v8, 0.0 }
  0xac   :  { %v558_v10 = vsel %vm332_vm0, %v279_v12, 0.0 }
  0xad   :  { %637 = vadd.xlane.f32.xlu1 %v636_v17  ;;  %634 = vadd.xlane.f32.xlu0 %v633_v18  ;;  %v630_v17 = vsel %vm332_vm0, %v303_v29, 0.0  ;;  %v306_v18 = vmul.f32 %v3800_v36, %v3780_v59  ;;  %v645_v59 = vsel %vm332_vm0, %v308_v33, 0.0 }
  0xaf   :  { %v639_v31 = vsel %vm332_vm0, %v306_v18, 0.0 }
  0xb1   :  { %463 = vadd.xlane.f32.xlu1 %v462_v44  ;;  %460 = vadd.xlane.f32.xlu0 %v459_v40  ;;  %v3878_v44 = vld [vmem:[#allocation3 + $0x178] sm:$0xff]  ;;  %v3880_v40 = vld [vmem:[#allocation3 + $0x170] sm:$0xff] }
  0xb2   :  { %v251_v49 = vmul.f32 %v3603_v15, %v3878_v44  ;;  %v250_v50 = vmul.f32 %v3603_v15, %v3880_v40 }
  0xb4   :  { %v474_v23 = vsel %vm332_vm0, %v251_v49, 0.0  ;;  %v3948_v49 = vld [vmem:[#allocation3 + $0x1a8] sm:$0xff] }
  0xb5   :  { %469 = vadd.xlane.f32.xlu1 %v468_v51  ;;  %466 = vadd.xlane.f32.xlu0 %v465_v52  ;;  %v3890_v51 = vld [vmem:[#allocation3 + $0x180] sm:$0xff]  ;;  %v471_v52 = vsel %vm332_vm0, %v250_v50, 0.0 }
  0xb6   :  { %v252_v60 = vmul.f32 %v3603_v15, %v3890_v51  ;;  %v3950_v50 = vld [vmem:[#allocation3 + $0x1a0] sm:$0xff] }
  0xb9   :  { %535 = vadd.xlane.f32.xlu1 %v534_v2  ;;  %532 = vadd.xlane.f32.xlu0 %v531_v14  ;;  %v480_v2 = vsel %vm332_vm0, %v253_v57, 0.0  ;;  %v477_v14 = vsel %vm332_vm0, %v252_v60, 0.0 }
  0xbd   :  { %547 = vadd.xlane.f32.xlu1 %v546_v4  ;;  %544 = vadd.xlane.f32.xlu0 %v543_v13 }
  0xc1   :  { %553 = vadd.xlane.f32.xlu1 %v552_v20  ;;  %550 = vadd.xlane.f32.xlu0 %v549_v28  ;;  %v281_v20 = vmul.f32 %v3800_v36, %v3651_v46  ;;  %v280_v28 = vmul.f32 %v3800_v36, %v3653_v47 }
  0xc3   :  { %v564_v29 = vsel %vm332_vm0, %v281_v20, 0.0  ;;  %v561_v21 = vsel %vm332_vm0, %v280_v28, 0.0  ;;  %v283_v20 = vmul.f32 %v3800_v36, %v3667_v55  ;;  %v282_v28 = vmul.f32 %v3800_v36, %v3669_v56 }
  0xc5   :  { %631 = vadd.xlane.f32.xlu1 %v630_v17  ;;  %628 = vadd.xlane.f32.xlu0 %v627_v34  ;;  %v311_v17 = vmul.f32 %v3800_v36, %v3822_v24  ;;  %v310_v34 = vmul.f32 %v3800_v36, %v3824_v25  ;;  %v3934_v24 = vld [vmem:[#allocation3 + $0x198] sm:$0xff] }
  0xc7   :  { %v654_v35 = vsel %vm332_vm0, %v311_v17, 0.0  ;;  %v651_v18 = vsel %vm332_vm0, %v310_v34, 0.0  ;;  %v570_v17 = vsel %vm332_vm0, %v283_v20, 0.0  ;;  %v567_v34 = vsel %vm332_vm0, %v282_v28, 0.0  ;;  %v4016_v20 = vld [vmem:[#allocation3 + $0x1c8] sm:$0xff]  ;;  %v4018_v28 = vld [vmem:[#allocation3 + $0x1c0] sm:$0xff] }
  0xc9   :  { %643 = vadd.xlane.f32.xlu1 %v642_v26  ;;  %640 = vadd.xlane.f32.xlu0 %v639_v31  ;;  %v313_v26 = vmul.f32 %v3800_v36, %v3832_v39  ;;  %v312_v31 = vmul.f32 %v3800_v36, %v3834_v43  ;;  %v255_v39 = vmul.f32 %v3603_v15, %v3934_v24 }
  0xca   :  { %v254_v43 = vmul.f32 %v3603_v15, %v3936_v32 }
  0xcb   :  { %v486_v57 = vsel %vm332_vm0, %v255_v39, 0.0 }
  0xcc   :  { %v483_v60 = vsel %vm332_vm0, %v254_v43, 0.0 }
  0xcd   :  { %649 = vadd.xlane.f32.xlu1 %v648_v58  ;;  %646 = vadd.xlane.f32.xlu0 %v645_v59  ;;  %v660_v58 = vsel %vm332_vm0, %v313_v26, 0.0  ;;  %v657_v59 = vsel %vm332_vm0, %v312_v31, 0.0 }
  0xd1   :  { %475 = vadd.xlane.f32.xlu1 %v474_v23  ;;  %472 = vadd.xlane.f32.xlu0 %v471_v52 }
  0xd5   :  { %481 = vadd.xlane.f32.xlu1 %v480_v2  ;;  %478 = vadd.xlane.f32.xlu0 %v477_v14  ;;  %v257_v2 = vmul.f32 %v3603_v15, %v3948_v49  ;;  %v256_v14 = vmul.f32 %v3603_v15, %v3950_v50 }
  0xd6   :  { %v3904_v4 = vpop.xlane.xlu1 %340  ;;  %v3906_v13 = vpop.xlane.xlu0 %334 }
  0xd9   :  { %559 = vadd.xlane.f32.xlu1 %v558_v10  ;;  %556 = vadd.xlane.f32.xlu0 %v555_v11  ;;  %v492_v10 = vsel %vm332_vm0, %v257_v2, 0.0  ;;  %v489_v11 = vsel %vm332_vm0, %v256_v14, 0.0  ;;  %v4004_v2 = vld [vmem:[#allocation3 + $0x1b0] sm:$0xff] }
  0xda   :  { %v3914_v41 = vpop.xlane.xlu1 %343  ;;  %v3916_v42 = vpop.xlane.xlu0 %337 }
  0xdd   :  { %565 = vadd.xlane.f32.xlu1 %v564_v29  ;;  %562 = vadd.xlane.f32.xlu0 %v561_v21 }
  0xde   :  { %v3924_v46 = vpop.xlane.xlu1 %349  ;;  %v3926_v47 = vpop.xlane.xlu0 %346 }
  0xe1   :  { %655 = vadd.xlane.f32.xlu1 %v654_v35  ;;  %652 = vadd.xlane.f32.xlu0 %v651_v18  ;;  %v285_v35 = vmul.f32 %v3800_v36, %v3678_v61  ;;  %v284_v18 = vmul.f32 %v3800_v36, %v3680_v62 }
  0xe2   :  { %v3938_v25 = vpop.xlane.xlu1 %355  ;;  %v3940_v33 = vpop.xlane.xlu0 %352 }
  0xe3   :  { %v576_v26 = vsel %vm332_vm0, %v285_v35, 0.0  ;;  %v573_v31 = vsel %vm332_vm0, %v284_v18, 0.0 }
  0xe5   :  { %661 = vadd.xlane.f32.xlu1 %v660_v58  ;;  %658 = vadd.xlane.f32.xlu0 %v657_v59  ;;  %v315_v58 = vmul.f32 %v3800_v36, %v3878_v44  ;;  %v314_v59 = vmul.f32 %v3800_v36, %v3880_v40  ;;  %v4002_v44 = vld [vmem:[#allocation3 + $0x1b8] sm:$0xff] }
  0xe6   :  { %v3952_v23 = vpop.xlane.xlu1 %361  ;;  %v3954_v52 = vpop.xlane.xlu0 %358 }
  0xe7   :  { %v666_v39 = vsel %vm332_vm0, %v315_v58, 0.0  ;;  %v663_v43 = vsel %vm332_vm0, %v314_v59, 0.0 }
  0xe9   :  { %487 = vadd.xlane.f32.xlu1 %v486_v57  ;;  %484 = vadd.xlane.f32.xlu0 %v483_v60  ;;  %v317_v57 = vmul.f32 %v3800_v36, %v3888_v16  ;;  %v316_v60 = vmul.f32 %v3800_v36, %v3890_v51  ;;  %v259_v16 = vmul.f32 %v3603_v15, %v4002_v44 }
  0xea   :  { %v3962_v12 = vpop.xlane.xlu1 %367  ;;  %v3964_v8 = vpop.xlane.xlu0 %364  ;;  %v258_v51 = vmul.f32 %v3603_v15, %v4004_v2 }
  0xeb   :  { %5777 = vst [vmem:[#allocation19_spill] sm:$0xff] %v3962_v12  ;;  %5778 = vst [vmem:[#allocation20_spill] sm:$0xff] %v3964_v8  ;;  %v498_v35 = vsel %vm332_vm0, %v259_v16, 0.0 }
  0xec   :  { %v495_v18 = vsel %vm332_vm0, %v258_v51, 0.0 }
  0xed   :  { %493 = vadd.xlane.f32.xlu1 %v492_v10  ;;  %490 = vadd.xlane.f32.xlu0 %v489_v11  ;;  %v672_v10 = vsel %vm332_vm0, %v317_v57, 0.0  ;;  %v669_v11 = vsel %vm332_vm0, %v316_v60, 0.0  ;;  %v287_v57 = vmul.f32 %v3800_v36, %v3688_v6  ;;  %v286_v60 = vmul.f32 %v3800_v36, %v3690_v7 }
  0xee   :  { %v3972_v29 = vpop.xlane.xlu1 %373  ;;  %v3974_v21 = vpop.xlane.xlu0 %370 }
  0xef   :  { %5779 = vst [vmem:[#allocation21_spill] sm:$0xff] %v3972_v29  ;;  %5780 = vst [vmem:[#allocation22_spill] sm:$0xff] %v3974_v21  ;;  %v582_v16 = vsel %vm332_vm0, %v287_v57, 0.0  ;;  %v579_v51 = vsel %vm332_vm0, %v286_v60, 0.0 }
  0xf1   :  { %571 = vadd.xlane.f32.xlu1 %v570_v17  ;;  %568 = vadd.xlane.f32.xlu0 %v567_v34 }
  0xf2   :  { %v3982_v55 = vpop.xlane.xlu1 %379  ;;  %v3984_v56 = vpop.xlane.xlu0 %376 }
  0xf3   :  { %5781 = vst [vmem:[#allocation23_spill] sm:$0xff] %v3982_v55  ;;  %5782 = vst [vmem:[#allocation24_spill] sm:$0xff] %v3984_v56 }
  0xf5   :  { %577 = vadd.xlane.f32.xlu1 %v576_v26  ;;  %574 = vadd.xlane.f32.xlu0 %v573_v31  ;;  %v261_v26 = vmul.f32 %v3603_v15, %v4016_v20  ;;  %v260_v31 = vmul.f32 %v3603_v15, %v4018_v28 }
  0xf6   :  { %v3992_v61 = vpop.xlane.xlu1 %385  ;;  %v3994_v62 = vpop.xlane.xlu0 %382 }
  0xf7   :  { %5783 = vst [vmem:[#allocation25_spill] sm:$0xff] %v3992_v61  ;;  %5784 = vst [vmem:[#allocation26_spill] sm:$0xff] %v3994_v62 }
  0xf9   :  { %667 = vadd.xlane.f32.xlu1 %v666_v39  ;;  %664 = vadd.xlane.f32.xlu0 %v663_v43  ;;  %v504_v39 = vsel %vm332_vm0, %v261_v26, 0.0  ;;  %v501_v43 = vsel %vm332_vm0, %v260_v31, 0.0 }
  0xfa   :  { %v4006_v40 = vpop.xlane.xlu1 %391  ;;  %v4008_v14 = vpop.xlane.xlu0 %388 }
  0xfb   :  { %5785 = vst [vmem:[#allocation27_spill] sm:$0xff] %v4006_v40  ;;  %5786 = vst [vmem:[#allocation28_spill] sm:$0xff] %v4008_v14  ;;  %v4241_v14 = vld [vmem:[#allocation6 + $0x8] sm:$0xff] }
  0xfc   :  { %v936_v61 = vrot.slane %v4241_v14, %v3590_v9 }
  0xfd   :  { %673 = vadd.xlane.f32.xlu1 %v672_v10  ;;  %670 = vadd.xlane.f32.xlu0 %v669_v11 }
  0xfe   :  { %v4020_v17 = vpop.xlane.xlu1 %397  ;;  %v4022_v34 = vpop.xlane.xlu0 %394 }
  0xff   :  { %5787 = vst [vmem:[#allocation29_spill] sm:$0xff] %v4020_v17  ;;  %5788 = vst [vmem:[#allocation30_spill] sm:$0xff] %v4022_v34 }
 0x101   :  { %499 = vadd.xlane.f32.xlu1 %v498_v35  ;;  %496 = vadd.xlane.f32.xlu0 %v495_v18  ;;  %v289_v35 = vmul.f32 %v3800_v36, %v3698_v19  ;;  %v288_v18 = vmul.f32 %v3800_v36, %v3700_v22 }
 0x102   :  { %v4030_v58 = vpop.xlane.xlu1 %403  ;;  %v4032_v59 = vpop.xlane.xlu0 %400 }
 0x103   :  { %5789 = vst [vmem:[#allocation31_spill] sm:$0xff] %v4030_v58  ;;  %5790 = vst [vmem:[#allocation32_spill] sm:$0xff] %v4032_v59  ;;  %v588_v26 = vsel %vm332_vm0, %v289_v35, 0.0  ;;  %v585_v31 = vsel %vm332_vm0, %v288_v18, 0.0  ;;  %v4072_v35 = vld [vmem:[#allocation3 + $0x1d0] sm:$0xff]  ;;  %v295_v59 = vmul.f32 %v3800_v36, %v3728_v45 }
 0x105   :  { %505 = vadd.xlane.f32.xlu1 %v504_v39  ;;  %502 = vadd.xlane.f32.xlu0 %v501_v43  ;;  %v319_v39 = vmul.f32 %v3800_v36, %v3934_v24  ;;  %v318_v43 = vmul.f32 %v3800_v36, %v3936_v32  ;;  %v4070_v24 = vld [vmem:[#allocation3 + $0x1d8] sm:$0xff] }
 0x106   :  { %v4040_v10 = vpop.xlane.xlu1 %409  ;;  %v4042_v11 = vpop.xlane.xlu0 %406 }
 0x107   :  { %5791 = vst [vmem:[#allocation33_spill] sm:$0xff] %v4040_v10  ;;  %5792 = vst [vmem:[#allocation34_spill] sm:$0xff] %v4042_v11  ;;  %v678_v57 = vsel %vm332_vm0, %v319_v39, 0.0  ;;  %v675_v60 = vsel %vm332_vm0, %v318_v43, 0.0  ;;  %v4084_v39 = vld [vmem:[#allocation3 + $0x1e8] sm:$0xff]  ;;  %v4086_v43 = vld [vmem:[#allocation3 + $0x1e0] sm:$0xff] }
 0x108   :  { %v265_v0 = vmul.f32 %v3603_v15, %v4084_v39  ;;  %v170_v10 = vld [vmem:[#allocation3 + $0x1f8] sm:$0xff] }
 0x109   :  { %583 = vadd.xlane.f32.xlu1 %v582_v16  ;;  %580 = vadd.xlane.f32.xlu0 %v579_v51  ;;  %v321_v16 = vmul.f32 %v3800_v36, %v3948_v49  ;;  %v320_v51 = vmul.f32 %v3800_v36, %v3950_v50  ;;  %v263_v49 = vmul.f32 %v3603_v15, %v4070_v24 }
 0x10a   :  { %v4050_v6 = vpop.xlane.xlu1 %415  ;;  %v4052_v7 = vpop.xlane.xlu0 %412  ;;  %v262_v50 = vmul.f32 %v3603_v15, %v4072_v35 }
 0x10b   :  { %5793 = vst [vmem:[#allocation35_spill] sm:$0xff] %v4050_v6  ;;  %5794 = vst [vmem:[#allocation36_spill] sm:$0xff] %v4052_v7 }
 0x10d   :  { %589 = vadd.xlane.f32.xlu1 %v588_v26  ;;  %586 = vadd.xlane.f32.xlu0 %v585_v31  ;;  %v684_v26 = vsel %vm332_vm0, %v321_v16, 0.0  ;;  %v681_v31 = vsel %vm332_vm0, %v320_v51, 0.0  ;;  %v510_v16 = vsel %vm332_vm0, %v263_v49, 0.0  ;;  %v507_v51 = vsel %vm332_vm0, %v262_v50, 0.0 }
 0x10e   :  { %v4060_v19 = vpop.xlane.xlu1 %421  ;;  %v4062_v22 = vpop.xlane.xlu0 %418  ;;  %v291_v49 = vmul.f32 %v3800_v36, %v3708_v27  ;;  %v290_v50 = vmul.f32 %v3800_v36, %v3710_v30 }
 0x10f   :  { %5795 = vst [vmem:[#allocation37_spill] sm:$0xff] %v4060_v19  ;;  %5796 = vst [vmem:[#allocation38_spill] sm:$0xff] %v4062_v22  ;;  %v4118_v27 = vpop.f32.mrf.mxu0 }
 0x110   :  { %v591_v7 = vsel %vm332_vm0, %v290_v50, 0.0  ;;  %v323_v50 = vmul.f32 %v3800_v36, %v4002_v44  ;;  %v324_v44 = vmul.f32 %v3800_v36, %v4018_v28 }
 0x111   :  { %679 = vadd.xlane.f32.xlu1 %v678_v57  ;;  %676 = vadd.xlane.f32.xlu0 %v675_v60  ;;  %v3303_v30 = vpop.f32.mrf.mxu0 }
 0x112   :  { %v4074_v32 = vpop.xlane.xlu1 %427  ;;  %v4076_v18 = vpop.xlane.xlu0 %424  ;;  %v690_v11 = vsel %vm332_vm0, %v323_v50, 0.0  ;;  %v693_v50 = vsel %vm332_vm0, %v324_v44, 0.0 }
 0x113   :  { %5797 = vst [vmem:[#allocation39_spill] sm:$0xff] %v4074_v32  ;;  %5798 = vst [vmem:[#allocation40_spill] sm:$0xff] %v4076_v18  ;;  %v264_v18 = vmul.f32 %v3603_v15, %v4086_v43 }
 0x115   :  { %685 = vadd.xlane.f32.xlu1 %v684_v26  ;;  %682 = vadd.xlane.f32.xlu0 %v681_v31  ;;  %v516_v31 = vsel %vm332_vm0, %v265_v0, 0.0  ;;  %v513_v22 = vsel %vm332_vm0, %v264_v18, 0.0  ;;  %v293_v0 = vmul.f32 %v3800_v36, %v3718_v37  ;;  %v292_v18 = vmul.f32 %v3800_v36, %v3720_v38  ;;  %v774_v38 = vpop.f32.mrf.mxu0 }
 0x116   :  { %v4088_v57 = vpop.xlane.xlu1 %433  ;;  %v4090_v60 = vpop.xlane.xlu0 %430  ;;  %v322_v37 = vmul.f32 %v3800_v36, %v4004_v2  ;;  %v169_v2 = vld [vmem:[#allocation3 + $0x1f0] sm:$0xff] }
 0x117   :  { %v600_v6 = vsel %vm332_vm0, %v293_v0, 0.0 }
 0x118   :  { %v687_v0 = vsel %vm332_vm0, %v322_v37, 0.0  ;;  %v267_v37 = vmul.f32 %v3603_v15, %v170_v10 }
 0x119   :  { %511 = vadd.xlane.f32.xlu1 %v510_v16  ;;  %508 = vadd.xlane.f32.xlu0 %v507_v51  ;;  %v594_v51 = vsel %vm332_vm0, %v291_v49, 0.0  ;;  %v597_v49 = vsel %vm332_vm0, %v292_v18, 0.0  ;;  %v325_v18 = vmul.f32 %v3800_v36, %v4016_v20 }
 0x11a   :  { %v4098_v32 = vpop.xlane.xlu1 %439  ;;  %v4100_v26 = vpop.xlane.xlu0 %436 }
 0x11b   :  { %v696_v38 = vsel %vm332_vm0, %v325_v18, 0.0  ;;  %v294_v18 = vmul.f32 %v3800_v36, %v3730_v48 }
 0x11d   :  { %517 = vadd.xlane.f32.xlu1 %v516_v31  ;;  %514 = vadd.xlane.f32.xlu0 %v513_v22 }
 0x11e   :  { %v4108_v19 = vpop.xlane.xlu1 %445  ;;  %v4110_v16 = vpop.xlane.xlu0 %442 }
 0x121   :  { %595 = vadd.xlane.f32.xlu1 %v594_v51  ;;  %592 = vadd.xlane.f32.xlu0 %v591_v7  ;;  %v3304_v51 = vpop.f32.mrf.mxu0 }
 0x122   :  { %v4120_v22 = vpop.xlane.xlu1 %451  ;;  %v4122_v31 = vpop.xlane.xlu0 %448  ;;  %v266_v51 = vmul.f32 %v3603_v15, %v169_v2 }
 0x125   :  { %601 = vadd.xlane.f32.xlu1 %v600_v6  ;;  %598 = vadd.xlane.f32.xlu0 %v597_v49 }
 0x126   :  { %v4130_v7 = vpop.xlane.xlu1 %457  ;;  %v4132_v30 = vpop.xlane.xlu0 %454 }
 0x129   :  { %691 = vadd.xlane.f32.xlu1 %v690_v11  ;;  %688 = vadd.xlane.f32.xlu0 %v687_v0  ;;  %v522_v11 = vsel %vm332_vm0, %v267_v37, 0.0  ;;  %v519_v0 = vsel %vm332_vm0, %v266_v51, 0.0  ;;  %v297_v37 = vmul.f32 %v3800_v36, %v3738_v53  ;;  %v296_v51 = vmul.f32 %v3800_v36, %v3740_v54 }
 0x12a   :  { %v4140_v6 = vpop.xlane.xlu1 %529  ;;  %v4142_v49 = vpop.xlane.xlu0 %526 }
 0x12d   :  { %697 = vadd.xlane.f32.xlu1 %v696_v38  ;;  %694 = vadd.xlane.f32.xlu0 %v693_v50  ;;  %v606_v38 = vsel %vm332_vm0, %v295_v59, 0.0  ;;  %v603_v50 = vsel %vm332_vm0, %v294_v18, 0.0  ;;  %v327_v59 = vmul.f32 %v3800_v36, %v4070_v24  ;;  %v326_v18 = vmul.f32 %v3800_v36, %v4072_v35 }
 0x12e   :  { %v4148_v20 = vpop.xlane.xlu1 %541  ;;  %v4150_v28 = vpop.xlane.xlu0 %538 }
 0x131   :  { %523 = vadd.xlane.f32.xlu1 %v522_v11  ;;  %520 = vadd.xlane.f32.xlu0 %v519_v0  ;;  %v612_v11 = vsel %vm332_vm0, %v297_v37, 0.0  ;;  %v609_v0 = vsel %vm332_vm0, %v296_v51, 0.0  ;;  %v329_v37 = vmul.f32 %v3800_v36, %v4084_v39  ;;  %v328_v51 = vmul.f32 %v3800_v36, %v4086_v43 }
 0x132   :  { %v4158_v44 = vpop.xlane.xlu1 %625  ;;  %v4160_v15 = vpop.xlane.xlu0 %622 }
 0x133   :  { %5799 = vst [vmem:[#allocation41_spill] sm:$0xff] %v4160_v15 }
 0x135   :  { %607 = vadd.xlane.f32.xlu1 %v606_v38  ;;  %604 = vadd.xlane.f32.xlu0 %v603_v50  ;;  %v702_v38 = vsel %vm332_vm0, %v327_v59, 0.0  ;;  %v699_v50 = vsel %vm332_vm0, %v326_v18, 0.0  ;;  %v299_v59 = vmul.f32 %v3800_v36, %v3748_v63  ;;  %v298_v18 = vmul.f32 %v3800_v36, %v3750_v1 }
 0x136   :  { %v4168_v45 = vpop.xlane.xlu1 %637  ;;  %v4170_v48 = vpop.xlane.xlu0 %634 }
 0x137   :  { %5800 = vst [vmem:[#allocation42_spill] sm:$0xff] %v4168_v45  ;;  %5801 = vst [vmem:[#allocation43_spill] sm:$0xff] %v4170_v48 }
 0x139   :  { %613 = vadd.xlane.f32.xlu1 %v612_v11  ;;  %610 = vadd.xlane.f32.xlu0 %v609_v0  ;;  %v708_v11 = vsel %vm332_vm0, %v329_v37, 0.0  ;;  %v705_v0 = vsel %vm332_vm0, %v328_v51, 0.0  ;;  %v331_v37 = vmul.f32 %v3800_v36, %v170_v10  ;;  %v330_v51 = vmul.f32 %v3800_v36, %v169_v2 }
 0x13a   :  { %v4178_v53 = vpop.xlane.xlu1 %463  ;;  %v4180_v54 = vpop.xlane.xlu0 %460 }
 0x13b   :  { %5802 = vst [vmem:[#allocation44_spill] sm:$0xff] %v4178_v53  ;;  %5803 = vst [vmem:[#allocation45_spill] sm:$0xff] %v4180_v54  ;;  %v714_v1 = vsel %vm332_vm0, %v331_v37, 0.0 }
 0x13d   :  { %703 = vadd.xlane.f32.xlu1 %v702_v38  ;;  %700 = vadd.xlane.f32.xlu0 %v699_v50  ;;  %v618_v38 = vsel %vm332_vm0, %v299_v59, 0.0  ;;  %v615_v50 = vsel %vm332_vm0, %v298_v18, 0.0 }
 0x13e   :  { %v4188_v24 = vpop.xlane.xlu1 %469  ;;  %v4190_v35 = vpop.xlane.xlu0 %466 }
 0x13f   :  { %5804 = vst [vmem:[#allocation46_spill] sm:$0xff] %v4188_v24  ;;  %5805 = vst [vmem:[#allocation47_spill] sm:$0xff] %v4190_v35 }
 0x141   :  { %709 = vadd.xlane.f32.xlu1 %v708_v11  ;;  %706 = vadd.xlane.f32.xlu0 %v705_v0  ;;  %v711_v11 = vsel %vm332_vm0, %v330_v51, 0.0 }
 0x142   :  { %v4198_v39 = vpop.xlane.xlu1 %535  ;;  %v4200_v43 = vpop.xlane.xlu0 %532 }
 0x143   :  { %5806 = vst [vmem:[#allocation48_spill] sm:$0xff] %v4198_v39  ;;  %5807 = vst [vmem:[#allocation49_spill] sm:$0xff] %v4200_v43 }
 0x145   :  { %619 = vadd.xlane.f32.xlu1 %v618_v38  ;;  %616 = vadd.xlane.f32.xlu0 %v615_v50  ;;  %v4224_v38 = vld [vmem:[#allocation6] sm:$0xff] }
 0x146   :  { %v4206_v63 = vpop.xlane.xlu1 %547  ;;  %v4208_v58 = vpop.xlane.xlu0 %544  ;;  %v784_v51 = vrot.slane %v4224_v38, %v3590_v9 }
 0x147   :  { %5808 = vst [vmem:[#allocation50_spill] sm:$0xff] %v4206_v63  ;;  %5809 = vst [vmem:[#allocation51_spill] sm:$0xff] %v4208_v58 }
 0x149   :  { %715 = vadd.xlane.f32.xlu1 %v714_v1  ;;  %712 = vadd.xlane.f32.xlu0 %v711_v11  ;;  %v4233_v1 = vsub.s32 1, %v3575_v3 }
 0x14a   :  { %v4212_v0 = vpop.xlane.xlu1 %553  ;;  %v4214_v59 = vpop.xlane.xlu0 %550 }
 0x14b   :  { %5810 = vst [vmem:[#allocation52_spill] sm:$0xff] %v4212_v0  ;;  %5811 = vst [vmem:[#allocation53_spill] sm:$0xff] %v4214_v59  ;;  %v803_v17 = vrot.slane %v4224_v38, %v4233_v1 }
 0x14c   :  { %5818 = vst [vmem:[#allocation60_spill] sm:$0xff] %v4233_v1 }
 0x14e   :  { %v4216_v18 = vpop.xlane.xlu1 %631  ;;  %v4218_v10 = vpop.xlane.xlu0 %628 }
 0x14f   :  { %5812 = vst [vmem:[#allocation54_spill] sm:$0xff] %v4216_v18  ;;  %5813 = vst [vmem:[#allocation55_spill] sm:$0xff] %v4218_v10 }
 0x152   :  { %v4220_v36 = vpop.xlane.xlu1 %643  ;;  %v4222_v2 = vpop.xlane.xlu0 %640 }
 0x153   :  { %5814 = vst [vmem:[#allocation56_spill] sm:$0xff] %v4220_v36  ;;  %5815 = vst [vmem:[#allocation57_spill] sm:$0xff] %v4222_v2 }
 0x156   :  { %v4226_v50 = vpop.xlane.xlu1 %649  ;;  %v4228_v37 = vpop.xlane.xlu0 %646 }
 0x157   :  { %5816 = vst [vmem:[#allocation58_spill] sm:$0xff] %v4226_v50  ;;  %5817 = vst [vmem:[#allocation59_spill] sm:$0xff] %v4228_v37 }
 0x15a   :  { %790 = vbcast.lane.b32.xlu1 %v784_v51, 264  ;;  %v4235_v11 = vpop.xlane.xlu1 %475  ;;  %v4237_v34 = vpop.xlane.xlu0 %472 }
 0x15b   :  { %5819 = vst [vmem:[#allocation61_spill] sm:$0xff] %v4235_v11  ;;  %5820 = vst [vmem:[#allocation62_spill] sm:$0xff] %v4237_v34  ;;  %v955_v34 = vrot.slane %v4241_v14, %v4233_v1 }
 0x15e   :  { %805 = vbcast.lane.b32.xlu1 %v803_v17, 256  ;;  %v4243_v40 = vpop.xlane.xlu1 %481  ;;  %v4245_v62 = vpop.xlane.xlu0 %478 }
 0x15f   :  { %5821 = vst [vmem:[#allocation63_spill] sm:$0xff] %v4243_v40  ;;  %5822 = vst [vmem:[#allocation64_spill] sm:$0xff] %v4245_v62  ;;  %786 = vbcast.lane.b32.xlu0 %v784_v51, 256 }
 0x162   :  { %809 = vbcast.lane.b32.xlu1 %v803_v17, 264  ;;  %v4249_v56 = vpop.xlane.xlu1 %559  ;;  %v4251_v11 = vpop.xlane.xlu0 %556 }
 0x163   :  { %5823 = vst [vmem:[#allocation65_spill] sm:$0xff] %v4249_v56  ;;  %5824 = vst [vmem:[#allocation66_spill] sm:$0xff] %v4251_v11  ;;  %938 = vbcast.lane.b32.xlu0 %v936_v61, 256  ;;  %v821_v56 = vsub.s32 2, %v3575_v3 }
 0x165   :  { %v822_v1 = vrot.slane %v4224_v38, %v821_v56 }
 0x166   :  { %942 = vbcast.lane.b32.xlu1 %v936_v61, 264  ;;  %v4255_v55 = vpop.xlane.xlu1 %565  ;;  %v4257_v37 = vpop.xlane.xlu0 %562 }
 0x167   :  { %5825 = vst [vmem:[#allocation67_spill] sm:$0xff] %v4255_v55  ;;  %5826 = vst [vmem:[#allocation68_spill] sm:$0xff] %v4257_v37  ;;  %957 = vbcast.lane.b32.xlu0 %v955_v34, 256 }
 0x16a   :  { %961 = vbcast.lane.b32.xlu1 %v955_v34, 264  ;;  %v4259_v62 = vpop.xlane.xlu1 %655  ;;  %v4261_v40 = vpop.xlane.xlu0 %652 }
 0x16b   :  { %5827 = vst [vmem:[#allocation69_spill] sm:$0xff] %v4259_v62  ;;  %5828 = vst [vmem:[#allocation70_spill] sm:$0xff] %v4261_v40  ;;  %794 = vbcast.lane.b32.xlu0 %v784_v51, 272 }
 0x16e   :  { %798 = vbcast.lane.b32.xlu1 %v784_v51, 280  ;;  %v4264_v11 = vpop.xlane.xlu1 %661  ;;  %v4266_v50 = vpop.xlane.xlu0 %658 }
 0x16f   :  { %5829 = vst [vmem:[#allocation71_spill] sm:$0xff] %v4264_v11  ;;  %5830 = vst [vmem:[#allocation72_spill] sm:$0xff] %v4266_v50  ;;  %813 = vbcast.lane.b32.xlu0 %v803_v17, 272  ;;  %v974_v50 = vrot.slane %v4241_v14, %v821_v56 }
 0x172   :  { %817 = vbcast.lane.b32.xlu1 %v803_v17, 280  ;;  %v4269_v55 = vpop.xlane.xlu1 %487  ;;  %v4271_v37 = vpop.xlane.xlu0 %484 }
 0x173   :  { %5831 = vst [vmem:[#allocation73_spill] sm:$0xff] %v4269_v55  ;;  %5832 = vst [vmem:[#allocation74_spill] sm:$0xff] %v4271_v37  ;;  %824 = vbcast.lane.b32.xlu0 %v822_v1, 256  ;;  %v840_v37 = vsub.s32 3, %v3575_v3 }
 0x176   :  { %828 = vbcast.lane.b32.xlu1 %v822_v1, 264  ;;  %v4273_v62 = vpop.xlane.xlu1 %493  ;;  %v4275_v40 = vpop.xlane.xlu0 %490 }
 0x177   :  { %5833 = vst [vmem:[#allocation75_spill] sm:$0xff] %v4273_v62  ;;  %5834 = vst [vmem:[#allocation76_spill] sm:$0xff] %v4275_v40  ;;  %946 = vbcast.lane.b32.xlu0 %v936_v61, 272 }
 0x17a   :  { %950 = vbcast.lane.b32.xlu1 %v936_v61, 280  ;;  %v4277_v51 = vpop.xlane.xlu1 %571  ;;  %v4279_v11 = vpop.xlane.xlu0 %568  ;;  %v841_v61 = vrot.slane %v4224_v38, %v840_v37 }
 0x17b   :  { %5835 = vst [vmem:[#allocation77_spill] sm:$0xff] %v4277_v51  ;;  %5836 = vst [vmem:[#allocation78_spill] sm:$0xff] %v4279_v11  ;;  %965 = vbcast.lane.b32.xlu0 %v955_v34, 272 }
 0x17e   :  { %969 = vbcast.lane.b32.xlu1 %v955_v34, 280  ;;  %v4282_v17 = vpop.xlane.xlu1 %577  ;;  %v4284_v55 = vpop.xlane.xlu0 %574  ;;  %v1284_v34 = vrot.slane %v4118_v27, %v3578_v5 }
 0x17f   :  { %5837 = vst [vmem:[#allocation79_spill] sm:$0xff] %v4282_v17  ;;  %5838 = vst [vmem:[#allocation80_spill] sm:$0xff] %v4284_v55  ;;  %976 = vbcast.lane.b32.xlu0 %v974_v50, 256 }
 0x182   :  { %980 = vbcast.lane.b32.xlu1 %v974_v50, 264  ;;  %v4287_v62 = vpop.xlane.xlu1 %667  ;;  %v4289_v40 = vpop.xlane.xlu0 %664 }
 0x183   :  { %5839 = vst [vmem:[#allocation81_spill] sm:$0xff] %v4287_v62  ;;  %5840 = vst [vmem:[#allocation82_spill] sm:$0xff] %v4289_v40  ;;  %832 = vbcast.lane.b32.xlu0 %v822_v1, 272  ;;  %v1292_v40 = vrot.slane %v1284_v34, %v3578_v5  ;;  %v993_v62 = vrot.slane %v4241_v14, %v840_v37 }
 0x186   :  { %836 = vbcast.lane.b32.xlu1 %v822_v1, 280  ;;  %v4292_v11 = vpop.xlane.xlu1 %673  ;;  %v4294_v56 = vpop.xlane.xlu0 %670 }
 0x187   :  { %5841 = vst [vmem:[#allocation83_spill] sm:$0xff] %v4292_v11  ;;  %5842 = vst [vmem:[#allocation84_spill] sm:$0xff] %v4294_v56  ;;  %843 = vbcast.lane.b32.xlu0 %v841_v61, 256  ;;  %v1303_v56 = vrot.slane %v1292_v40, %v3590_v9 }
 0x18a   :  { %847 = vbcast.lane.b32.xlu1 %v841_v61, 264  ;;  %v4298_v55 = vpop.xlane.xlu1 %499  ;;  %v4300_v17 = vpop.xlane.xlu0 %496 }
 0x18b   :  { %5843 = vst [vmem:[#allocation85_spill] sm:$0xff] %v4298_v55  ;;  %5844 = vst [vmem:[#allocation86_spill] sm:$0xff] %v4300_v17  ;;  %984 = vbcast.lane.b32.xlu0 %v974_v50, 272  ;;  %v859_v17 = vsub.s32 4, %v3575_v3 }
 0x18e   :  { %988 = vbcast.lane.b32.xlu1 %v974_v50, 280  ;;  %v4304_v1 = vpop.xlane.xlu1 %505  ;;  %v4306_v11 = vpop.xlane.xlu0 %502  ;;  %v860_v50 = vrot.slane %v4224_v38, %v859_v17 }
 0x18f   :  { %5845 = vst [vmem:[#allocation87_spill] sm:$0xff] %v4304_v1  ;;  %5846 = vst [vmem:[#allocation88_spill] sm:$0xff] %v4306_v11  ;;  %995 = vbcast.lane.b32.xlu0 %v993_v62, 256  ;;  %v1012_v1 = vrot.slane %v4241_v14, %v859_v17 }
 0x192   :  { %999 = vbcast.lane.b32.xlu1 %v993_v62, 264  ;;  %v4309_v27 = vpop.xlane.xlu1 %583  ;;  %v4311_v51 = vpop.xlane.xlu0 %580 }
 0x193   :  { %5847 = vst [vmem:[#allocation89_spill] sm:$0xff] %v4309_v27  ;;  %5848 = vst [vmem:[#allocation90_spill] sm:$0xff] %v4311_v51  ;;  %1309 = vbcast.lane.b32.xlu0 %v1303_v56, 256 }
 0x196   :  { %1313 = vbcast.lane.b32.xlu1 %v1303_v56, 264  ;;  %v4314_v55 = vpop.xlane.xlu1 %589  ;;  %v4316_v37 = vpop.xlane.xlu0 %586 }
 0x197   :  { %5849 = vst [vmem:[#allocation91_spill] sm:$0xff] %v4314_v55  ;;  %5850 = vst [vmem:[#allocation92_spill] sm:$0xff] %v4316_v37  ;;  %851 = vbcast.lane.b32.xlu0 %v841_v61, 272  ;;  %v1285_v55 = vcombine.high %v1284_v34, %v1284_v34 }
 0x19a   :  { %855 = vbcast.lane.b32.xlu1 %v841_v61, 280  ;;  %v4319_v11 = vpop.xlane.xlu1 %679  ;;  %v4321_v40 = vpop.xlane.xlu0 %676  ;;  %v1299_v61 = vrot.slane %v1285_v55, %v3578_v5 }
 0x19b   :  { %5851 = vst [vmem:[#allocation93_spill] sm:$0xff] %v4319_v11  ;;  %5852 = vst [vmem:[#allocation94_spill] sm:$0xff] %v4321_v40  ;;  %862 = vbcast.lane.b32.xlu0 %v860_v50, 256 }
 0x19e   :  { %866 = vbcast.lane.b32.xlu1 %v860_v50, 264  ;;  %v4323_v27 = vpop.xlane.xlu1 %685  ;;  %v4325_v51 = vpop.xlane.xlu0 %682 }
 0x19f   :  { %5853 = vst [vmem:[#allocation95_spill] sm:$0xff] %v4323_v27  ;;  %5854 = vst [vmem:[#allocation96_spill] sm:$0xff] %v4325_v51  ;;  %1003 = vbcast.lane.b32.xlu0 %v993_v62, 272  ;;  %v1307_v51 = vrot.slane %v1299_v61, %v3590_v9 }
 0x1a2   :  { %1007 = vbcast.lane.b32.xlu1 %v993_v62, 280  ;;  %v4328_v37 = vpop.xlane.xlu1 %511  ;;  %v4330_v10 = vpop.xlane.xlu0 %508  ;;  %v878_v62 = vsub.s32 5, %v3575_v3 }
 0x1a3   :  { %5855 = vst [vmem:[#allocation97_spill] sm:$0xff] %v4328_v37  ;;  %5856 = vst [vmem:[#allocation98_spill] sm:$0xff] %v4330_v10  ;;  %1014 = vbcast.lane.b32.xlu0 %v1012_v1, 256 }
 0x1a4   :  { %v879_v55 = vrot.slane %v4224_v38, %v878_v62 }
 0x1a6   :  { %1018 = vbcast.lane.b32.xlu1 %v1012_v1, 264  ;;  %v4333_v40 = vpop.xlane.xlu1 %517  ;;  %v4335_v11 = vpop.xlane.xlu0 %514 }
 0x1a7   :  { %5857 = vst [vmem:[#allocation99_spill] sm:$0xff] %v4333_v40  ;;  %5858 = vst [vmem:[#allocation100_spill] sm:$0xff] %v4335_v11  ;;  %1317 = vbcast.lane.b32.xlu0 %v1303_v56, 272 }
 0x1aa   :  { %1321 = vbcast.lane.b32.xlu1 %v1303_v56, 280  ;;  %v4338_v27 = vpop.xlane.xlu1 %595  ;;  %v4340_v17 = vpop.xlane.xlu0 %592 }
 0x1ab   :  { %5859 = vst [vmem:[#allocation101_spill] sm:$0xff] %v4338_v27  ;;  %5860 = vst [vmem:[#allocation102_spill] sm:$0xff] %v4340_v17  ;;  %1324 = vbcast.lane.b32.xlu0 %v1307_v51, 256  ;;  %v1031_v17 = vrot.slane %v4241_v14, %v878_v62 }
 0x1ae   :  { %1328 = vbcast.lane.b32.xlu1 %v1307_v51, 264  ;;  %v4343_v34 = vpop.xlane.xlu1 %601  ;;  %v4345_v5 = vpop.xlane.xlu0 %598 }
 0x1af   :  { %5861 = vst [vmem:[#allocation103_spill] sm:$0xff] %v4343_v34  ;;  %5862 = vst [vmem:[#allocation104_spill] sm:$0xff] %v4345_v5  ;;  %870 = vbcast.lane.b32.xlu0 %v860_v50, 272 }
 0x1b2   :  { %874 = vbcast.lane.b32.xlu1 %v860_v50, 280  ;;  %v4348_v11 = vpop.xlane.xlu1 %691  ;;  %v4350_v61 = vpop.xlane.xlu0 %688 }
 0x1b3   :  { %5863 = vst [vmem:[#allocation105_spill] sm:$0xff] %v4348_v11  ;;  %5864 = vst [vmem:[#allocation106_spill] sm:$0xff] %v4350_v61  ;;  %881 = vbcast.lane.b32.xlu0 %v879_v55, 256 }
 0x1b6   :  { %885 = vbcast.lane.b32.xlu1 %v879_v55, 264  ;;  %v4352_v56 = vpop.xlane.xlu1 %697  ;;  %v4354_v9 = vpop.xlane.xlu0 %694 }
 0x1b7   :  { %5865 = vst [vmem:[#allocation107_spill] sm:$0xff] %v4352_v56  ;;  %5866 = vst [vmem:[#allocation108_spill] sm:$0xff] %v4354_v9  ;;  %1022 = vbcast.lane.b32.xlu0 %v1012_v1, 272  ;;  %v3275_v56 = vld [vmem:[%s5728_s3] ss:$0 sm:$0xff] }
 0x1ba   :  { %1026 = vbcast.lane.b32.xlu1 %v1012_v1, 280  ;;  %v4357_v34 = vpop.xlane.xlu1 %523  ;;  %v4359_v5 = vpop.xlane.xlu0 %520  ;;  %v897_v1 = vsub.s32 6, %v3575_v3 }
 0x1bb   :  { %5867 = vst [vmem:[#allocation109_spill] sm:$0xff] %v4357_v34  ;;  %5868 = vst [vmem:[#allocation110_spill] sm:$0xff] %v4359_v5  ;;  %1033 = vbcast.lane.b32.xlu0 %v1031_v17, 256 }
 0x1be   :  { %1037 = vbcast.lane.b32.xlu1 %v1031_v17, 264  ;;  %v4361_v50 = vpop.xlane.xlu1 %607  ;;  %v4363_v11 = vpop.xlane.xlu0 %604 }
 0x1bf   :  { %5869 = vst [vmem:[#allocation111_spill] sm:$0xff] %v4361_v50  ;;  %5870 = vst [vmem:[#allocation112_spill] sm:$0xff] %v4363_v11  ;;  %1332 = vbcast.lane.b32.xlu0 %v1307_v51, 272  ;;  %v898_v11 = vrot.slane %v4224_v38, %v897_v1  ;;  %v3493_v50 = vmov 0  }
 0x1c0   :  { %3336 = vset.pattern.permute.xlu1 %v3493_v50  ;;  %3335 = vset.pattern.permute.xlu0 %v3493_v50 }
 0x1c2   :  { %1336 = vbcast.lane.b32.xlu1 %v1307_v51, 280  ;;  %v4368_v9 = vpop.xlane.xlu1 %613  ;;  %v4370_v62 = vpop.xlane.xlu0 %610 }
 0x1c3   :  { %5871 = vst [vmem:[#allocation113_spill] sm:$0xff] %v4368_v9  ;;  %5872 = vst [vmem:[#allocation114_spill] sm:$0xff] %v4370_v62  ;;  %1481 = vbcast.lane.b32.xlu0 %v3275_v56, 256 }
 0x1c6   :  { %v4373_v5 = vpop.xlane.xlu1 %703  ;;  %v4375_v34 = vpop.xlane.xlu0 %700  ;;  %1485 = vbcast.lane.b32.xlu1 %v3275_v56, 264 }
 0x1c7   :  { %5873 = vst [vmem:[#allocation115_spill] sm:$0xff] %v4373_v5  ;;  %5874 = vst [vmem:[#allocation116_spill] sm:$0xff] %v4375_v34  ;;  %889 = vbcast.lane.b32.xlu0 %v879_v55, 272  ;;  %v1050_v5 = vrot.slane %v4241_v14, %v897_v1 }
 0x1ca   :  { %v4378_v61 = vpop.xlane.xlu1 %709  ;;  %v4380_v51 = vpop.xlane.xlu0 %706  ;;  %893 = vbcast.lane.b32.xlu1 %v879_v55, 280  ;;  %v916_v55 = vsub.s32 7, %v3575_v3 }
 0x1cb   :  { %5875 = vst [vmem:[#allocation117_spill] sm:$0xff] %v4378_v61  ;;  %5876 = vst [vmem:[#allocation118_spill] sm:$0xff] %v4380_v51  ;;  %900 = vbcast.lane.b32.xlu0 %v898_v11, 256 }
 0x1cc   :  { %v917_v1 = vrot.slane %v4224_v38, %v916_v55  ;;  %v1069_v3 = vrot.slane %v4241_v14, %v916_v55 }
 0x1ce   :  { %v4382_v9 = vpop.xlane.xlu1 %619  ;;  %v4384_v62 = vpop.xlane.xlu0 %616  ;;  %904 = vbcast.lane.b32.xlu1 %v898_v11, 264 }
 0x1cf   :  { %5877 = vst [vmem:[#allocation119_spill] sm:$0xff] %v4382_v9  ;;  %5878 = vst [vmem:[#allocation120_spill] sm:$0xff] %v4384_v62  ;;  %1041 = vbcast.lane.b32.xlu0 %v1031_v17, 272 }
 0x1d2   :  { %v4387_v34 = vpop.xlane.xlu1 %715  ;;  %v4389_v27 = vpop.xlane.xlu0 %712  ;;  %1045 = vbcast.lane.b32.xlu1 %v1031_v17, 280 }
 0x1d3   :  { %5879 = vst [vmem:[#allocation121_spill] sm:$0xff] %v4387_v34  ;;  %5880 = vst [vmem:[#allocation122_spill] sm:$0xff] %v4389_v27  ;;  %1052 = vbcast.lane.b32.xlu0 %v1050_v5, 256 }
 0x1d6   :  { %v4391_v50 = vpop.permute.xlu1 %790  ;;  %v4393_v61 = vpop.permute.xlu0 %786  ;;  %1056 = vbcast.lane.b32.xlu1 %v1050_v5, 264 }
 0x1d7   :  { %1489 = vbcast.lane.b32.xlu0 %v3275_v56, 272 }
 0x1da   :  { %v4396_v9 = vpop.permute.xlu1 %805  ;;  %v4398_v62 = vpop.permute.xlu0 %938  ;;  %1493 = vbcast.lane.b32.xlu1 %v3275_v56, 280 }
 0x1db   :  { %908 = vbcast.lane.b32.xlu0 %v898_v11, 272 }
 0x1de   :  { %v4401_v34 = vpop.permute.xlu1 %809  ;;  %v4403_v17 = vpop.permute.xlu0 %957  ;;  %912 = vbcast.lane.b32.xlu1 %v898_v11, 280 }
 0x1df   :  { %919 = vbcast.lane.b32.xlu0 %v917_v1, 256 }
 0x1e2   :  { %v4405_v27 = vpop.permute.xlu1 %942  ;;  %v4407_v51 = vpop.permute.xlu0 %794  ;;  %923 = vbcast.lane.b32.xlu1 %v917_v1, 264 }
 0x1e3   :  { %1060 = vbcast.lane.b32.xlu0 %v1050_v5, 272 }
 0x1e6   :  { %v4410_v40 = vpop.permute.xlu1 %961  ;;  %v4412_v56 = vpop.permute.xlu0 %813  ;;  %1064 = vbcast.lane.b32.xlu1 %v1050_v5, 280 }
 0x1e7   :  { %1071 = vbcast.lane.b32.xlu0 %v1069_v3, 256 }
 0x1ea   :  { %v4414_v38 = vpop.permute.xlu1 %798  ;;  %v4416_v10 = vpop.permute.xlu0 %824  ;;  %1075 = vbcast.lane.b32.xlu1 %v1069_v3, 264 }
 0x1eb   :  { %927 = vbcast.lane.b32.xlu0 %v917_v1, 272 }
 0x1ee   :  { %v4418_v11 = vpop.permute.xlu1 %817  ;;  %v4420_v37 = vpop.permute.xlu0 %946  ;;  %931 = vbcast.lane.b32.xlu1 %v917_v1, 280 }
 0x1ef   :  { %1079 = vbcast.lane.b32.xlu0 %v1069_v3, 272 }
 0x1f2   :  { %v4422_v2 = vpop.permute.xlu1 %828  ;;  %v4424_v14 = vpop.permute.xlu0 %965  ;;  %1083 = vbcast.lane.b32.xlu1 %v1069_v3, 280 }
 0x1f6   :  { %v4426_v55 = vpop.permute.xlu1 %950  ;;  %v4428_v5 = vpop.permute.xlu0 %976 }
 0x1fa   :  { %v4430_v18 = vpop.permute.xlu1 %969  ;;  %v4432_v36 = vpop.permute.xlu0 %832 }
 0x1fb   :  { %5881 = vst [vmem:[#allocation123_spill] sm:$0xff] %v4432_v36 }
 0x1fe   :  { %v4434_v59 = vpop.permute.xlu1 %980  ;;  %v4436_v0 = vpop.permute.xlu0 %843 }
 0x1ff   :  { %5882 = vst [vmem:[#allocation124_spill] sm:$0xff] %v4436_v0 }
 0x202   :  { %v4438_v43 = vpop.permute.xlu1 %836  ;;  %v4440_v1 = vpop.permute.xlu0 %984 }
 0x203   :  { %5883 = vst [vmem:[#allocation125_spill] sm:$0xff] %v4438_v43  ;;  %5884 = vst [vmem:[#allocation126_spill] sm:$0xff] %v4440_v1 }
 0x206   :  { %v4442_v58 = vpop.permute.xlu1 %847  ;;  %v4444_v39 = vpop.permute.xlu0 %995 }
 0x207   :  { %5885 = vst [vmem:[#allocation127_spill] sm:$0xff] %v4442_v58  ;;  %5886 = vst [vmem:[#allocation128_spill] sm:$0xff] %v4444_v39 }
 0x20a   :  { %v4446_v3 = vpop.permute.xlu1 %988  ;;  %v4448_v63 = vpop.permute.xlu0 %1309 }
 0x20b   :  { %5887 = vst [vmem:[#allocation129_spill] sm:$0xff] %v4446_v3 }
 0x20e   :  { %v4450_v35 = vpop.permute.xlu1 %999  ;;  %v4452_v24 = vpop.permute.xlu0 %851 }
 0x20f   :  { %5888 = vst [vmem:[#allocation130_spill] sm:$0xff] %v4450_v35  ;;  %5889 = vst [vmem:[#allocation131_spill] sm:$0xff] %v4452_v24 }
 0x212   :  { %v4454_v54 = vpop.permute.xlu1 %1313  ;;  %v4456_v53 = vpop.permute.xlu0 %862 }
 0x213   :  { %5890 = vst [vmem:[#allocation132_spill] sm:$0xff] %v4456_v53 }
 0x216   :  { %v4458_v36 = vpop.permute.xlu1 %855  ;;  %v4460_v8 = vpop.permute.xlu0 %1003 }
 0x217   :  { %5891 = vst [vmem:[#allocation133_spill] sm:$0xff] %v4458_v36  ;;  %5892 = vst [vmem:[#allocation134_spill] sm:$0xff] %v4460_v8 }
 0x21a   :  { %v4462_v1 = vpop.permute.xlu1 %866  ;;  %v4464_v0 = vpop.permute.xlu0 %1014 }
 0x21b   :  { %5893 = vst [vmem:[#allocation135_spill] sm:$0xff] %v4462_v1  ;;  %5894 = vst [vmem:[#allocation136_spill] sm:$0xff] %v4464_v0 }
 0x21e   :  { %v4466_v39 = vpop.permute.xlu1 %1007  ;;  %v4468_v3 = vpop.permute.xlu0 %1317 }
 0x21f   :  { %5895 = vst [vmem:[#allocation137_spill] sm:$0xff] %v4466_v39 }
 0x222   :  { %v4470_v21 = vpop.permute.xlu1 %1018  ;;  %v4472_v35 = vpop.permute.xlu0 %1324 }
 0x223   :  { %5896 = vst [vmem:[#allocation138_spill] sm:$0xff] %v4470_v21 }
 0x226   :  { %v4474_v24 = vpop.permute.xlu1 %1321  ;;  %v4476_v43 = vpop.permute.xlu0 %870 }
 0x227   :  { %5897 = vst [vmem:[#allocation139_spill] sm:$0xff] %v4476_v43 }
 0x22a   :  { %v4478_v53 = vpop.permute.xlu1 %1328  ;;  %v4480_v36 = vpop.permute.xlu0 %881 }
 0x22b   :  { %5898 = vst [vmem:[#allocation140_spill] sm:$0xff] %v4480_v36  ;;  %v1150_v36 = vadd.f32 %v4391_v50, %v3916_v42 }
 0x22e   :  { %v4482_v8 = vpop.permute.xlu1 %874  ;;  %v4484_v1 = vpop.permute.xlu0 %1022 }
 0x22f   :  { %5899 = vst [vmem:[#allocation141_spill] sm:$0xff] %v4482_v8  ;;  %5900 = vst [vmem:[#allocation142_spill] sm:$0xff] %v4484_v1  ;;  %v1149_v1 = vadd.f32 %v4393_v61, %v3906_v13 }
 0x232   :  { %v4486_v0 = vpop.permute.xlu1 %885  ;;  %v4488_v39 = vpop.permute.xlu0 %1033 }
 0x233   :  { %5901 = vst [vmem:[#allocation143_spill] sm:$0xff] %v4486_v0  ;;  %5902 = vst [vmem:[#allocation144_spill] sm:$0xff] %v4488_v39  ;;  %v1154_v39 = vadd.f32 %v4401_v34, %v3924_v46  ;;  %v1347_v0 = vadd.f32 %v4454_v54, %v1150_v36  ;;  %v1182_v46 = vadd.f32 %v4405_v27, %v4088_v57 }
 0x236   :  { %v4490_v12 = vpop.permute.xlu1 %1026  ;;  %v4492_v21 = vpop.permute.xlu0 %1332 }
 0x237   :  { %5903 = vst [vmem:[#allocation145_spill] sm:$0xff] %v4490_v12  ;;  %5904 = vst [vmem:[#allocation146_spill] sm:$0xff] %v4492_v21  ;;  %v1346_v12 = vadd.f32 %v4448_v63, %v1149_v1 }
 0x23a   :  { %v4494_v58 = vpop.permute.xlu1 %1037  ;;  %v4496_v29 = vpop.permute.xlu0 %1481 }
 0x23b   :  { %5905 = vst [vmem:[#allocation147_spill] sm:$0xff] %v4494_v58  ;;  %v1153_v58 = vadd.f32 %v4396_v9, %v3926_v47  ;;  %v1499_v42 = vadd.f32 %v4496_v29, %v1346_v12  ;;  %v1181_v47 = vadd.f32 %v4398_v62, %v4090_v60  ;;  %v1186_v12 = vadd.f32 %v4410_v40, %v4108_v19 }
 0x23c   :  { %v1185_v60 = vadd.f32 %v4403_v17, %v4110_v16 }
 0x23d   :  { %v1350_v1 = vadd.f32 %v4448_v63, %v1153_v58  ;;  %v1383_v19 = vadd.f32 %v4454_v54, %v1186_v12 }
 0x23e   :  { %v4498_v43 = vpop.permute.xlu1 %1336  ;;  %v4500_v48 = vpop.permute.xlu0 %889 }
 0x23f   :  { %5906 = vst [vmem:[#allocation148_spill] sm:$0xff] %v4498_v43  ;;  %5907 = vst [vmem:[#allocation149_spill] sm:$0xff] %v4500_v48  ;;  %v1351_v48 = vadd.f32 %v4454_v54, %v1154_v39  ;;  %v1503_v39 = vadd.f32 %v4496_v29, %v1350_v1  ;;  %v1382_v1 = vadd.f32 %v4448_v63, %v1185_v60 }
 0x240   :  { %v1158_v60 = vadd.f32 %v4422_v2, %v3952_v23 }
 0x242   :  { %v4512_v8 = vpop.permute.xlu1 %1485  ;;  %v4515_v21 = vpop.permute.xlu0 %900 }
 0x243   :  { %5908 = vst [vmem:[#allocation150_spill] sm:$0xff] %v4515_v21  ;;  %v1500_v13 = vadd.f32 %v4512_v8, %v1347_v0  ;;  %v1504_v36 = vadd.f32 %v4512_v8, %v1351_v48  ;;  %v1379_v21 = vadd.f32 %v4454_v54, %v1182_v46  ;;  %v1378_v0 = vadd.f32 %v4448_v63, %v1181_v47 }
 0x245   :  { %v1627_v43 = vpack.c.bf16 %v1500_v13, %v1499_v42  ;;  %v1629_v58 = vpack.c.bf16 %v1504_v36, %v1503_v39  ;;  %v1532_v48 = vadd.f32 %v4512_v8, %v1379_v21  ;;  %v1531_v46 = vadd.f32 %v4496_v29, %v1378_v0 }
 0x246   :  { %v4525_v45 = vpop.permute.xlu1 %893  ;;  %v4535_v42 = vpop.permute.xlu0 %1041  ;;  %v1536_v21 = vadd.f32 %v4512_v8, %v1383_v19  ;;  %v1535_v39 = vadd.f32 %v4496_v29, %v1382_v1  ;;  %v1156_v19 = vadd.f32 %v4418_v11, %v3938_v25 }
 0x247   :  { %v1760_v57 = vunpack.c.h.b16 %v1627_v43  ;;  %v1759_v15 = vunpack.c.l.b16 %v1627_v43  ;;  %5909 = vst [vmem:[#allocation151_spill] sm:$0xff] %v4535_v42  ;;  %v1763_v47 = vunpack.c.l.b16 %v1629_v58  ;;  %v1764_v43 = vunpack.c.h.b16 %v1629_v58 }
 0x248   :  { %v1643_v36 = vpack.c.bf16 %v1532_v48, %v1531_v46  ;;  %v1645_v0 = vpack.c.bf16 %v1536_v21, %v1535_v39  ;;  %v1151_v58 = vadd.f32 %v4407_v51, %v3904_v4  ;;  %v1155_v48 = vadd.f32 %v4412_v56, %v3940_v33 }
 0x249   :  { %1891 = vperm.xlu1 %3336, %v1760_v57   ;;  %1888 = vperm.xlu0 %3335, %v1759_v15   ;;  %v1152_v46 = vadd.f32 %v4414_v38, %v3914_v41  ;;  %v1355_v33 = vadd.f32 %v4454_v54, %v1158_v60  ;;  %v1353_v41 = vadd.f32 %v4474_v24, %v1156_v19 }
 0x24a   :  { %v4537_v13 = vpop.permute.xlu1 %904  ;;  %v4546_v15 = vpop.permute.xlu0 %1052  ;;  %v1791_v57 = vunpack.c.l.b16 %v1643_v36  ;;  %v1792_v42 = vunpack.c.h.b16 %v1643_v36  ;;  %v1795_v1 = vunpack.c.l.b16 %v1645_v0  ;;  %v1352_v4 = vadd.f32 %v4468_v3, %v1155_v48 }
 0x24b   :  { %v1348_v36 = vadd.f32 %v4468_v3, %v1151_v58  ;;  %v1349_v25 = vadd.f32 %v4474_v24, %v1152_v46  ;;  %v1188_v21 = vadd.f32 %v4430_v18, %v4120_v22  ;;  %v1508_v39 = vadd.f32 %v4512_v8, %v1355_v33 }
 0x24c   :  { %v1187_v58 = vadd.f32 %v4424_v14, %v4122_v31  ;;  %v1184_v46 = vadd.f32 %v4426_v55, %v4098_v32 }
 0x24d   :  { %1900 = vperm.xlu1 %3336, %v1763_v47   ;;  %1903 = vperm.xlu0 %3335, %v1764_v43   ;;  %v1796_v47 = vunpack.c.h.b16 %v1645_v0 }
 0x24e   :  { %v4543_v16 = vpop.permute.xlu1 %1045  ;;  %v4562_v43 = vpop.permute.xlu0 %1489  ;;  %v1384_v33 = vadd.f32 %v4468_v3, %v1187_v58  ;;  %v1381_v31 = vadd.f32 %v4474_v24, %v1184_v46 }
 0x24f   :  { %v1501_v48 = vadd.f32 %v4562_v43, %v1348_v36 }
 0x251   :  { %1984 = vperm.xlu1 %3336, %v1791_v57   ;;  %1987 = vperm.xlu0 %3335, %v1792_v42   ;;  %v1157_v42 = vadd.f32 %v4416_v10, %v3954_v52  ;;  %v1505_v57 = vadd.f32 %v4562_v43, %v1352_v4  ;;  %v1190_v4 = vadd.f32 %v4434_v59, %v4130_v7 }
 0x252   :  { %v4548_v12 = vpop.permute.xlu1 %1056  ;;  %v1537_v7 = vadd.f32 %v4562_v43, %v1384_v33 }
 0x253   :  { %v1354_v52 = vadd.f32 %v4448_v63, %v1157_v42  ;;  %v1183_v42 = vadd.f32 %v4420_v37, %v4100_v26  ;;  %v1189_v26 = vadd.f32 %v4428_v5, %v4132_v30 }
 0x255   :  { %1996 = vperm.xlu1 %3336, %v1795_v1   ;;  %1999 = vperm.xlu0 %3335, %v1796_v47   ;;  %v1507_v1 = vadd.f32 %v4496_v29, %v1354_v52  ;;  %v1385_v47 = vadd.f32 %v4474_v24, %v1188_v21  ;;  %v1380_v52 = vadd.f32 %v4468_v3, %v1183_v42 }
 0x256   :  { %v4566_v23 = vpop.permute.xlu1 %1493  ;;  %v1386_v58 = vadd.f32 %v4448_v63, %v1189_v26 }
 0x257   :  { %v1506_v0 = vadd.f32 %v4566_v23, %v1353_v41  ;;  %v1502_v60 = vadd.f32 %v4566_v23, %v1349_v25  ;;  %v1631_v36 = vpack.c.bf16 %v1508_v39, %v1507_v1  ;;  %v1538_v25 = vadd.f32 %v4566_v23, %v1385_v47 }
 0x258   :  { %v1534_v21 = vadd.f32 %v4566_v23, %v1381_v31  ;;  %v1533_v39 = vadd.f32 %v4562_v43, %v1380_v52  ;;  %v1213_v47 = vadd.f32 %v4393_v61, %v4142_v49  ;;  %v1539_v42 = vadd.f32 %v4496_v29, %v1386_v58 }
 0x259   :  { %v4583_v19 = vpack.c.bf16 %v1506_v0, %v1505_v57  ;;  %v4585_v22 = vpack.c.bf16 %v1502_v60, %v1501_v48  ;;  %v1387_v57 = vadd.f32 %v4454_v54, %v1190_v4  ;;  %v1214_v0 = vadd.f32 %v4391_v50, %v4140_v6 }
 0x25a   :  { %v1768_v48 = vunpack.c.h.b16 %v1631_v36  ;;  %v4607_v60 = vpack.c.bf16 %v1538_v25, %v1537_v7  ;;  %v1767_v1 = vunpack.c.l.b16 %v1631_v36  ;;  %v4611_v30 = vpack.c.bf16 %v1534_v21, %v1533_v39  ;;  %v5910_v7 = vld [vmem:[#allocation41_spill] sm:$0xff] }
 0x25b   :  { %v1765_v32 = vunpack.c.l.b16 %v4583_v19  ;;  %v1761_v41 = vunpack.c.l.b16 %v4585_v22  ;;  %v1540_v46 = vadd.f32 %v4512_v8, %v1387_v57  ;;  %v1411_v6 = vadd.f32 %v4478_v53, %v1214_v0  ;;  %v5911_v0 = vld [vmem:[#allocation42_spill] sm:$0xff] }
 0x25c   :  { %v1218_v50 = vadd.f32 %v4401_v34, %v4148_v20  ;;  %v1797_v4 = vunpack.c.l.b16 %v4607_v60  ;;  %v1410_v31 = vadd.f32 %v4472_v35, %v1213_v47  ;;  %v1217_v49 = vadd.f32 %v4396_v9, %v4150_v28 }
 0x25d   :  { %1906 = vperm.xlu0 %3335, %v1765_v32   ;;  %1894 = vperm.xlu1 %3336, %v1761_v41   ;;  %v1647_v33 = vpack.c.bf16 %v1540_v46, %v1539_v42  ;;  %v1564_v32 = vadd.f32 %v4512_v8, %v1411_v6  ;;  %v1793_v41 = vunpack.c.l.b16 %v4611_v30  ;;  %v1246_v20 = vadd.f32 %v4405_v27, %v4158_v44 }
 0x25e   :  { %v1563_v61 = vadd.f32 %v4496_v29, %v1410_v31  ;;  %v1415_v36 = vadd.f32 %v4478_v53, %v1218_v50  ;;  %v1414_v52 = vadd.f32 %v4472_v35, %v1217_v49  ;;  %v1245_v57 = vadd.f32 %v4398_v62, %v5910_v7 }
 0x25f   :  { %v1800_v34 = vunpack.c.h.b16 %v1647_v33  ;;  %v1799_v26 = vunpack.c.l.b16 %v1647_v33  ;;  %v1443_v28 = vadd.f32 %v4478_v53, %v1246_v20  ;;  %v1250_v39 = vadd.f32 %v4410_v40, %v5911_v0  ;;  %v5916_v20 = vld [vmem:[#allocation125_spill] sm:$0xff] }
 0x260   :  { %v1659_v25 = vpack.c.bf16 %v1564_v32, %v1563_v61  ;;  %v1568_v21 = vadd.f32 %v4512_v8, %v1415_v36  ;;  %v1567_v9 = vadd.f32 %v4496_v29, %v1414_v52  ;;  %v5913_v32 = vld [vmem:[#allocation21_spill] sm:$0xff]  ;;  %v5915_v36 = vld [vmem:[#allocation19_spill] sm:$0xff]  ;;  %v5917_v52 = vld [vmem:[#allocation22_spill] sm:$0xff] }
 0x261   :  { %1915 = vperm.xlu0 %3335, %v1768_v48   ;;  %1912 = vperm.xlu1 %3336, %v1767_v1   ;;  %v1442_v48 = vadd.f32 %v4472_v35, %v1245_v57  ;;  %v1596_v58 = vadd.f32 %v4512_v8, %v1443_v28  ;;  %v5912_v1 = vld [vmem:[#allocation43_spill] sm:$0xff]  ;;  %v1447_v42 = vadd.f32 %v4478_v53, %v1250_v39  ;;  %v5919_v57 = vld [vmem:[#allocation20_spill] sm:$0xff] }
 0x262   :  { %v1824_v44 = vunpack.c.h.b16 %v1659_v25  ;;  %v1661_v27 = vpack.c.bf16 %v1568_v21, %v1567_v9  ;;  %v1823_v46 = vunpack.c.l.b16 %v1659_v25  ;;  %v1249_v47 = vadd.f32 %v4403_v17, %v5912_v1  ;;  %v5918_v21 = vld [vmem:[#allocation124_spill] sm:$0xff]  ;;  %v5920_v9 = vld [vmem:[#allocation123_spill] sm:$0xff] }
 0x263   :  { %v1595_v62 = vadd.f32 %v4496_v29, %v1442_v48  ;;  %v1159_v28 = vadd.f32 %v5920_v9, %v5919_v57 }
 0x264   :  { %v1828_v6 = vunpack.c.h.b16 %v1661_v27  ;;  %v1446_v40 = vadd.f32 %v4472_v35, %v1249_v47  ;;  %v1827_v33 = vunpack.c.l.b16 %v1661_v27 }
 0x265   :  { %2002 = vperm.xlu0 %3335, %v1797_v4   ;;  %1990 = vperm.xlu1 %3336, %v1793_v41   ;;  %v1675_v50 = vpack.c.bf16 %v1596_v58, %v1595_v62  ;;  %v1600_v4 = vadd.f32 %v4512_v8, %v1447_v42  ;;  %v5914_v41 = vld [vmem:[#allocation127_spill] sm:$0xff]  ;;  %v1356_v58 = vadd.f32 %v4468_v3, %v1159_v28  ;;  %v5921_v62 = vld [vmem:[#allocation44_spill] sm:$0xff]  ;;  %v5922_v42 = vld [vmem:[#allocation129_spill] sm:$0xff] }
 0x266   :  { %v1599_v31 = vadd.f32 %v4496_v29, %v1446_v40  ;;  %v1162_v17 = vadd.f32 %v5914_v41, %v5913_v32  ;;  %v5924_v32 = vld [vmem:[#allocation126_spill] sm:$0xff] }
 0x267   :  { %v1856_v49 = vunpack.c.h.b16 %v1675_v50  ;;  %v1855_v25 = vunpack.c.l.b16 %v1675_v50  ;;  %v1509_v47 = vadd.f32 %v4562_v43, %v1356_v58  ;;  %v1766_v50 = vunpack.c.h.b16 %v4583_v19 }
 0x268   :  { %v1677_v61 = vpack.c.bf16 %v1600_v4, %v1599_v31  ;;  %v1359_v7 = vadd.f32 %v4454_v54, %v1162_v17  ;;  %v1762_v4 = vunpack.c.h.b16 %v4585_v22  ;;  %v5923_v31 = vld [vmem:[#allocation45_spill] sm:$0xff]  ;;  %v5927_v22 = vld [vmem:[#allocation47_spill] sm:$0xff] }
 0x269   :  { %2011 = vperm.xlu0 %3335, %v1800_v34   ;;  %2008 = vperm.xlu1 %3336, %v1799_v26   ;;  %v1160_v34 = vadd.f32 %v5916_v20, %v5915_v36  ;;  %v1161_v26 = vadd.f32 %v5918_v21, %v5917_v52  ;;  %v1191_v17 = vadd.f32 %v5924_v32, %v5923_v31  ;;  %v5926_v36 = vld [vmem:[#allocation130_spill] sm:$0xff] }
 0x26a   :  { %v1860_v39 = vunpack.c.h.b16 %v1677_v61  ;;  %v1512_v27 = vadd.f32 %v4512_v8, %v1359_v7  ;;  %v1859_v48 = vunpack.c.l.b16 %v1677_v61  ;;  %v5925_v61 = vld [vmem:[#allocation46_spill] sm:$0xff]  ;;  %v5928_v7 = vld [vmem:[#allocation128_spill] sm:$0xff] }
 0x26b   :  { %v1357_v0 = vadd.f32 %v4474_v24, %v1160_v34  ;;  %v1194_v34 = vadd.f32 %v5926_v36, %v5925_v61  ;;  %v1388_v52 = vadd.f32 %v4468_v3, %v1191_v17  ;;  %v1193_v57 = vadd.f32 %v5928_v7, %v5927_v22  ;;  %v5933_v17 = vld [vmem:[#allocation49_spill] sm:$0xff] }
 0x26d   :  { %2083 = vperm.xlu0 %3335, %v1824_v44   ;;  %2080 = vperm.xlu1 %3336, %v1823_v46   ;;  %v1358_v44 = vadd.f32 %v4448_v63, %v1161_v26  ;;  %v1510_v46 = vadd.f32 %v4566_v23, %v1357_v0  ;;  %v1541_v28 = vadd.f32 %v4562_v43, %v1388_v52 }
 0x26e   :  { %v1391_v0 = vadd.f32 %v4454_v54, %v1194_v34  ;;  %v1390_v58 = vadd.f32 %v4448_v63, %v1193_v57 }
 0x26f   :  { %v1511_v1 = vadd.f32 %v4496_v29, %v1358_v44 }
 0x271   :  { %2095 = vperm.xlu0 %3335, %v1828_v6   ;;  %2092 = vperm.xlu1 %3336, %v1827_v33   ;;  %v1192_v6 = vadd.f32 %v5922_v42, %v5921_v62  ;;  %v1633_v40 = vpack.c.bf16 %v1512_v27, %v1511_v1  ;;  %v4666_v33 = vpack.c.bf16 %v1510_v46, %v1509_v47  ;;  %v1794_v27 = vunpack.c.h.b16 %v4611_v30  ;;  %v5930_v1 = vld [vmem:[#allocation48_spill] sm:$0xff] }
 0x272   :  { %v1544_v46 = vadd.f32 %v4512_v8, %v1391_v0  ;;  %v1216_v47 = vadd.f32 %v4414_v38, %v5930_v1  ;;  %v1215_v30 = vadd.f32 %v4407_v51, %v5933_v17  ;;  %v5936_v51 = vld [vmem:[#allocation53_spill] sm:$0xff]  ;;  %v5937_v0 = vld [vmem:[#allocation56_spill] sm:$0xff]  ;;  %v5938_v1 = vld [vmem:[#allocation54_spill] sm:$0xff] }
 0x273   :  { %v1769_v26 = vunpack.c.l.b16 %v4666_v33  ;;  %v1772_v62 = vunpack.c.h.b16 %v1633_v40  ;;  %v1221_v57 = vadd.f32 %v4416_v10, %v5936_v51  ;;  %v1248_v10 = vadd.f32 %v4426_v55, %v5938_v1  ;;  %v5944_v51 = vld [vmem:[#allocation133_spill] sm:$0xff] }
 0x275   :  { %2179 = vperm.xlu0 %3335, %v1856_v49   ;;  %2176 = vperm.xlu1 %3336, %v1855_v25   ;;  %v1389_v49 = vadd.f32 %v4474_v24, %v1192_v6  ;;  %v1771_v25 = vunpack.c.l.b16 %v1633_v40  ;;  %v5931_v6 = vld [vmem:[#allocation51_spill] sm:$0xff] }
 0x277   :  { %v1542_v19 = vadd.f32 %v4566_v23, %v1389_v49  ;;  %v5934_v49 = vld [vmem:[#allocation52_spill] sm:$0xff] }
 0x278   :  { %v1222_v61 = vadd.f32 %v4422_v2, %v5934_v49 }
 0x279   :  { %2191 = vperm.xlu0 %3335, %v1860_v39   ;;  %2188 = vperm.xlu1 %3336, %v1859_v48   ;;  %v5929_v39 = vld [vmem:[#allocation50_spill] sm:$0xff]  ;;  %v4683_v48 = vpack.c.bf16 %v1542_v19, %v1541_v28  ;;  %v1798_v19 = vunpack.c.h.b16 %v4607_v60 }
 0x27a   :  { %v1220_v44 = vadd.f32 %v4418_v11, %v5929_v39  ;;  %v5932_v11 = vld [vmem:[#allocation148_spill] sm:$0xff]  ;;  %v1419_v28 = vadd.f32 %v4478_v53, %v1222_v61  ;;  %v1252_v39 = vadd.f32 %v4430_v18, %v5937_v0 }
 0x27b   :  { %v1413_v34 = vadd.f32 %v5932_v11, %v1216_v47  ;;  %v1801_v38 = vunpack.c.l.b16 %v4683_v48  ;;  %v1445_v55 = vadd.f32 %v5932_v11, %v1248_v10  ;;  %v5947_v10 = vld [vmem:[#allocation25_spill] sm:$0xff] }
 0x27c   :  { %v1417_v31 = vadd.f32 %v5932_v11, %v1220_v44 }
 0x27d   :  { %1909 = vperm.xlu0 %3335, %v1766_v50   ;;  %1897 = vperm.xlu1 %3336, %v1762_v4   ;;  %v1219_v50 = vadd.f32 %v4412_v56, %v5931_v6  ;;  %v1543_v4 = vadd.f32 %v4496_v29, %v1390_v58  ;;  %v1566_v22 = vadd.f32 %v4566_v23, %v1413_v34  ;;  %v5939_v6 = vld [vmem:[#allocation57_spill] sm:$0xff] }
 0x27e   :  { %v1570_v56 = vadd.f32 %v4566_v23, %v1417_v31  ;;  %v1418_v58 = vadd.f32 %v4472_v35, %v1221_v57  ;;  %v5940_v31 = vld [vmem:[#allocation55_spill] sm:$0xff] }
 0x27f   :  { %v1649_v40 = vpack.c.bf16 %v1544_v46, %v1543_v4  ;;  %v1572_v46 = vadd.f32 %v4512_v8, %v1419_v28  ;;  %v1449_v4 = vadd.f32 %v5932_v11, %v1252_v39  ;;  %v1247_v17 = vadd.f32 %v4420_v37, %v5940_v31  ;;  %v5942_v37 = vld [vmem:[#allocation59_spill] sm:$0xff]  ;;  %v5950_v31 = vld [vmem:[#allocation132_spill] sm:$0xff] }
 0x280   :  { %v1571_v18 = vadd.f32 %v4496_v29, %v1418_v58  ;;  %v5945_v58 = vld [vmem:[#allocation24_spill] sm:$0xff] }
 0x281   :  { %1924 = vperm.xlu0 %3335, %v1771_v25   ;;  %1918 = vperm.xlu1 %3336, %v1769_v26   ;;  %v5935_v25 = vld [vmem:[#allocation146_spill] sm:$0xff]  ;;  %v1803_v47 = vunpack.c.l.b16 %v1649_v40 }
 0x282   :  { %v1416_v52 = vadd.f32 %v5935_v25, %v1219_v50  ;;  %v1412_v26 = vadd.f32 %v5935_v25, %v1215_v30  ;;  %v1251_v50 = vadd.f32 %v4424_v14, %v5939_v6  ;;  %v5941_v30 = vld [vmem:[#allocation58_spill] sm:$0xff]  ;;  %v1663_v34 = vpack.c.bf16 %v1572_v46, %v1571_v18  ;;  %v5946_v46 = vld [vmem:[#allocation131_spill] sm:$0xff] }
 0x283   :  { %v1254_v49 = vadd.f32 %v4434_v59, %v5941_v30  ;;  %v1602_v14 = vadd.f32 %v4566_v23, %v1449_v4  ;;  %v1163_v1 = vadd.f32 %v5946_v46, %v5945_v58  ;;  %v5949_v4 = vld [vmem:[#allocation26_spill] sm:$0xff] }
 0x284   :  { %v1569_v2 = vadd.f32 %v4562_v43, %v1416_v52  ;;  %v1565_v44 = vadd.f32 %v4562_v43, %v1412_v26  ;;  %v1444_v52 = vadd.f32 %v5935_v25, %v1247_v17  ;;  %v1832_v28 = vunpack.c.h.b16 %v1663_v34 }
 0x285   :  { %1993 = vperm.xlu0 %3335, %v1794_v27   ;;  %1927 = vperm.xlu1 %3336, %v1772_v62   ;;  %v1804_v27 = vunpack.c.h.b16 %v1649_v40  ;;  %v1451_v26 = vadd.f32 %v4478_v53, %v1254_v49  ;;  %v1165_v17 = vadd.f32 %v5950_v31, %v5949_v4 }
 0x286   :  { %v4711_v60 = vpack.c.bf16 %v1570_v56, %v1569_v2  ;;  %v4717_v62 = vpack.c.bf16 %v1566_v22, %v1565_v44  ;;  %v1598_v56 = vadd.f32 %v4566_v23, %v1445_v55  ;;  %v5943_v22 = vld [vmem:[#allocation23_spill] sm:$0xff]  ;;  %v1597_v2 = vadd.f32 %v4562_v43, %v1444_v52  ;;  %v5951_v52 = vld [vmem:[#allocation61_spill] sm:$0xff] }
 0x287   :  { %v1164_v57 = vadd.f32 %v5944_v51, %v5943_v22  ;;  %v1604_v44 = vadd.f32 %v4512_v8, %v1451_v26  ;;  %v1360_v55 = vadd.f32 %v4468_v3, %v1163_v1 }
 0x288   :  { %v1829_v61 = vunpack.c.l.b16 %v4711_v60  ;;  %v1825_v40 = vunpack.c.l.b16 %v4717_v62 }
 0x289   :  { %2014 = vperm.xlu0 %3335, %v1801_v38   ;;  %2005 = vperm.xlu1 %3336, %v1798_v19   ;;  %v1448_v38 = vadd.f32 %v5935_v25, %v1251_v50  ;;  %v1253_v19 = vadd.f32 %v4428_v5, %v5942_v37  ;;  %v4745_v5 = vpack.c.bf16 %v1598_v56, %v1597_v2  ;;  %v5952_v56 = vld [vmem:[#allocation137_spill] sm:$0xff]  ;;  %v5954_v2 = vld [vmem:[#allocation134_spill] sm:$0xff] }
 0x28a   :  { %v1361_v18 = vadd.f32 %v4474_v24, %v1164_v57  ;;  %v1196_v37 = vadd.f32 %v5952_v56, %v5951_v52  ;;  %v5953_v57 = vld [vmem:[#allocation62_spill] sm:$0xff] }
 0x28b   :  { %v1601_v59 = vadd.f32 %v4562_v43, %v1448_v38  ;;  %v1450_v39 = vadd.f32 %v4472_v35, %v1253_v19 }
 0x28c   :  { %v1393_v1 = vadd.f32 %v4474_v24, %v1196_v37 }
 0x28d   :  { %2023 = vperm.xlu0 %3335, %v1804_v27   ;;  %2020 = vperm.xlu1 %3336, %v1803_v47   ;;  %v4741_v0 = vpack.c.bf16 %v1602_v14, %v1601_v59  ;;  %v1831_v27 = vunpack.c.l.b16 %v1663_v34  ;;  %v5948_v47 = vld [vmem:[#allocation135_spill] sm:$0xff]  ;;  %v1603_v50 = vadd.f32 %v4496_v29, %v1450_v39  ;;  %v1857_v34 = vunpack.c.l.b16 %v4745_v5 }
 0x28e   :  { %v1166_v6 = vadd.f32 %v5948_v47, %v5947_v10  ;;  %v1513_v14 = vadd.f32 %v4562_v43, %v1360_v55  ;;  %v5955_v39 = vld [vmem:[#allocation63_spill] sm:$0xff]  ;;  %v5957_v10 = vld [vmem:[#allocation64_spill] sm:$0xff] }
 0x28f   :  { %v1861_v30 = vunpack.c.l.b16 %v4741_v0  ;;  %v1679_v49 = vpack.c.bf16 %v1604_v44, %v1603_v50  ;;  %v5956_v44 = vld [vmem:[#allocation138_spill] sm:$0xff] }
 0x290   :  { %v1363_v38 = vadd.f32 %v4454_v54, %v1166_v6  ;;  %v5958_v6 = vld [vmem:[#allocation136_spill] sm:$0xff] }
 0x291   :  { %2098 = vperm.xlu0 %3335, %v1829_v61   ;;  %2086 = vperm.xlu1 %3336, %v1825_v40   ;;  %v1514_v61 = vadd.f32 %v4566_v23, %v1361_v18  ;;  %v1362_v40 = vadd.f32 %v4448_v63, %v1165_v17  ;;  %v1864_v19 = vunpack.c.h.b16 %v1679_v49  ;;  %v1863_v22 = vunpack.c.l.b16 %v1679_v49 }
 0x292   :  { %v1516_v26 = vadd.f32 %v4512_v8, %v1363_v38  ;;  %v1197_v50 = vadd.f32 %v5958_v6, %v5957_v10  ;;  %v1770_v49 = vunpack.c.h.b16 %v4666_v33  ;;  %v4783_v38 = vpop.permute.xlu1 %912  ;;  %v1802_v10 = vunpack.c.h.b16 %v4683_v48 }
 0x293   :  { %v4764_v59 = vpack.c.bf16 %v1514_v61, %v1513_v14  ;;  %v1515_v58 = vadd.f32 %v4496_v29, %v1362_v40 }
 0x294   :  { %v1394_v14 = vadd.f32 %v4448_v63, %v1197_v50  ;;  %v5961_v50 = vld [vmem:[#allocation68_spill] sm:$0xff] }
 0x295   :  { %2107 = vperm.xlu0 %3335, %v1832_v28   ;;  %2104 = vperm.xlu1 %3336, %v1831_v27   ;;  %v1195_v28 = vadd.f32 %v5954_v2, %v5953_v57  ;;  %v1198_v27 = vadd.f32 %v5956_v44, %v5955_v39  ;;  %v1773_v18 = vunpack.c.l.b16 %v4764_v59  ;;  %v1635_v4 = vpack.c.bf16 %v1516_v26, %v1515_v58  ;;  %v5959_v26 = vld [vmem:[#allocation67_spill] sm:$0xff]  ;;  %v5960_v39 = vld [vmem:[#allocation65_spill] sm:$0xff] }
 0x296   :  { %v1547_v33 = vadd.f32 %v4496_v29, %v1394_v14 }
 0x297   :  { %v1392_v17 = vadd.f32 %v4468_v3, %v1195_v28  ;;  %v1395_v55 = vadd.f32 %v4454_v54, %v1198_v27  ;;  %v1776_v40 = vunpack.c.h.b16 %v1635_v4  ;;  %v1224_v27 = vadd.f32 %v5916_v20, %v5960_v39  ;;  %v5964_v39 = vld [vmem:[#allocation70_spill] sm:$0xff] }
 0x299   :  { %2194 = vperm.xlu0 %3335, %v1861_v30   ;;  %2182 = vperm.xlu1 %3336, %v1857_v34   ;;  %v1546_v30 = vadd.f32 %v4566_v23, %v1393_v1  ;;  %v1545_v61 = vadd.f32 %v4562_v43, %v1392_v17  ;;  %v4781_v34 = vpop.permute.xlu0 %908  ;;  %v1548_v37 = vadd.f32 %v4512_v8, %v1395_v55  ;;  %v4797_v1 = vpop.permute.xlu1 %923  ;;  %v5962_v17 = vld [vmem:[#allocation66_spill] sm:$0xff] }
 0x29b   :  { %v4786_v52 = vpack.c.bf16 %v1546_v30, %v1545_v61  ;;  %v1651_v28 = vpack.c.bf16 %v1548_v37, %v1547_v33  ;;  %v1421_v30 = vadd.f32 %v5932_v11, %v1224_v27  ;;  %v1255_v27 = vadd.f32 %v5924_v32, %v5964_v39  ;;  %v5971_v39 = vld [vmem:[#allocation29_spill] sm:$0xff] }
 0x29d   :  { %2203 = vperm.xlu0 %3335, %v1864_v19   ;;  %2200 = vperm.xlu1 %3336, %v1863_v22   ;;  %v1775_v19 = vunpack.c.l.b16 %v1635_v4  ;;  %v1226_v22 = vadd.f32 %v5914_v41, %v5959_v26  ;;  %v1805_v57 = vunpack.c.l.b16 %v4786_v52  ;;  %v4795_v58 = vpop.permute.xlu0 %919  ;;  %v1223_v41 = vadd.f32 %v5920_v9, %v5962_v17  ;;  %v4813_v37 = vpop.permute.xlu1 %1064 }
 0x29e   :  { %v1807_v61 = vunpack.c.l.b16 %v1651_v28  ;;  %v1574_v14 = vadd.f32 %v4566_v23, %v1421_v30  ;;  %v1830_v26 = vunpack.c.h.b16 %v4711_v60  ;;  %v5966_v30 = vld [vmem:[#allocation72_spill] sm:$0xff] }
 0x29f   :  { %v1423_v4 = vadd.f32 %v4478_v53, %v1226_v22  ;;  %v1420_v48 = vadd.f32 %v5935_v25, %v1223_v41  ;;  %v1257_v32 = vadd.f32 %v5928_v7, %v5966_v30 }
 0x2a1   :  { %1930 = vperm.xlu0 %3335, %v1773_v18   ;;  %1921 = vperm.xlu1 %3336, %v1770_v49   ;;  %v1225_v18 = vadd.f32 %v5918_v21, %v5961_v50  ;;  %v1808_v49 = vunpack.c.h.b16 %v1651_v28  ;;  %v1576_v55 = vadd.f32 %v4512_v8, %v1423_v4  ;;  %v1573_v9 = vadd.f32 %v4562_v43, %v1420_v48  ;;  %v5965_v50 = vld [vmem:[#allocation71_spill] sm:$0xff]  ;;  %v5969_v48 = vld [vmem:[#allocation28_spill] sm:$0xff] }
 0x2a3   :  { %v1422_v20 = vadd.f32 %v4472_v35, %v1225_v18  ;;  %v4820_v28 = vpack.c.bf16 %v1574_v14, %v1573_v9  ;;  %v1258_v18 = vadd.f32 %v5926_v36, %v5965_v50  ;;  %v5970_v14 = vld [vmem:[#allocation139_spill] sm:$0xff]  ;;  %v1858_v9 = vunpack.c.h.b16 %v4745_v5 }
 0x2a5   :  { %1939 = vperm.xlu0 %3335, %v1776_v40   ;;  %1936 = vperm.xlu1 %3336, %v1775_v19   ;;  %v1575_v21 = vadd.f32 %v4496_v29, %v1422_v20  ;;  %v4811_v40 = vpop.permute.xlu0 %1060  ;;  %v5963_v19 = vld [vmem:[#allocation69_spill] sm:$0xff]  ;;  %v1833_v41 = vunpack.c.l.b16 %v4820_v28 }
 0x2a6   :  { %v1256_v33 = vadd.f32 %v5922_v42, %v5963_v19  ;;  %v1452_v42 = vadd.f32 %v5935_v25, %v1255_v27  ;;  %v5968_v20 = vld [vmem:[#allocation141_spill] sm:$0xff]  ;;  %v5972_v27 = vld [vmem:[#allocation143_spill] sm:$0xff] }
 0x2a7   :  { %v1665_v22 = vpack.c.bf16 %v1576_v55, %v1575_v21  ;;  %v1167_v21 = vadd.f32 %v5970_v14, %v5969_v48 }
 0x2a8   :  { %v1605_v36 = vadd.f32 %v4562_v43, %v1452_v42  ;;  %v5974_v42 = vld [vmem:[#allocation30_spill] sm:$0xff] }
 0x2a9   :  { %2026 = vperm.xlu0 %3335, %v1805_v57   ;;  %2017 = vperm.xlu1 %3336, %v1802_v10   ;;  %v1826_v57 = vunpack.c.h.b16 %v4717_v62  ;;  %v1453_v10 = vadd.f32 %v5932_v11, %v1256_v33  ;;  %v1835_v4 = vunpack.c.l.b16 %v1665_v22  ;;  %v4829_v17 = vpop.permute.xlu0 %1071  ;;  %v4831_v62 = vpop.permute.xlu1 %1075  ;;  %v1454_v33 = vadd.f32 %v4472_v35, %v1257_v32 }
 0x2ab   :  { %v1606_v60 = vadd.f32 %v4566_v23, %v1453_v10  ;;  %v1170_v10 = vadd.f32 %v5972_v27, %v5971_v39  ;;  %v1607_v50 = vadd.f32 %v4496_v29, %v1454_v33  ;;  %v5979_v33 = vld [vmem:[#allocation142_spill] sm:$0xff] }
 0x2ad   :  { %2035 = vperm.xlu0 %3335, %v1808_v49   ;;  %2032 = vperm.xlu1 %3336, %v1807_v61   ;;  %v5967_v49 = vld [vmem:[#allocation27_spill] sm:$0xff]  ;;  %v1455_v61 = vadd.f32 %v4478_v53, %v1258_v18  ;;  %v4843_v19 = vpack.c.bf16 %v1606_v60, %v1605_v36  ;;  %v1364_v18 = vadd.f32 %v4468_v3, %v1167_v21  ;;  %v4854_v5 = vpop.permute.xlu1 %931  ;;  %v5975_v60 = vld [vmem:[#allocation140_spill] sm:$0xff]  ;;  %v5976_v36 = vld [vmem:[#allocation73_spill] sm:$0xff] }
 0x2ae   :  { %v1168_v55 = vadd.f32 %v5968_v20, %v5967_v49  ;;  %v1862_v49 = vunpack.c.h.b16 %v4741_v0 }
 0x2af   :  { %v1608_v7 = vadd.f32 %v4512_v8, %v1455_v61  ;;  %v5977_v61 = vld [vmem:[#allocation145_spill] sm:$0xff]  ;;  %v1517_v21 = vadd.f32 %v4562_v43, %v1364_v18  ;;  %v5983_v18 = vld [vmem:[#allocation147_spill] sm:$0xff] }
 0x2b0   :  { %v1200_v48 = vadd.f32 %v5977_v61, %v5976_v36  ;;  %v5982_v36 = vld [vmem:[#allocation75_spill] sm:$0xff] }
 0x2b1   :  { %2101 = vperm.xlu0 %3335, %v1830_v26   ;;  %2089 = vperm.xlu1 %3336, %v1826_v57   ;;  %v1836_v26 = vunpack.c.h.b16 %v1665_v22  ;;  %v1365_v57 = vadd.f32 %v4474_v24, %v1168_v55  ;;  %v1865_v22 = vunpack.c.l.b16 %v4843_v19  ;;  %v1681_v30 = vpack.c.bf16 %v1608_v7, %v1607_v50 }
 0x2b2   :  { %v1367_v55 = vadd.f32 %v4454_v54, %v1170_v10  ;;  %v4873_v10 = vpop.permute.xlu1 %1083 }
 0x2b3   :  { %v1518_v32 = vadd.f32 %v4566_v23, %v1365_v57  ;;  %5981 = vst [vmem:[#allocation43_spill] sm:$0xff] %v4873_v10  ;;  %v1867_v50 = vunpack.c.l.b16 %v1681_v30 }
 0x2b4   :  { %v1520_v57 = vadd.f32 %v4512_v8, %v1367_v55 }
 0x2b5   :  { %2116 = vperm.xlu0 %3335, %v1835_v4   ;;  %2110 = vperm.xlu1 %3336, %v1833_v41   ;;  %v4852_v4 = vpop.permute.xlu0 %927  ;;  %v1169_v41 = vadd.f32 %v5975_v60, %v5974_v42  ;;  %v1868_v42 = vunpack.c.h.b16 %v1681_v30  ;;  %v4868_v7 = vpack.c.bf16 %v1518_v32, %v1517_v21  ;;  %v5984_v32 = vld [vmem:[#allocation76_spill] sm:$0xff] }
 0x2b6   :  { %5973 = vst [vmem:[#allocation41_spill] sm:$0xff] %v4852_v4  ;;  %v1202_v4 = vadd.f32 %v5983_v18, %v5982_v36  ;;  %v5985_v21 = vld [vmem:[#allocation144_spill] sm:$0xff]  ;;  %v1774_v36 = vunpack.c.h.b16 %v4764_v59 }
 0x2b7   :  { %v1366_v39 = vadd.f32 %v4448_v63, %v1169_v41  ;;  %v1777_v55 = vunpack.c.l.b16 %v4868_v7 }
 0x2b9   :  { %2185 = vperm.xlu0 %3335, %v1858_v9   ;;  %2119 = vperm.xlu1 %3336, %v1836_v26   ;;  %v5978_v9 = vld [vmem:[#allocation74_spill] sm:$0xff]  ;;  %v4871_v0 = vpop.permute.xlu0 %1079 }
 0x2ba   :  { %v1199_v26 = vadd.f32 %v5979_v33, %v5978_v9  ;;  %5980 = vst [vmem:[#allocation42_spill] sm:$0xff] %v4871_v0  ;;  %v1201_v9 = vadd.f32 %v5985_v21, %v5984_v32 }
 0x2bc   :  { %v1396_v41 = vadd.f32 %v4468_v3, %v1199_v26  ;;  %v1398_v32 = vadd.f32 %v4448_v63, %v1201_v9 }
 0x2bd   :  { %2206 = vperm.xlu0 %3335, %v1865_v22   ;;  %2197 = vperm.xlu1 %3336, %v1862_v49   ;;  %v1397_v22 = vadd.f32 %v4474_v24, %v1200_v48  ;;  %v1519_v49 = vadd.f32 %v4496_v29, %v1366_v39  ;;  %v5988_v39 = vld [vmem:[#allocation77_spill] sm:$0xff] }
 0x2be   :  { %v1549_v26 = vadd.f32 %v4562_v43, %v1396_v41  ;;  %v1551_v41 = vadd.f32 %v4496_v29, %v1398_v32 }
 0x2bf   :  { %v1637_v0 = vpack.c.bf16 %v1520_v57, %v1519_v49  ;;  %v1550_v10 = vadd.f32 %v4566_v23, %v1397_v22 }
 0x2c1   :  { %2215 = vperm.xlu0 %3335, %v1868_v42   ;;  %2212 = vperm.xlu1 %3336, %v1867_v50   ;;  %v1399_v42 = vadd.f32 %v4454_v54, %v1202_v4  ;;  %v1228_v50 = vadd.f32 %v5944_v51, %v5988_v39  ;;  %v1780_v57 = vunpack.c.h.b16 %v1637_v0  ;;  %v4894_v49 = vpack.c.bf16 %v1550_v10, %v1549_v26  ;;  %v5991_v4 = vld [vmem:[#allocation78_spill] sm:$0xff] }
 0x2c2   :  { %v1779_v59 = vunpack.c.l.b16 %v1637_v0  ;;  %v1806_v0 = vunpack.c.h.b16 %v4786_v52 }
 0x2c3   :  { %v1552_v22 = vadd.f32 %v4512_v8, %v1399_v42  ;;  %v1425_v51 = vadd.f32 %v5932_v11, %v1228_v50  ;;  %v1809_v10 = vunpack.c.l.b16 %v4894_v49 }
 0x2c4   :  { %v4884_v30 = vpop.permute.xlu1 %1891  ;;  %v4886_v48 = vpop.permute.xlu0 %1888 }
 0x2c5   :  { %5986 = vst [vmem:[#allocation21_spill] sm:$0xff] %v4884_v30  ;;  %5987 = vst [vmem:[#allocation127_spill] sm:$0xff] %v4886_v48  ;;  %1942 = vperm.xlu0 %3335, %v1777_v55   ;;  %1933 = vperm.xlu1 %3336, %v1774_v36   ;;  %v1227_v55 = vadd.f32 %v5946_v46, %v5991_v4  ;;  %v5992_v36 = vld [vmem:[#allocation79_spill] sm:$0xff]  ;;  %v1653_v42 = vpack.c.bf16 %v1552_v22, %v1551_v41  ;;  %v5997_v41 = vld [vmem:[#allocation82_spill] sm:$0xff] }
 0x2c6   :  { %v1230_v9 = vadd.f32 %v5948_v47, %v5992_v36  ;;  %v1578_v39 = vadd.f32 %v4566_v23, %v1425_v51  ;;  %v1259_v51 = vadd.f32 %v5954_v2, %v5997_v41 }
 0x2c7   :  { %v1424_v26 = vadd.f32 %v5935_v25, %v1227_v55  ;;  %v1812_v4 = vunpack.c.h.b16 %v1653_v42 }
 0x2c8   :  { %v4897_v30 = vpop.permute.xlu1 %1900  ;;  %v4899_v48 = vpop.permute.xlu0 %1903  ;;  %v1427_v50 = vadd.f32 %v4478_v53, %v1230_v9  ;;  %v5998_v9 = vld [vmem:[#allocation83_spill] sm:$0xff] }
 0x2c9   :  { %5989 = vst [vmem:[#allocation19_spill] sm:$0xff] %v4897_v30  ;;  %5990 = vst [vmem:[#allocation125_spill] sm:$0xff] %v4899_v48  ;;  %1951 = vperm.xlu0 %3335, %v1780_v57   ;;  %1948 = vperm.xlu1 %3336, %v1779_v59   ;;  %v5993_v48 = vld [vmem:[#allocation80_spill] sm:$0xff]  ;;  %v1577_v32 = vadd.f32 %v4562_v43, %v1424_v26  ;;  %v5994_v57 = vld [vmem:[#allocation81_spill] sm:$0xff] }
 0x2ca   :  { %v1229_v46 = vadd.f32 %v5950_v31, %v5993_v48  ;;  %v1260_v47 = vadd.f32 %v5952_v56, %v5994_v57  ;;  %v1580_v31 = vadd.f32 %v4512_v8, %v1427_v50  ;;  %v1811_v48 = vunpack.c.l.b16 %v1653_v42  ;;  %v5999_v42 = vld [vmem:[#allocation84_spill] sm:$0xff] }
 0x2cb   :  { %v4921_v55 = vpack.c.bf16 %v1578_v39, %v1577_v32  ;;  %v1261_v32 = vadd.f32 %v5958_v6, %v5999_v42  ;;  %v1834_v57 = vunpack.c.h.b16 %v4820_v28 }
 0x2cc   :  { %v4917_v59 = vpop.permute.xlu1 %1984  ;;  %v4919_v22 = vpop.permute.xlu0 %1987  ;;  %v1426_v52 = vadd.f32 %v4472_v35, %v1229_v46  ;;  %v1457_v56 = vadd.f32 %v5932_v11, %v1260_v47  ;;  %v6002_v47 = vld [vmem:[#allocation31_spill] sm:$0xff] }
 0x2cd   :  { %2038 = vperm.xlu0 %3335, %v1809_v10   ;;  %5995 = vst [vmem:[#allocation22_spill] sm:$0xff] %v4917_v59  ;;  %5996 = vst [vmem:[#allocation124_spill] sm:$0xff] %v4919_v22  ;;  %2029 = vperm.xlu1 %3336, %v1806_v0   ;;  %v1262_v10 = vadd.f32 %v5956_v44, %v5998_v9  ;;  %v1837_v26 = vunpack.c.l.b16 %v4921_v55  ;;  %v1456_v0 = vadd.f32 %v5935_v25, %v1259_v51  ;;  %v6005_v51 = vld [vmem:[#allocation33_spill] sm:$0xff] }
 0x2ce   :  { %v1579_v36 = vadd.f32 %v4496_v29, %v1426_v52  ;;  %v1610_v46 = vadd.f32 %v4566_v23, %v1457_v56  ;;  %v1172_v44 = vadd.f32 %v4525_v45, %v6002_v47  ;;  %v1458_v6 = vadd.f32 %v4472_v35, %v1261_v32  ;;  %v6009_v47 = vld [vmem:[#allocation150_spill] sm:$0xff] }
 0x2cf   :  { %v1459_v52 = vadd.f32 %v4478_v53, %v1262_v10  ;;  %v6008_v10 = vld [vmem:[#allocation34_spill] sm:$0xff] }
 0x2d0   :  { %v1667_v39 = vpack.c.bf16 %v1580_v31, %v1579_v36  ;;  %v4936_v2 = vpop.permute.xlu1 %1996  ;;  %v4938_v50 = vpop.permute.xlu0 %1999  ;;  %v6003_v31 = vld [vmem:[#allocation32_spill] sm:$0xff]  ;;  %v1174_v36 = vadd.f32 %v4537_v13, %v6005_v51  ;;  %v1611_v32 = vadd.f32 %v4496_v29, %v1458_v6 }
 0x2d1   :  { %2047 = vperm.xlu0 %3335, %v1812_v4   ;;  %2044 = vperm.xlu1 %3336, %v1811_v48   ;;  %6000 = vst [vmem:[#allocation20_spill] sm:$0xff] %v4936_v2  ;;  %6001 = vst [vmem:[#allocation123_spill] sm:$0xff] %v4938_v50  ;;  %v1609_v4 = vadd.f32 %v4562_v43, %v1456_v0  ;;  %v6004_v48 = vld [vmem:[#allocation149_spill] sm:$0xff]  ;;  %v1612_v28 = vadd.f32 %v4512_v8, %v1459_v52 }
 0x2d2   :  { %v1171_v41 = vadd.f32 %v6004_v48, %v6003_v31  ;;  %v1840_v56 = vunpack.c.h.b16 %v1667_v39  ;;  %v1839_v0 = vunpack.c.l.b16 %v1667_v39  ;;  %v1173_v50 = vadd.f32 %v6009_v47, %v6008_v10 }
 0x2d3   :  { %v4950_v9 = vpack.c.bf16 %v1610_v46, %v1609_v4  ;;  %v1371_v46 = vadd.f32 %v4454_v54, %v1174_v36  ;;  %v1683_v52 = vpack.c.bf16 %v1612_v28, %v1611_v32  ;;  %v1866_v39 = vunpack.c.h.b16 %v4843_v19  ;;  %v6013_v36 = vld [vmem:[#allocation86_spill] sm:$0xff] }
 0x2d4   :  { %v1368_v31 = vadd.f32 %v4468_v3, %v1171_v41  ;;  %v1370_v10 = vadd.f32 %v4448_v63, %v1173_v50 }
 0x2d5   :  { %2122 = vperm.xlu0 %3335, %v1837_v26   ;;  %2113 = vperm.xlu1 %3336, %v1834_v57   ;;  %v1369_v57 = vadd.f32 %v4474_v24, %v1172_v44  ;;  %v1869_v4 = vunpack.c.l.b16 %v4950_v9  ;;  %v6011_v44 = vld [vmem:[#allocation85_spill] sm:$0xff]  ;;  %v1524_v28 = vadd.f32 %v4512_v8, %v1371_v46  ;;  %v1872_v19 = vunpack.c.h.b16 %v1683_v52 }
 0x2d6   :  { %v1521_v41 = vadd.f32 %v4562_v43, %v1368_v31 }
 0x2d7   :  { %v1522_v51 = vadd.f32 %v4566_v23, %v1369_v57  ;;  %v6015_v57 = vld [vmem:[#allocation87_spill] sm:$0xff] }
 0x2d8   :  { %v4953_v42 = vpop.permute.xlu1 %1894  ;;  %v4955_v26 = vpop.permute.xlu0 %1906  ;;  %v1206_v32 = vadd.f32 %v4548_v12, %v6015_v57 }
 0x2d9   :  { %6006 = vst [vmem:[#allocation44_spill] sm:$0xff] %v4953_v42  ;;  %6007 = vst [vmem:[#allocation129_spill] sm:$0xff] %v4955_v26  ;;  %2131 = vperm.xlu0 %3335, %v1840_v56   ;;  %2128 = vperm.xlu1 %3336, %v1839_v0   ;;  %v1204_v56 = vadd.f32 %v4543_v16, %v6011_v44  ;;  %v6014_v0 = vld [vmem:[#allocation151_spill] sm:$0xff]  ;;  %v4979_v59 = vpack.c.bf16 %v1522_v51, %v1521_v41  ;;  %v1871_v44 = vunpack.c.l.b16 %v1683_v52  ;;  %v6058_v42 = vld [vmem:[#allocation110_spill] sm:$0xff] }
 0x2da   :  { %v1203_v22 = vadd.f32 %v6014_v0, %v6013_v36 }
 0x2db   :  { %v1781_v51 = vunpack.c.l.b16 %v4979_v59 }
 0x2dc   :  { %v4965_v2 = vpop.permute.xlu0 %1915  ;;  %v4971_v6 = vpop.permute.xlu1 %1912  ;;  %v1400_v46 = vadd.f32 %v4468_v3, %v1203_v22  ;;  %v6021_v22 = vld [vmem:[#allocation89_spill] sm:$0xff] }
 0x2dd   :  { %6010 = vst [vmem:[#allocation45_spill] sm:$0xff] %v4965_v2  ;;  %6012 = vst [vmem:[#allocation126_spill] sm:$0xff] %v4971_v6  ;;  %2218 = vperm.xlu0 %3335, %v1869_v4   ;;  %2209 = vperm.xlu1 %3336, %v1866_v39   ;;  %v1523_v2 = vadd.f32 %v4496_v29, %v1370_v10  ;;  %v6017_v4 = vld [vmem:[#allocation88_spill] sm:$0xff]  ;;  %v1401_v6 = vadd.f32 %v4474_v24, %v1204_v56  ;;  %v1778_v10 = vunpack.c.h.b16 %v4868_v7  ;;  %v6022_v7 = vld [vmem:[#allocation90_spill] sm:$0xff] }
 0x2de   :  { %v1205_v31 = vadd.f32 %v4546_v15, %v6017_v4  ;;  %v1403_v39 = vadd.f32 %v4454_v54, %v1206_v32  ;;  %v1232_v32 = vadd.f32 %v5968_v20, %v6021_v22 }
 0x2df   :  { %v1639_v41 = vpack.c.bf16 %v1524_v28, %v1523_v2  ;;  %v1554_v52 = vadd.f32 %v4566_v23, %v1401_v6 }
 0x2e0   :  { %v4981_v50 = vpop.permute.xlu0 %2002  ;;  %v4987_v36 = vpop.permute.xlu1 %1990  ;;  %v1402_v4 = vadd.f32 %v4448_v63, %v1205_v31  ;;  %v1231_v31 = vadd.f32 %v5970_v14, %v6022_v7  ;;  %v1429_v20 = vadd.f32 %v5932_v11, %v1232_v32 }
 0x2e1   :  { %6016 = vst [vmem:[#allocation46_spill] sm:$0xff] %v4981_v50  ;;  %6018 = vst [vmem:[#allocation130_spill] sm:$0xff] %v4987_v36  ;;  %2227 = vperm.xlu0 %3335, %v1872_v19   ;;  %2224 = vperm.xlu1 %3336, %v1871_v44   ;;  %v1553_v19 = vadd.f32 %v4562_v43, %v1400_v46  ;;  %v1556_v44 = vadd.f32 %v4512_v8, %v1403_v39  ;;  %v1784_v2 = vunpack.c.h.b16 %v1639_v41  ;;  %v6024_v39 = vld [vmem:[#allocation92_spill] sm:$0xff]  ;;  %v6033_v50 = vld [vmem:[#allocation38_spill] sm:$0xff] }
 0x2e2   :  { %v1783_v36 = vunpack.c.l.b16 %v1639_v41  ;;  %v1555_v46 = vadd.f32 %v4496_v29, %v1402_v4  ;;  %v1428_v22 = vadd.f32 %v5935_v25, %v1231_v31  ;;  %v1582_v14 = vadd.f32 %v4566_v23, %v1429_v20  ;;  %v6026_v20 = vld [vmem:[#allocation94_spill] sm:$0xff] }
 0x2e3   :  { %v5003_v28 = vpack.c.bf16 %v1554_v52, %v1553_v19  ;;  %v1233_v52 = vadd.f32 %v5975_v60, %v6024_v39 }
 0x2e4   :  { %v4993_v57 = vpop.permute.xlu0 %2011  ;;  %v4997_v56 = vpop.permute.xlu1 %2008  ;;  %v1655_v41 = vpack.c.bf16 %v1556_v44, %v1555_v46  ;;  %v1581_v32 = vadd.f32 %v4562_v43, %v1428_v22 }
 0x2e5   :  { %6019 = vst [vmem:[#allocation47_spill] sm:$0xff] %v4993_v57  ;;  %6020 = vst [vmem:[#allocation128_spill] sm:$0xff] %v4997_v56  ;;  %1954 = vperm.xlu0 %3335, %v1781_v51   ;;  %1945 = vperm.xlu1 %3336, %v1778_v10   ;;  %v6023_v57 = vld [vmem:[#allocation91_spill] sm:$0xff]  ;;  %v1813_v19 = vunpack.c.l.b16 %v5003_v28  ;;  %v1430_v60 = vadd.f32 %v4472_v35, %v1233_v52 }
 0x2e6   :  { %v1234_v51 = vadd.f32 %v5972_v27, %v6023_v57  ;;  %v1810_v27 = vunpack.c.h.b16 %v4894_v49  ;;  %v5030_v31 = vpack.c.bf16 %v1582_v14, %v1581_v32  ;;  %v1263_v49 = vadd.f32 %v5979_v33, %v6026_v20  ;;  %v6028_v14 = vld [vmem:[#allocation96_spill] sm:$0xff]  ;;  %v6029_v33 = vld [vmem:[#allocation35_spill] sm:$0xff] }
 0x2e7   :  { %v1815_v39 = vunpack.c.l.b16 %v1655_v41  ;;  %v1583_v52 = vadd.f32 %v4496_v29, %v1430_v60  ;;  %v1176_v32 = vadd.f32 %v4783_v38, %v6029_v33  ;;  %v1838_v60 = vunpack.c.h.b16 %v4921_v55 }
 0x2e8   :  { %v5005_v6 = vpop.permute.xlu0 %2083  ;;  %v5012_v10 = vpop.permute.xlu1 %2080  ;;  %v1431_v57 = vadd.f32 %v4478_v53, %v1234_v51 }
 0x2e9   :  { %1963 = vperm.xlu0 %3335, %v1784_v2   ;;  %1960 = vperm.xlu1 %3336, %v1783_v36   ;;  %v6025_v36 = vld [vmem:[#allocation93_spill] sm:$0xff]  ;;  %v1816_v2 = vunpack.c.h.b16 %v1655_v41  ;;  %v1841_v41 = vunpack.c.l.b16 %v5030_v31 }
 0x2ea   :  { %v1264_v44 = vadd.f32 %v5977_v61, %v6025_v36  ;;  %v1584_v46 = vadd.f32 %v4512_v8, %v1431_v57  ;;  %v1460_v57 = vadd.f32 %v5935_v25, %v1263_v49 }
 0x2ec   :  { %v5020_v7 = vpop.permute.xlu0 %2095  ;;  %v5024_v4 = vpop.permute.xlu1 %2092  ;;  %v1461_v61 = vadd.f32 %v5932_v11, %v1264_v44  ;;  %v1669_v36 = vpack.c.bf16 %v1584_v46, %v1583_v52  ;;  %v1613_v49 = vadd.f32 %v4562_v43, %v1460_v57  ;;  %v1373_v52 = vadd.f32 %v4474_v24, %v1176_v32 }
 0x2ed   :  { %2050 = vperm.xlu0 %3335, %v1813_v19   ;;  %2041 = vperm.xlu1 %3336, %v1810_v27   ;;  %v6027_v19 = vld [vmem:[#allocation95_spill] sm:$0xff]  ;;  %v1265_v27 = vadd.f32 %v5985_v21, %v6028_v14  ;;  %v6031_v14 = vld [vmem:[#allocation37_spill] sm:$0xff]  ;;  %v1177_v57 = vadd.f32 %v4795_v58, %v6033_v50  ;;  %v1870_v50 = vunpack.c.h.b16 %v4950_v9 }
 0x2ee   :  { %v1266_v22 = vadd.f32 %v5983_v18, %v6027_v19  ;;  %v1614_v18 = vadd.f32 %v4566_v23, %v1461_v61  ;;  %v1178_v46 = vadd.f32 %v4797_v1, %v6031_v14  ;;  %v1844_v61 = vunpack.c.h.b16 %v1669_v36 }
 0x2ef   :  { %v1462_v19 = vadd.f32 %v4472_v35, %v1265_v27 }
 0x2f0   :  { %v5035_v51 = vpop.permute.xlu0 %2179  ;;  %v5039_v56 = vpop.permute.xlu1 %2176  ;;  %v1463_v44 = vadd.f32 %v4478_v53, %v1266_v22  ;;  %v5063_v55 = vpack.c.bf16 %v1614_v18, %v1613_v49  ;;  %v1375_v32 = vadd.f32 %v4454_v54, %v1178_v46  ;;  %v1526_v18 = vadd.f32 %v4566_v23, %v1373_v52  ;;  %v6035_v49 = vld [vmem:[#allocation97_spill] sm:$0xff] }
 0x2f1   :  { %2059 = vperm.xlu0 %3335, %v1816_v2   ;;  %2056 = vperm.xlu1 %3336, %v1815_v39   ;;  %v6030_v2 = vld [vmem:[#allocation36_spill] sm:$0xff] }
 0x2f2   :  { %v1175_v21 = vadd.f32 %v4781_v34, %v6030_v2  ;;  %v1616_v22 = vadd.f32 %v4512_v8, %v1463_v44  ;;  %v1843_v2 = vunpack.c.l.b16 %v1669_v36  ;;  %v1208_v44 = vadd.f32 %v4813_v37, %v6035_v49 }
 0x2f3   :  { %v1873_v36 = vunpack.c.l.b16 %v5063_v55  ;;  %v1528_v52 = vadd.f32 %v4512_v8, %v1375_v32 }
 0x2f4   :  { %v5050_v20 = vpop.permute.xlu0 %2191  ;;  %v5056_v39 = vpop.permute.xlu1 %2188  ;;  %v1405_v49 = vadd.f32 %v4474_v24, %v1208_v44 }
 0x2f5   :  { %2134 = vperm.xlu0 %3335, %v1841_v41   ;;  %2125 = vperm.xlu1 %3336, %v1838_v60   ;;  %v1372_v41 = vadd.f32 %v4468_v3, %v1175_v21  ;;  %v1615_v60 = vadd.f32 %v4496_v29, %v1462_v19  ;;  %v6036_v19 = vld [vmem:[#allocation98_spill] sm:$0xff] }
 0x2f6   :  { %v1207_v46 = vadd.f32 %v4811_v40, %v6036_v19  ;;  %v1558_v44 = vadd.f32 %v4566_v23, %v1405_v49  ;;  %v6044_v49 = vld [vmem:[#allocation102_spill] sm:$0xff] }
 0x2f7   :  { %v1685_v14 = vpack.c.bf16 %v1616_v22, %v1615_v60  ;;  %v6038_v22 = vld [vmem:[#allocation99_spill] sm:$0xff] }
 0x2f8   :  { %v5066_v33 = vpop.permute.xlu0 %1909  ;;  %v5071_v27 = vpop.permute.xlu1 %1897  ;;  %v1210_v60 = vadd.f32 %v4831_v62, %v6038_v22  ;;  %v1404_v19 = vadd.f32 %v4468_v3, %v1207_v46 }
 0x2f9   :  { %6032 = vst [vmem:[#allocation50_spill] sm:$0xff] %v5066_v33  ;;  %6034 = vst [vmem:[#allocation48_spill] sm:$0xff] %v5071_v27  ;;  %2143 = vperm.xlu0 %3335, %v1844_v61   ;;  %2140 = vperm.xlu1 %3336, %v1843_v2   ;;  %v1525_v33 = vadd.f32 %v4562_v43, %v1372_v41  ;;  %v1374_v61 = vadd.f32 %v4448_v63, %v1177_v57  ;;  %v1876_v27 = vunpack.c.h.b16 %v1685_v14 }
 0x2fa   :  { %v1875_v57 = vunpack.c.l.b16 %v1685_v14  ;;  %v1782_v14 = vunpack.c.h.b16 %v4979_v59 }
 0x2fb   :  { %v5092_v9 = vpack.c.bf16 %v1526_v18, %v1525_v33  ;;  %v1527_v26 = vadd.f32 %v4496_v29, %v1374_v61  ;;  %v6042_v61 = vld [vmem:[#allocation101_spill] sm:$0xff] }
 0x2fc   :  { %v5079_v21 = vpop.permute.xlu0 %1924  ;;  %v5086_v2 = vpop.permute.xlu1 %1918  ;;  %v1236_v46 = vadd.f32 %v4525_v45, %v6042_v61  ;;  %v6046_v61 = vld [vmem:[#allocation104_spill] sm:$0xff] }
 0x2fd   :  { %6037 = vst [vmem:[#allocation51_spill] sm:$0xff] %v5086_v2  ;;  %2230 = vperm.xlu0 %3335, %v1873_v36   ;;  %2221 = vperm.xlu1 %3336, %v1870_v50   ;;  %v6040_v2 = vld [vmem:[#allocation100_spill] sm:$0xff]  ;;  %v1407_v50 = vadd.f32 %v4454_v54, %v1210_v60  ;;  %v1785_v33 = vunpack.c.l.b16 %v5092_v9  ;;  %v1641_v18 = vpack.c.bf16 %v1528_v52, %v1527_v26  ;;  %v6045_v60 = vld [vmem:[#allocation103_spill] sm:$0xff] }
 0x2fe   :  { %v1209_v36 = vadd.f32 %v4829_v17, %v6040_v2  ;;  %v1557_v2 = vadd.f32 %v4562_v43, %v1404_v19  ;;  %v1235_v54 = vadd.f32 %v6004_v48, %v6044_v49  ;;  %v1238_v26 = vadd.f32 %v4537_v13, %v6045_v60 }
 0x2ff   :  { %v1560_v52 = vadd.f32 %v4512_v8, %v1407_v50  ;;  %v1788_v59 = vunpack.c.h.b16 %v1641_v18  ;;  %v1787_v19 = vunpack.c.l.b16 %v1641_v18 }
 0x300   :  { %v5094_v41 = vpop.permute.xlu0 %1993  ;;  %v5100_v32 = vpop.permute.xlu1 %1927  ;;  %v1432_v13 = vadd.f32 %v5935_v25, %v1235_v54  ;;  %v1435_v50 = vadd.f32 %v4478_v53, %v1238_v26  ;;  %v6048_v26 = vld [vmem:[#allocation106_spill] sm:$0xff] }
 0x301   :  { %6039 = vst [vmem:[#allocation148_spill] sm:$0xff] %v5094_v41  ;;  %2239 = vperm.xlu0 %3335, %v1876_v27   ;;  %2236 = vperm.xlu1 %3336, %v1875_v57   ;;  %v1406_v41 = vadd.f32 %v4448_v63, %v1209_v36  ;;  %v5119_v57 = vpack.c.bf16 %v1558_v44, %v1557_v2 }
 0x302   :  { %v1237_v63 = vadd.f32 %v6009_v47, %v6046_v61  ;;  %v1433_v36 = vadd.f32 %v5932_v11, %v1236_v46  ;;  %v1814_v47 = vunpack.c.h.b16 %v5003_v28  ;;  %v1585_v54 = vadd.f32 %v4562_v43, %v1432_v13 }
 0x303   :  { %v1817_v44 = vunpack.c.l.b16 %v5119_v57  ;;  %v1588_v61 = vadd.f32 %v4512_v8, %v1435_v50 }
 0x304   :  { %v5105_v22 = vpop.permute.xlu0 %2014  ;;  %v5112_v27 = vpop.permute.xlu1 %2005  ;;  %v1586_v18 = vadd.f32 %v4566_v23, %v1433_v36  ;;  %v1434_v46 = vadd.f32 %v4472_v35, %v1237_v63 }
 0x305   :  { %6041 = vst [vmem:[#allocation49_spill] sm:$0xff] %v5105_v22  ;;  %6043 = vst [vmem:[#allocation52_spill] sm:$0xff] %v5112_v27  ;;  %1966 = vperm.xlu0 %3335, %v1785_v33   ;;  %1957 = vperm.xlu1 %3336, %v1782_v14   ;;  %v1559_v33 = vadd.f32 %v4496_v29, %v1406_v41  ;;  %v6047_v41 = vld [vmem:[#allocation105_spill] sm:$0xff] }
 0x306   :  { %v1268_v49 = vadd.f32 %v4543_v16, %v6047_v41  ;;  %v5147_v36 = vpack.c.bf16 %v1586_v18, %v1585_v54  ;;  %v6053_v18 = vld [vmem:[#allocation39_spill] sm:$0xff] }
 0x307   :  { %v1657_v14 = vpack.c.bf16 %v1560_v52, %v1559_v33  ;;  %v6049_v52 = vld [vmem:[#allocation107_spill] sm:$0xff]  ;;  %v1587_v33 = vadd.f32 %v4496_v29, %v1434_v46 }
 0x308   :  { %v5121_v45 = vpop.permute.xlu0 %2023  ;;  %v5127_v48 = vpop.permute.xlu1 %2020  ;;  %v1465_v41 = vadd.f32 %v5932_v11, %v1268_v49 }
 0x309   :  { %1975 = vperm.xlu0 %3335, %v1788_v59   ;;  %1972 = vperm.xlu1 %3336, %v1787_v19   ;;  %v1267_v59 = vadd.f32 %v6014_v0, %v6048_v26  ;;  %v1270_v19 = vadd.f32 %v4548_v12, %v6049_v52  ;;  %v1820_v28 = vunpack.c.h.b16 %v1657_v14  ;;  %v1819_v16 = vunpack.c.l.b16 %v1657_v14  ;;  %v6054_v52 = vld [vmem:[#allocation40_spill] sm:$0xff] }
 0x30a   :  { %v1845_v14 = vunpack.c.l.b16 %v5147_v36  ;;  %v1671_v54 = vpack.c.bf16 %v1588_v61, %v1587_v33  ;;  %v1618_v46 = vadd.f32 %v4566_v23, %v1465_v41  ;;  %v6056_v33 = vld [vmem:[#allocation109_spill] sm:$0xff]  ;;  %v6057_v41 = vld [vmem:[#allocation43_spill] sm:$0xff] }
 0x30b   :  { %v1464_v12 = vadd.f32 %v5935_v25, %v1267_v59  ;;  %v1467_v50 = vadd.f32 %v4478_v53, %v1270_v19 }
 0x30c   :  { %v5133_v2 = vpop.permute.xlu0 %2098  ;;  %v5139_v60 = vpop.permute.xlu1 %2086  ;;  %v1848_v22 = vunpack.c.h.b16 %v1671_v54  ;;  %v1847_v27 = vunpack.c.l.b16 %v1671_v54 }
 0x30d   :  { %2062 = vperm.xlu0 %3335, %v1817_v44   ;;  %2053 = vperm.xlu1 %3336, %v1814_v47   ;;  %v6051_v44 = vld [vmem:[#allocation108_spill] sm:$0xff]  ;;  %v1180_v47 = vadd.f32 %v4854_v5, %v6053_v18  ;;  %v1617_v19 = vadd.f32 %v4562_v43, %v1464_v12  ;;  %v1212_v18 = vadd.f32 %v6057_v41, %v6056_v33  ;;  %v6059_v12 = vld [vmem:[#allocation42_spill] sm:$0xff] }
 0x30e   :  { %v1269_v13 = vadd.f32 %v4546_v15, %v6051_v44  ;;  %v1842_v15 = vunpack.c.h.b16 %v5030_v31  ;;  %v1211_v30 = vadd.f32 %v6059_v12, %v6058_v42 }
 0x30f   :  { %v1377_v61 = vadd.f32 %v4474_v24, %v1180_v47  ;;  %v5176_v31 = vpack.c.bf16 %v1618_v46, %v1617_v19  ;;  %v6060_v47 = vld [vmem:[#allocation111_spill] sm:$0xff]  ;;  %v1409_v19 = vadd.f32 %v4474_v24, %v1212_v18  ;;  %v6063_v24 = vld [vmem:[#allocation116_spill] sm:$0xff]  ;;  %v6064_v18 = vld [vmem:[#allocation113_spill] sm:$0xff] }
 0x310   :  { %v5149_v63 = vpop.permute.xlu0 %2107  ;;  %v5155_v0 = vpop.permute.xlu1 %2104  ;;  %v1466_v49 = vadd.f32 %v4472_v35, %v1269_v13 }
 0x311   :  { %6050 = vst [vmem:[#allocation146_spill] sm:$0xff] %v5149_v63  ;;  %6052 = vst [vmem:[#allocation53_spill] sm:$0xff] %v5155_v0  ;;  %2071 = vperm.xlu0 %3335, %v1820_v28   ;;  %2068 = vperm.xlu1 %3336, %v1819_v16   ;;  %v6055_v28 = vld [vmem:[#allocation41_spill] sm:$0xff]  ;;  %v1620_v16 = vadd.f32 %v4512_v8, %v1467_v50  ;;  %v1530_v46 = vadd.f32 %v4566_v23, %v1377_v61  ;;  %v1877_v54 = vunpack.c.l.b16 %v5176_v31  ;;  %v6061_v63 = vld [vmem:[#allocation112_spill] sm:$0xff] }
 0x312   :  { %v1179_v59 = vadd.f32 %v6055_v28, %v6054_v52  ;;  %v1619_v52 = vadd.f32 %v4496_v29, %v1466_v49  ;;  %v1239_v42 = vadd.f32 %v4781_v34, %v6061_v63  ;;  %v6062_v0 = vld [vmem:[#allocation114_spill] sm:$0xff] }
 0x314   :  { %v5163_v26 = vpop.permute.xlu0 %2194  ;;  %v5169_v44 = vpop.permute.xlu1 %2182  ;;  %v1687_v33 = vpack.c.bf16 %v1620_v16, %v1619_v52  ;;  %v1271_v16 = vadd.f32 %v4811_v40, %v6063_v24  ;;  %v1242_v52 = vadd.f32 %v4797_v1, %v6064_v18  ;;  %v1436_v40 = vadd.f32 %v5935_v25, %v1239_v42 }
 0x315   :  { %2146 = vperm.xlu0 %3335, %v1845_v14   ;;  %2137 = vperm.xlu1 %3336, %v1842_v15   ;;  %v1376_v14 = vadd.f32 %v4468_v3, %v1179_v59  ;;  %v1240_v15 = vadd.f32 %v4783_v38, %v6060_v47  ;;  %v1874_v59 = vunpack.c.h.b16 %v5063_v55  ;;  %v6065_v55 = vlaneseq }
 0x316   :  { %v1880_v63 = vunpack.c.h.b16 %v1687_v33 }
 0x317   :  { %v1529_v38 = vadd.f32 %v4562_v43, %v1376_v14  ;;  %v2272_v47 = vand.u32 127, %v6065_v55  ;;  %v1437_v34 = vadd.f32 %v5932_v11, %v1240_v15  ;;  %v1468_v15 = vadd.f32 %v5935_v25, %v1271_v16 }
 0x318   :  { %v5178_v13 = vpop.permute.xlu0 %2203  ;;  %v5184_v50 = vpop.permute.xlu1 %2200 }
 0x319   :  { %2155 = vperm.xlu0 %3335, %v1848_v22   ;;  %2152 = vperm.xlu1 %3336, %v1847_v27   ;;  %v1241_v22 = vadd.f32 %v4795_v58, %v6062_v0  ;;  %v1408_v27 = vadd.f32 %v4468_v3, %v1211_v30  ;;  %v1562_v58 = vadd.f32 %v4566_v23, %v1409_v19  ;;  %v6066_v3 = vld [vmem:[#allocation115_spill] sm:$0xff]  ;;  %v6067_v19 = vld [vmem:[#allocation118_spill] sm:$0xff] }
 0x31a   :  { %v5209_v0 = vpack.c.bf16 %v1530_v46, %v1529_v38  ;;  %v1272_v30 = vadd.f32 %v4813_v37, %v6066_v3  ;;  %v1439_v46 = vadd.f32 %v4478_v53, %v1242_v52  ;;  %v1273_v38 = vadd.f32 %v4829_v17, %v6067_v19 }
 0x31b   :  { %v1438_v1 = vadd.f32 %v4472_v35, %v1241_v22  ;;  %v1561_v24 = vadd.f32 %v4562_v43, %v1408_v27  ;;  %v2277_v37 = vadd.s32 4294967288, %v2272_v47  ;;  %v6068_v27 = vld [vmem:[#allocation117_spill] sm:$0xff]  ;;  %v1786_v52 = vunpack.c.h.b16 %v5092_v9 }
 0x31c   :  { %v5191_v49 = vpop.permute.xlu0 %1930  ;;  %v5200_v61 = vpop.permute.xlu1 %1921  ;;  %v1789_v42 = vunpack.c.l.b16 %v5209_v0  ;;  %v1469_v22 = vadd.f32 %v5932_v11, %v1272_v30  ;;  %v1274_v55 = vadd.f32 %v4831_v62, %v6068_v27  ;;  %v1589_v17 = vadd.f32 %v4562_v43, %v1436_v40 }
 0x31d   :  { %2242 = vperm.xlu0 %3335, %v1877_v54   ;;  %2233 = vperm.xlu1 %3336, %v1874_v59   ;;  %v1879_v54 = vunpack.c.l.b16 %v1687_v33  ;;  %v1590_v33 = vadd.f32 %v4566_v23, %v1437_v34  ;;  %v5226_v18 = vpack.c.bf16 %v1562_v58, %v1561_v24  ;;  %v1591_v3 = vadd.f32 %v4496_v29, %v1438_v1  ;;  %v6069_v24 = vld [vmem:[#allocation17_spill] sm:$0xff] }
 0x31e   :  { %v1621_v34 = vadd.f32 %v4562_v43, %v1468_v15  ;;  %v1592_v58 = vadd.f32 %v4512_v8, %v1439_v46  ;;  %v1470_v30 = vadd.f32 %v4472_v35, %v1273_v38  ;;  %v5242_v62 = vsub.s32 %v2277_v37, %v6069_v24 }
 0x31f   :  { %v5245_v19 = vsub.s32 %v2272_v47, %v6069_v24  ;;  %v2291_v9 = vadd.s32 4294967272, %v2272_v47  ;;  %v1821_v40 = vunpack.c.l.b16 %v5226_v18  ;;  %v5248_v1 = vpack.c.bf16 %v1590_v33, %v1589_v17  ;;  %v6070_v17 = vld [vmem:[#allocation120_spill] sm:$0xff] }
 0x320   :  { %v5213_v14 = vpop.permute.xlu0 %1939  ;;  %v5218_v59 = vpop.permute.xlu1 %1936  ;;  %v1471_v15 = vadd.f32 %v4478_v53, %v1274_v55  ;;  %v1818_v38 = vunpack.c.h.b16 %v5119_v57 }
 0x321   :  { %2251 = vperm.xlu0 %3335, %v1880_v63   ;;  %2248 = vperm.xlu1 %3336, %v1879_v54   ;;  %v2284_v63 = vadd.s32 4294967280, %v2272_v47  ;;  %v2605_v37 = vrot.slane %v5024_v4, %v5245_v19  ;;  %v2609_v47 = vrot.slane %v5020_v7, %v5242_v62  ;;  %v2586_v53 = vrot.slane %v5012_v10, %v5245_v19 }
 0x322   :  { %v5269_v4 = vsub.s32 %v2291_v9, %v6069_v24  ;;  %v1243_v10 = vadd.f32 %v6055_v28, %v6070_v17  ;;  %v6073_v17 = vld [vmem:[#allocation122_spill] sm:$0xff] }
 0x323   :  { %v5253_v46 = vsub.s32 %v2284_v63, %v6069_v24  ;;  %v1849_v63 = vunpack.c.l.b16 %v5248_v1  ;;  %v1624_v24 = vadd.f32 %v4512_v8, %v1471_v15 }
 0x324   :  { %v5231_v16 = vpop.permute.xlu0 %2026  ;;  %v5236_v54 = vpop.permute.xlu1 %2017 }
 0x325   :  { %1978 = vperm.xlu0 %3335, %v1789_v42   ;;  %1969 = vperm.xlu1 %3336, %v1786_v52   ;;  %v1622_v42 = vadd.f32 %v4566_v23, %v1469_v22  ;;  %v2590_v22 = vrot.slane %v5005_v6, %v5242_v62  ;;  %v2614_v57 = vrot.slane %v5133_v2, %v5253_v46 }
 0x326   :  { %v2595_v7 = vrot.slane %v5139_v60, %v5253_v46  ;;  %v1673_v52 = vpack.c.bf16 %v1592_v58, %v1591_v3  ;;  %v2610_v60 = vsel %vm2282_vm2, %v2609_v47, %v2605_v37  ;;  %v6072_v37 = vld [vmem:[#allocation121_spill] sm:$0xff] }
 0x327   :  { %v2591_v28 = vsel %vm2282_vm2, %v2590_v22, %v2586_v53  ;;  %v5290_v15 = vpack.c.bf16 %v1622_v42, %v1621_v34  ;;  %v1276_v47 = vadd.f32 %v6057_v41, %v6072_v37  ;;  %v1440_v41 = vadd.f32 %v5935_v25, %v1243_v10 }
 0x328   :  { %v2036_v35 = vpop.permute.xlu0 %2035  ;;  %v2033_v27 = vpop.permute.xlu1 %2032  ;;  %v1852_v8 = vunpack.c.h.b16 %v1673_v52  ;;  %v1851_v22 = vunpack.c.l.b16 %v1673_v52  ;;  %v2761_v10 = vrot.slane %v5050_v20, %v5242_v62  ;;  %v2766_v20 = vrot.slane %v5163_v26, %v5253_v46 }
 0x329   :  { %v2514_v33 = vrot.slane %v2036_v35, %v5242_v62  ;;  %2074 = vperm.xlu0 %3335, %v1821_v40   ;;  %v2510_v55 = vrot.slane %v2033_v27, %v5245_v19  ;;  %2065 = vperm.xlu1 %3336, %v1818_v38   ;;  %v6071_v40 = vld [vmem:[#allocation119_spill] sm:$0xff]  ;;  %v1846_v38 = vunpack.c.h.b16 %v5147_v36  ;;  %v2596_v27 = vsel %vm2289_vm3, %v2595_v7, %v2591_v28 }
 0x32a   :  { %v1244_v6 = vadd.f32 %v4854_v5, %v6071_v40  ;;  %v2615_v5 = vsel %vm2289_vm3, %v2614_v57, %v2610_v60  ;;  %v1623_v57 = vadd.f32 %v4496_v29, %v1470_v30  ;;  %v1881_v42 = vunpack.c.l.b16 %v5290_v15 }
 0x32b   :  { %v5279_v2 = vsel %vm2282_vm2, %v2514_v33, %v2510_v55  ;;  %v1275_v40 = vadd.f32 %v6059_v12, %v6073_v17  ;;  %v1473_v52 = vadd.f32 %v5932_v11, %v1276_v47  ;;  %v1878_v30 = vunpack.c.h.b16 %v5176_v31 }
 0x32c   :  { %v2102_v35 = vpop.permute.xlu0 %2101  ;;  %v2090_v9 = vpop.permute.xlu1 %2089  ;;  %v1441_v34 = vadd.f32 %v5932_v11, %v1244_v6  ;;  %v1689_v7 = vpack.c.bf16 %v1624_v24, %v1623_v57  ;;  %v2757_v6 = vrot.slane %v5056_v39, %v5245_v19  ;;  %v2776_v11 = vrot.slane %v5184_v50, %v5245_v19 }
 0x32d   :  { %v2619_v3 = vrot.slane %v2102_v35, %v5269_v4  ;;  %2158 = vperm.xlu0 %3335, %v1849_v63   ;;  %v2600_v58 = vrot.slane %v2090_v9, %v5269_v4  ;;  %2149 = vperm.xlu1 %3336, %v1846_v38   ;;  %v2738_v35 = vrot.slane %v5039_v56, %v5245_v19  ;;  %v1822_v26 = vunpack.c.h.b16 %v5226_v18 }
 0x32e   :  { %v2742_v38 = vrot.slane %v5035_v51, %v5242_v62  ;;  %v2780_v31 = vrot.slane %v5178_v13, %v5242_v62  ;;  %v1594_v51 = vadd.f32 %v4566_v23, %v1441_v34  ;;  %v2747_v39 = vrot.slane %v5169_v44, %v5253_v46 }
 0x32f   :  { %v2620_v36 = vsel %vm2296_vm4, %v2619_v3, %v2615_v5  ;;  %v2601_v33 = vsel %vm2296_vm4, %v2600_v58, %v2596_v27  ;;  %v1884_v60 = vunpack.c.h.b16 %v1689_v7  ;;  %v1593_v9 = vadd.f32 %v4562_v43, %v1440_v41 }
 0x330   :  { %v2117_v53 = vpop.permute.xlu0 %2116  ;;  %v5297_v55 = vsel %vm2887_vm5, %v2620_v36, %v2601_v33  ;;  %v5299_v63 = vpop.permute.xlu1 %2110  ;;  %v1883_v28 = vunpack.c.l.b16 %v1689_v7  ;;  %v1472_v5 = vadd.f32 %v5935_v25, %v1275_v40  ;;  %v1626_v58 = vadd.f32 %v4566_v23, %v1473_v52 }
 0x331   :  { %2167 = vperm.xlu0 %3335, %v1852_v8   ;;  %2164 = vperm.xlu1 %3336, %v1851_v22   ;;  %v2643_v12 = vrot.slane %v2117_v53, %v5245_v19  ;;  %v2743_v36 = vsel %vm2282_vm2, %v2742_v38, %v2738_v35  ;;  %v2762_v8 = vsel %vm2282_vm2, %v2761_v10, %v2757_v6  ;;  %v1790_v34 = vunpack.c.h.b16 %v5209_v0 }
 0x332   :  { %v2781_v37 = vsel %vm2282_vm2, %v2780_v31, %v2776_v11  ;;  %v2748_v33 = vsel %vm2289_vm3, %v2747_v39, %v2743_v36  ;;  %v2767_v25 = vsel %vm2289_vm3, %v2766_v20, %v2762_v8  ;;  %v1674_v53 = vpack.c.bf16 %v1594_v51, %v1593_v9 }
 0x333   :  { %v2343_v40 = vrot.slane %v5100_v32, %v5242_v62  ;;  %v2358_v52 = vrot.slane %v5218_v59, %v5245_v19  ;;  %v2339_v38 = vrot.slane %v5079_v21, %v5245_v19  ;;  %v1850_v59 = vunpack.c.h.b16 %v5248_v1 }
 0x334   :  { %v2186_v29 = vpop.permute.xlu0 %2185  ;;  %v2120_v24 = vpop.permute.xlu1 %2119  ;;  %v1882_v51 = vunpack.c.h.b16 %v5290_v15  ;;  %v2491_v9 = vrot.slane %v5127_v48, %v5245_v19 }
 0x335   :  { %2254 = vperm.xlu0 %3335, %v1881_v42   ;;  %v2647_v56 = vrot.slane %v2120_v24, %v5242_v62  ;;  %2245 = vperm.xlu1 %3336, %v1878_v30   ;;  %v2752_v13 = vrot.slane %v2186_v29, %v5269_v4  ;;  %v1625_v42 = vadd.f32 %v4562_v43, %v1472_v5  ;;  %v1853_v30 = vunpack.c.l.b16 %v1674_v53 }
 0x336   :  { %v2362_v29 = vrot.slane %v5213_v14, %v5242_v62  ;;  %v2348_v43 = vrot.slane %v5191_v49, %v5253_v46  ;;  %v2344_v24 = vsel %vm2282_vm2, %v2343_v40, %v2339_v38 }
 0x337   :  { %v5329_v50 = vsel %vm2282_vm2, %v2647_v56, %v2643_v12  ;;  %v2753_v22 = vsel %vm2296_vm4, %v2752_v13, %v2748_v33  ;;  %v1690_v35 = vpack.c.bf16 %v1626_v58, %v1625_v42  ;;  %v2495_v13 = vrot.slane %v5121_v45, %v5242_v62 }
 0x338   :  { %v2207_v3 = vpop.permute.xlu0 %2206  ;;  %v2198_v27 = vpop.permute.xlu1 %2197  ;;  %v2363_v11 = vsel %vm2282_vm2, %v2362_v29, %v2358_v52  ;;  %v2349_v31 = vsel %vm2289_vm3, %v2348_v43, %v2344_v24  ;;  %v6077_v24 = vld [vmem:[#allocation127_spill] sm:$0xff] }
 0x339   :  { %v2785_v44 = vrot.slane %v2207_v3, %v5253_v46  ;;  %2263 = vperm.xlu0 %3335, %v1884_v60   ;;  %v2771_v47 = vrot.slane %v2198_v27, %v5269_v4  ;;  %2260 = vperm.xlu1 %3336, %v1883_v28   ;;  %v1885_v12 = vunpack.c.l.b16 %v1690_v35  ;;  %v3339_v60 = vld [vmem:[#allocation9 + $0x8] sm:$0xff]   ;;  %v2500_v28 = vrot.slane %v5231_v16, %v5253_v46 }
 0x33a   :  { %v1886_v5 = vunpack.c.h.b16 %v1690_v35  ;;  %3305 = vmatprep.subr.bf16.mxu1 %v3339_v60  ;;  %v1854_v27 = vunpack.c.h.b16 %v1674_v53  ;;  %v2496_v45 = vsel %vm2282_vm2, %v2495_v13, %v2491_v9  ;;  %v6074_v53 = vld [vmem:[#allocation53_spill] sm:$0xff] }
 0x33b   :  { %v5343_v23 = vsel %vm2289_vm3, %v2785_v44, %v2781_v37  ;;  %v2772_v18 = vsel %vm2296_vm4, %v2771_v47, %v2767_v25  ;;  %3306 = vmatpush3.bf16.msra.mxu1 %v3339_v60  ;;  %v2501_v16 = vsel %vm2289_vm3, %v2500_v28, %v2496_v45  ;;  %v6081_v9 = vld [vmem:[#allocation129_spill] sm:$0xff] }
 0x33c   :  { %v2216_v57 = vpop.permute.xlu0 %2215  ;;  %v5350_v7 = vsel %vm2887_vm5, %v2772_v18, %v2753_v22  ;;  %v2213_v41 = vpop.permute.xlu1 %2212  ;;  %v2624_v22 = vrot.slane %v6074_v53, %v5245_v19  ;;  %v6075_v18 = vld [vmem:[#allocation146_spill] sm:$0xff]  ;;  %v2310_v13 = vrot.slane %v6081_v9, %v5253_v46  ;;  %v6094_v9 = vld [vmem:[#allocation52_spill] sm:$0xff] }
 0x33d   :  { %v2799_v17 = vrot.slane %v2216_v57, %v5242_v62  ;;  %2077 = vperm.xlu0 %3335, %v1822_v26   ;;  %v2795_v0 = vrot.slane %v2213_v41, %v5245_v19  ;;  %1981 = vperm.xlu1 %3336, %v1790_v34   ;;  %v3340_v26 = vld [vmem:[#allocation9] sm:$0xff]   ;;  %v2628_v57 = vrot.slane %v6075_v18, %v5242_v62 }
 0x33e   :  { %3307 = vmatprep.subr.bf16.mxu1 %v3340_v26 }
 0x33f   :  { %v5365_v6 = vsel %vm2282_vm2, %v2799_v17, %v2795_v0  ;;  %3308 = vmatpush3.bf16.msra.mxu1 %v3340_v26  ;;  %v2629_v52 = vsel %vm2282_vm2, %v2628_v57, %v2624_v22  ;;  %v6085_v26 = vld [vmem:[#allocation50_spill] sm:$0xff] }
 0x340   :  { %v1943_v32 = vpop.permute.xlu0 %1942  ;;  %v1934_v10 = vpop.permute.xlu1 %1933  ;;  %v2315_v45 = vrot.slane %v6085_v26, %v5269_v4 }
 0x341   :  { %v2367_v14 = vrot.slane %v1943_v32, %v5253_v46  ;;  %2170 = vperm.xlu0 %3335, %v1853_v30   ;;  %v2353_v49 = vrot.slane %v1934_v10, %v5269_v4  ;;  %2161 = vperm.xlu1 %3336, %v1850_v59   ;;  %v6076_v10 = vld [vmem:[#allocation21_spill] sm:$0xff] }
 0x343   :  { %v5374_v21 = vsel %vm2289_vm3, %v2367_v14, %v2363_v11  ;;  %v5377_v56 = vsel %vm2296_vm4, %v2353_v49, %v2349_v31  ;;  %v2281_v14 = vrot.slane %v6076_v10, %v5242_v62  ;;  %v6078_v31 = vld [vmem:[#allocation19_spill] sm:$0xff] }
 0x344   :  { %v1952_v1 = vpop.permute.xlu0 %1951  ;;  %v1949_v39 = vpop.permute.xlu1 %1948 }
 0x345   :  { %v2381_v20 = vrot.slane %v1952_v1, %v5242_v62  ;;  %2266 = vperm.xlu0 %3335, %v1885_v12   ;;  %v2377_v3 = vrot.slane %v1949_v39, %v5245_v19  ;;  %2257 = vperm.xlu1 %3336, %v1882_v51   ;;  %v2301_v12 = vrot.slane %v6078_v31, %v5245_v19  ;;  %v6080_v51 = vld [vmem:[#allocation44_spill] sm:$0xff] }
 0x346   :  { %v2288_v39 = vrot.slane %v6080_v51, %v5253_v46  ;;  %v6093_v51 = vld [vmem:[#allocation47_spill] sm:$0xff] }
 0x347   :  { %v5389_v15 = vsel %vm2282_vm2, %v2381_v20, %v2377_v3  ;;  %v6082_v3 = vld [vmem:[#allocation126_spill] sm:$0xff] }
 0x348   :  { %v2039_v58 = vpop.permute.xlu0 %2038  ;;  %v2030_v44 = vpop.permute.xlu1 %2029  ;;  %v2320_v28 = vrot.slane %v6082_v3, %v5245_v19  ;;  %v6095_v3 = vld [vmem:[#allocation49_spill] sm:$0xff] }
 0x349   :  { %v2519_v48 = vrot.slane %v2039_v58, %v5253_v46  ;;  %2269 = vperm.xlu0 %3335, %v1886_v5   ;;  %v2505_v36 = vrot.slane %v2030_v44, %v5269_v4  ;;  %2173 = vperm.xlu1 %3336, %v1854_v27   ;;  %v6083_v5 = vld [vmem:[#allocation45_spill] sm:$0xff]  ;;  %v6084_v44 = vld [vmem:[#allocation48_spill] sm:$0xff] }
 0x34a   :  { %v2324_v58 = vrot.slane %v6083_v5, %v5242_v62 }
 0x34b   :  { %v5397_v8 = vsel %vm2289_vm3, %v2519_v48, %v5279_v2  ;;  %v5400_v37 = vsel %vm2296_vm4, %v2505_v36, %v2501_v16  ;;  %v2633_v2 = vrot.slane %v5299_v63, %v5253_v46  ;;  %v2295_v48 = vrot.slane %v6084_v44, %v5269_v4  ;;  %v6086_v36 = vld [vmem:[#allocation51_spill] sm:$0xff] }
 0x34c   :  { %v2048_v47 = vpop.permute.xlu0 %2047  ;;  %v2045_v33 = vpop.permute.xlu1 %2044  ;;  %v2329_v16 = vrot.slane %v6086_v36, %v5253_v46 }
 0x34d   :  { %v2533_v25 = vrot.slane %v2048_v47, %v5242_v62  ;;  %v2529_v34 = vrot.slane %v2045_v33, %v5245_v19  ;;  %v2634_v0 = vsel %vm2289_vm3, %v2633_v2, %v2629_v52  ;;  %v2334_v33 = vrot.slane %v5200_v61, %v5269_v4 }
 0x34f   :  { %v5411_v42 = vsel %vm2282_vm2, %v2533_v25, %v2529_v34 }
 0x350   :  { %v2123_v41 = vpop.permute.xlu0 %2122  ;;  %v2114_v17 = vpop.permute.xlu1 %2113 }
 0x351   :  { %v2652_v40 = vrot.slane %v2123_v41, %v5253_v46  ;;  %v2638_v29 = vrot.slane %v2114_v17, %v5269_v4  ;;  %v2325_v41 = vsel %vm2282_vm2, %v2324_v58, %v2320_v28  ;;  %v6087_v17 = vld [vmem:[#allocation22_spill] sm:$0xff]  ;;  %v2481_v28 = vrot.slane %v6095_v3, %v5253_v46 }
 0x353   :  { %v5419_v43 = vsel %vm2289_vm3, %v2652_v40, %v5329_v50  ;;  %v2639_v63 = vsel %vm2296_vm4, %v2638_v29, %v2634_v0  ;;  %v2276_v50 = vrot.slane %v6077_v24, %v5245_v19  ;;  %v2434_v40 = vrot.slane %v6087_v17, %v5245_v19  ;;  %v6088_v0 = vld [vmem:[#allocation124_spill] sm:$0xff] }
 0x354   :  { %v2132_v30 = vpop.permute.xlu0 %2131  ;;  %v5424_v35 = vsel %vm2889_vm6, %v2639_v63, %v5297_v55  ;;  %v2129_v38 = vpop.permute.xlu1 %2128  ;;  %v6079_v55 = vld [vmem:[#allocation125_spill] sm:$0xff]  ;;  %v2438_v63 = vrot.slane %v6088_v0, %v5242_v62 }
 0x355   :  { %v2666_v32 = vrot.slane %v2132_v30, %v5242_v62  ;;  %v2662_v59 = vrot.slane %v2129_v38, %v5245_v19  ;;  %v2305_v1 = vrot.slane %v6079_v55, %v5242_v62  ;;  %v2283_v22 = vsel %vm2282_vm2, %v2281_v14, %v2276_v50  ;;  %v6089_v30 = vld [vmem:[#allocation20_spill] sm:$0xff]  ;;  %v6090_v14 = vld [vmem:[#allocation123_spill] sm:$0xff]  ;;  %v6091_v50 = vld [vmem:[#allocation46_spill] sm:$0xff] }
 0x356   :  { %v2290_v2 = vsel %vm2289_vm3, %v2288_v39, %v2283_v22  ;;  %v2453_v38 = vrot.slane %v6089_v30, %v5245_v19  ;;  %v2457_v24 = vrot.slane %v6090_v14, %v5242_v62  ;;  %v6092_v55 = vld [vmem:[#allocation128_spill] sm:$0xff]  ;;  %v2476_v39 = vrot.slane %v6093_v51, %v5242_v62 }
 0x357   :  { %v5433_v11 = vsel %vm2282_vm2, %v2666_v32, %v2662_v59  ;;  %v2306_v18 = vsel %vm2282_vm2, %v2305_v1, %v2301_v12  ;;  %v2297_v52 = vsel %vm2296_vm4, %v2295_v48, %v2290_v2  ;;  %v2472_v1 = vrot.slane %v6092_v55, %v5245_v19 }
 0x358   :  { %v2219_v49 = vpop.permute.xlu0 %2218  ;;  %v2210_v20 = vpop.permute.xlu1 %2209  ;;  %v2311_v61 = vsel %vm2289_vm3, %v2310_v13, %v2306_v18  ;;  %v2467_v13 = vrot.slane %v6094_v9, %v5269_v4  ;;  %v2486_v48 = vrot.slane %v5236_v54, %v5269_v4 }
 0x359   :  { %v2804_v60 = vrot.slane %v2219_v49, %v5253_v46  ;;  %v2790_v27 = vrot.slane %v2210_v20, %v5269_v4  ;;  %v2316_v29 = vsel %vm2296_vm4, %v2315_v45, %v2311_v61  ;;  %v2462_v49 = vrot.slane %v6091_v50, %v5253_v46 }
 0x35a   :  { %v2888_v20 = vsel %vm2887_vm5, %v2316_v29, %v2297_v52  ;;  %v2477_v54 = vsel %vm2282_vm2, %v2476_v39, %v2472_v1 }
 0x35b   :  { %v5457_v47 = vsel %vm2289_vm3, %v2804_v60, %v5365_v6  ;;  %v2791_v25 = vsel %vm2296_vm4, %v2790_v27, %v5343_v23  ;;  %v6096_v27 = vld [vmem:[#allocation130_spill] sm:$0xff] }
 0x35c   :  { %v2228_v53 = vpop.permute.xlu0 %2227  ;;  %v5467_v57 = vsel %vm2889_vm6, %v2791_v25, %v5350_v7  ;;  %v2225_v34 = vpop.permute.xlu1 %2224  ;;  %v2330_v7 = vsel %vm2289_vm3, %v2329_v16, %v2325_v41  ;;  %v2443_v44 = vrot.slane %v6096_v27, %v5253_v46  ;;  %v2458_v16 = vsel %vm2282_vm2, %v2457_v24, %v2453_v38 }
 0x35d   :  { %v2818_v6 = vrot.slane %v2228_v53, %v5242_v62  ;;  %v2814_v23 = vrot.slane %v2225_v34, %v5245_v19  ;;  %v2335_v32 = vsel %vm2296_vm4, %v2334_v33, %v2330_v7  ;;  %v6097_v33 = vld [vmem:[#allocation148_spill] sm:$0xff]  ;;  %v2463_v18 = vsel %vm2289_vm3, %v2462_v49, %v2458_v16 }
 0x35e   :  { %v2890_v5 = vsel %vm2889_vm6, %v2335_v32, %v2888_v20  ;;  %v2448_v25 = vrot.slane %v6097_v33, %v5269_v4  ;;  %v2439_v34 = vsel %vm2282_vm2, %v2438_v63, %v2434_v40 }
 0x35f   :  { %v5485_v59 = vsel %vm2282_vm2, %v2818_v6, %v2814_v23  ;;  %v2892_v26 = vsel %vm2891_vm7, %v5377_v56, %v2890_v5  ;;  %v2482_v6 = vsel %vm2289_vm3, %v2481_v28, %v2477_v54  ;;  %v2444_v2 = vsel %vm2289_vm3, %v2443_v44, %v2439_v34 }
 0x360   :  { %v1955_v10 = vpop.permute.xlu0 %1954  ;;  %v1946_v31 = vpop.permute.xlu1 %1945  ;;  %v2487_v61 = vsel %vm2296_vm4, %v2486_v48, %v2482_v6  ;;  %v2449_v17 = vsel %vm2296_vm4, %v2448_v25, %v2444_v2 }
 0x361   :  { %v2386_v12 = vrot.slane %v1955_v10, %v5253_v46  ;;  %v2372_v60 = vrot.slane %v1946_v31, %v5269_v4 }
 0x363   :  { %v5505_v58 = vsel %vm2289_vm3, %v2386_v12, %v5389_v15  ;;  %v2373_v45 = vsel %vm2296_vm4, %v2372_v60, %v5374_v21  ;;  %v2468_v21 = vsel %vm2296_vm4, %v2467_v13, %v2463_v18 }
 0x364   :  { %v1964_v36 = vpop.permute.xlu0 %1963  ;;  %v2894_v15 = vsel %vm2893_vm8, %v2373_v45, %v2892_v26  ;;  %v1961_v53 = vpop.permute.xlu1 %1960  ;;  %v2901_v7 = vsel %vm2887_vm5, %v2468_v21, %v2449_v17 }
 0x365   :  { %v2400_v22 = vrot.slane %v1964_v36, %v5242_v62  ;;  %v2396_v56 = vrot.slane %v1961_v53, %v5245_v19  ;;  %v2902_v0 = vsel %vm2889_vm6, %v2487_v61, %v2901_v7 }
 0x366   :  { %v2903_v30 = vsel %vm2891_vm7, %v5400_v37, %v2902_v0 }
 0x367   :  { %v5529_v41 = vsel %vm2282_vm2, %v2400_v22, %v2396_v56 }
 0x368   :  { %v2051_v23 = vpop.permute.xlu0 %2050  ;;  %v2042_v52 = vpop.permute.xlu1 %2041 }
 0x369   :  { %v2538_v29 = vrot.slane %v2051_v23, %v5253_v46  ;;  %v2524_v40 = vrot.slane %v2042_v52, %v5269_v4 }
 0x36b   :  { %v2539_v63 = vsel %vm2289_vm3, %v2538_v29, %v5411_v42  ;;  %v2525_v38 = vsel %vm2296_vm4, %v2524_v40, %v5397_v8 }
 0x36c   :  { %v2060_v32 = vpop.permute.xlu0 %2059  ;;  %v2904_v10 = vsel %vm2893_vm8, %v2525_v38, %v2903_v30  ;;  %v2057_v14 = vpop.permute.xlu1 %2056 }
 0x36d   :  { %v2552_v24 = vrot.slane %v2060_v32, %v5242_v62  ;;  %v2548_v50 = vrot.slane %v2057_v14, %v5245_v19 }
 0x36f   :  { %v5546_v49 = vsel %vm2282_vm2, %v2552_v24, %v2548_v50 }
 0x370   :  { %v2135_v31 = vpop.permute.xlu0 %2134  ;;  %v2126_v12 = vpop.permute.xlu1 %2125 }
 0x371   :  { %v2671_v42 = vrot.slane %v2135_v31, %v5253_v46  ;;  %v2657_v37 = vrot.slane %v2126_v12, %v5269_v4 }
 0x373   :  { %v2672_v8 = vsel %vm2289_vm3, %v2671_v42, %v5433_v11  ;;  %v2658_v55 = vsel %vm2296_vm4, %v2657_v37, %v5419_v43 }
 0x374   :  { %v2144_v1 = vpop.permute.xlu0 %2143  ;;  %v2910_v51 = vsel %vm2891_vm7, %v2658_v55, %v5424_v35  ;;  %v2141_v39 = vpop.permute.xlu1 %2140 }
 0x375   :  { %v2685_v20 = vrot.slane %v2144_v1, %v5242_v62  ;;  %v2681_v60 = vrot.slane %v2141_v39, %v5245_v19 }
 0x377   :  { %v2686_v9 = vsel %vm2282_vm2, %v2685_v20, %v2681_v60 }
 0x378   :  { %v2231_v13 = vpop.permute.xlu0 %2230  ;;  %v2222_v3 = vpop.permute.xlu1 %2221 }
 0x379   :  { %v2823_v28 = vrot.slane %v2231_v13, %v5253_v46  ;;  %v2809_v11 = vrot.slane %v2222_v3, %v5269_v4 }
 0x37b   :  { %v2824_v43 = vsel %vm2289_vm3, %v2823_v28, %v5485_v59  ;;  %v2810_v5 = vsel %vm2296_vm4, %v2809_v11, %v5457_v47 }
 0x37c   :  { %v2240_v35 = vpop.permute.xlu0 %2239  ;;  %v2917_v27 = vsel %vm2891_vm7, %v2810_v5, %v5467_v57  ;;  %v2237_v44 = vpop.permute.xlu1 %2236 }
 0x37d   :  { %v2837_v48 = vrot.slane %v2240_v35, %v5242_v62  ;;  %v2833_v26 = vrot.slane %v2237_v44, %v5245_v19 }
 0x37f   :  { %v2838_v45 = vsel %vm2282_vm2, %v2837_v48, %v2833_v26 }
 0x380   :  { %v1967_v36 = vpop.permute.xlu0 %1966  ;;  %v1958_v16 = vpop.permute.xlu1 %1957 }
 0x381   :  { %v2391_v33 = vrot.slane %v1958_v16, %v5269_v4  ;;  %v2405_v38 = vrot.slane %v1967_v36, %v5253_v46 }
 0x383   :  { %v2392_v59 = vsel %vm2296_vm4, %v2391_v33, %v5505_v58  ;;  %v2406_v24 = vsel %vm2289_vm3, %v2405_v38, %v5529_v41 }
 0x384   :  { %v5573_v47 = vpop.permute.xlu0 %1975  ;;  %v5575_v25 = vpop.permute.xlu1 %1972  ;;  %v2896_v57 = vsel %vm2895_vm9, %v2392_v59, %v2894_v15 }
 0x385   :  { %v2415_v59 = vrot.slane %v5575_v25, %v5245_v19 }
 0x388   :  { %v2063_v53 = vpop.permute.xlu0 %2062  ;;  %v2054_v22 = vpop.permute.xlu1 %2053 }
 0x389   :  { %v2543_v18 = vrot.slane %v2054_v22, %v5269_v4  ;;  %v2557_v50 = vrot.slane %v2063_v53, %v5253_v46 }
 0x38b   :  { %v2544_v54 = vsel %vm2296_vm4, %v2543_v18, %v2539_v63  ;;  %v2558_v55 = vsel %vm2289_vm3, %v2557_v50, %v5546_v49 }
 0x38c   :  { %v2072_v56 = vpop.permute.xlu0 %2071  ;;  %v2069_v34 = vpop.permute.xlu1 %2068  ;;  %v2905_v21 = vsel %vm2895_vm9, %v2544_v54, %v2904_v10 }
 0x38d   :  { %v2571_v36 = vrot.slane %v2072_v56, %v5242_v62 }
 0x390   :  { %v2147_v6 = vpop.permute.xlu0 %2146  ;;  %v2138_v2 = vpop.permute.xlu1 %2137 }
 0x391   :  { %v2676_v58 = vrot.slane %v2138_v2, %v5269_v4  ;;  %v2690_v1 = vrot.slane %v2147_v6, %v5253_v46 }
 0x393   :  { %v2677_v61 = vsel %vm2296_vm4, %v2676_v58, %v2672_v8  ;;  %v2691_v13 = vsel %vm2289_vm3, %v2690_v1, %v2686_v9  ;;  %v2567_v9 = vrot.slane %v2069_v34, %v5245_v19 }
 0x394   :  { %v5583_v23 = vpop.permute.xlu0 %2155  ;;  %v2911_v15 = vsel %vm2893_vm8, %v2677_v61, %v2910_v51  ;;  %v5586_v17 = vpop.permute.xlu1 %2152 }
 0x395   :  { %v2572_v18 = vsel %vm2282_vm2, %v2571_v36, %v2567_v9  ;;  %v2704_v38 = vrot.slane %v5583_v23, %v5242_v62  ;;  %v3341_v9 = vld [vmem:[#allocation11 + $0x8] sm:$0xff]  }
 0x396   :  { %3313 = vmatprep.subr.bf16.mxu0 %v3341_v9 }
 0x397   :  { %3314 = vmatpush3.bf16.msra.mxu0 %v3341_v9 }
 0x398   :  { %v2243_v52 = vpop.permute.xlu0 %2242  ;;  %v2234_v29 = vpop.permute.xlu1 %2233 }
 0x399   :  { %v2828_v7 = vrot.slane %v2234_v29, %v5269_v4 }
 0x39b   :  { %v2829_v40 = vsel %vm2296_vm4, %v2828_v7, %v2824_v43  ;;  %v2842_v43 = vrot.slane %v2243_v52, %v5253_v46 }
 0x39c   :  { %v5590_v0 = vpop.permute.xlu0 %2251  ;;  %v2918_v63 = vsel %vm2893_vm8, %v2829_v40, %v2917_v27  ;;  %v5593_v30 = vpop.permute.xlu1 %2248 }
 0x39d   :  { %v2843_v44 = vsel %vm2289_vm3, %v2842_v43, %v2838_v45  ;;  %v2856_v52 = vrot.slane %v5590_v0, %v5242_v62 }
 0x3a0   :  { %v1979_v32 = vpop.permute.xlu0 %1978  ;;  %v1970_v10 = vpop.permute.xlu1 %1969 }
 0x3a1   :  { %v2410_v14 = vrot.slane %v1970_v10, %v5269_v4  ;;  %v2424_v45 = vrot.slane %v1979_v32, %v5253_v46 }
 0x3a3   :  { %v2411_v31 = vsel %vm2296_vm4, %v2410_v14, %v2406_v24 }
 0x3a4   :  { %v2075_v12 = vpop.permute.xlu0 %2074  ;;  %v2066_v42 = vpop.permute.xlu1 %2065  ;;  %v2898_v37 = vsel %vm2897_vm10, %v2411_v31, %v2896_v57  ;;  %v2419_v57 = vrot.slane %v5573_v47, %v5242_v62 }
 0x3a5   :  { %v2562_v8 = vrot.slane %v2066_v42, %v5269_v4  ;;  %v2576_v53 = vrot.slane %v2075_v12, %v5253_v46 }
 0x3a6   :  { %v2420_v56 = vsel %vm2282_vm2, %v2419_v57, %v2415_v59 }
 0x3a7   :  { %v2563_v51 = vsel %vm2296_vm4, %v2562_v8, %v2558_v55  ;;  %v2425_v6 = vsel %vm2289_vm3, %v2424_v45, %v2420_v56 }
 0x3a8   :  { %v2159_v39 = vpop.permute.xlu0 %2158  ;;  %v2150_v20 = vpop.permute.xlu1 %2149  ;;  %v2906_v41 = vsel %vm2897_vm10, %v2563_v51, %v2905_v21  ;;  %v2577_v21 = vsel %vm2289_vm3, %v2576_v53, %v2572_v18 }
 0x3a9   :  { %v2695_v60 = vrot.slane %v2150_v20, %v5269_v4  ;;  %v2709_v10 = vrot.slane %v2159_v39, %v5253_v46 }
 0x3ab   :  { %v2696_v3 = vsel %vm2296_vm4, %v2695_v60, %v2691_v13 }
 0x3ac   :  { %v5611_v28 = vpop.permute.xlu0 %2167  ;;  %v5614_v11 = vsel %vm2895_vm9, %v2696_v3, %v2911_v15  ;;  %v2165_v49 = vpop.permute.xlu1 %2164  ;;  %v2852_v15 = vrot.slane %v5593_v30, %v5245_v19 }
 0x3ad   :  { %v2723_v23 = vrot.slane %v5611_v28, %v5242_v62 }
 0x3ae   :  { %v2857_v14 = vsel %vm2282_vm2, %v2856_v52, %v2852_v15 }
 0x3b0   :  { %v2255_v5 = vpop.permute.xlu0 %2254  ;;  %v2246_v35 = vpop.permute.xlu1 %2245 }
 0x3b1   :  { %v2847_v27 = vrot.slane %v2246_v35, %v5269_v4  ;;  %v2861_v32 = vrot.slane %v2255_v5, %v5253_v46 }
 0x3b3   :  { %v2848_v48 = vsel %vm2296_vm4, %v2847_v27, %v2843_v44  ;;  %v2862_v8 = vsel %vm2289_vm3, %v2861_v32, %v2857_v14 }
 0x3b4   :  { %v2264_v26 = vpop.permute.xlu0 %2263  ;;  %v2919_v16 = vsel %vm2895_vm9, %v2848_v48, %v2918_v63  ;;  %v2261_v33 = vpop.permute.xlu1 %2260  ;;  %v2700_v63 = vrot.slane %v5586_v17, %v5245_v19  ;;  %v2719_v17 = vrot.slane %v2165_v49, %v5245_v19 }
 0x3b5   :  { %v2871_v0 = vrot.slane %v2261_v33, %v5245_v19  ;;  %v2875_v24 = vrot.slane %v2264_v26, %v5242_v62 }
 0x3b6   :  { %v2724_v3 = vsel %vm2282_vm2, %v2723_v23, %v2719_v17 }
 0x3b7   :  { %v2876_v20 = vsel %vm2282_vm2, %v2875_v24, %v2871_v0 }
 0x3b8   :  { %v2078_v22 = vpop.permute.xlu0 %2077  ;;  %v1982_v54 = vpop.permute.xlu1 %1981 }
 0x3b9   :  { %v2581_v34 = vrot.slane %v2078_v22, %v5269_v4  ;;  %v2429_v25 = vrot.slane %v1982_v54, %v5269_v4  ;;  %v3280_v54 = vld [vmem:[%s5732_s7] ss:$0 sm:$0xff] }
 0x3bb   :  { %v2582_v47 = vsel %vm2296_vm4, %v2581_v34, %v2577_v21  ;;  %v2430_v58 = vsel %vm2296_vm4, %v2429_v25, %v2425_v6  ;;  %v3285_v21 = vld [vmem:[%s5733_s8] ss:$0 sm:$0xff] }
 0x3bc   :  { %v2171_v2 = vpop.permute.xlu0 %2170  ;;  %v2907_v61 = vsel %vm2899_vm11, %v2582_v47, %v2906_v41  ;;  %v2162_v29 = vpop.permute.xlu1 %2161  ;;  %v2900_v7 = vsel %vm2899_vm11, %v2430_v58, %v2898_v37  ;;  %v2705_v37 = vsel %vm2282_vm2, %v2704_v38, %v2700_v63 }
 0x3bd   :  { %v2922_v40 = vpack.c.b16 %v2907_v61, %v2900_v7  ;;  %v2714_v50 = vrot.slane %v2162_v29, %v5269_v4  ;;  %v2728_v55 = vrot.slane %v2171_v2, %v5253_v46  ;;  %v2710_v1 = vsel %vm2289_vm3, %v2709_v10, %v2705_v37 }
 0x3bf   :  { %3309 = vmatprep.mubr.msk.bf16.mxu1 %vm332_vm0, %v2922_v40  ;;  %v2715_v41 = vsel %vm2296_vm4, %v2714_v50, %v2710_v1  ;;  %v3103_v50 = vstv %s5734_s9  ;;  %s3494_s9 = smov [#allocation12]  }
 0x3c0   :  { %v2267_v30 = vpop.permute.xlu0 %2266  ;;  %v2258_v31 = vpop.permute.xlu1 %2257  ;;  %v2913_v35 = vsel %vm2897_vm10, %v2715_v41, %v5614_v11  ;;  %s3261_s23 = sshll.u32 %s3494_s9, 4  ;;  %s3262_s23 = int_to_ptr.vmem [resolvable:$true] %s3261_s23 }
 0x3c1   :  { %v2866_v12 = vrot.slane %v2258_v31, %v5269_v4  ;;  %v2880_v42 = vrot.slane %v2267_v30, %v5253_v46  ;;  %v2729_v46 = vsel %vm2289_vm3, %v2728_v55, %v2724_v3  ;;  %s3453_s24 = scalar_lea.vmem %s3262_s23, 32  ;;  %p3458_p12 = scmp.lt.s32.totalorder %s3262_s23, %s3262_s23 }
 0x3c2   :  { %p3454_p11 = scmp.ne.s32.totalorder %s3262_s23, %s3453_s24  ;;  %p3459_p13 = scmp.lt.s32.totalorder %s3453_s24, %s3453_s24 }
 0x3c3   :  { %v2867_v51 = vsel %vm2296_vm4, %v2866_v12, %v2862_v8  ;;  %v2881_v28 = vsel %vm2289_vm3, %v2880_v42, %v2876_v20 }
 0x3c4   :  { %v2270_v39 = vpop.permute.xlu0 %2269  ;;  %v2174_v60 = vpop.permute.xlu1 %2173  ;;  %v2920_v43 = vsel %vm2897_vm10, %v2867_v51, %v2919_v16  ;;  %p3460_p0 = por %p3459_p13, %p3458_p12 }
 0x3c5   :  { %v2885_v13 = vrot.slane %v2270_v39, %v5269_v4  ;;  %v2733_v49 = vrot.slane %v2174_v60, %v5269_v4  ;;  %v3342_v4 = vld [vmem:[#allocation11] sm:$0xff]  }
 0x3c6   :  { %3315 = vmatprep.subr.bf16.mxu0 %v3342_v4  ;;  %p3461_p1 = pnand %p3460_p0, %p3454_p11 }
 0x3c7   :  { %v2886_v5 = vsel %vm2296_vm4, %v2885_v13, %v2881_v28  ;;  %v2734_v27 = vsel %vm2296_vm4, %v2733_v49, %v2729_v46  ;;  %3316 = vmatpush3.bf16.msra.mxu0 %v3342_v4  ;;  %v6098_v28 = vld [vmem:[#allocation18_spill] sm:$0xff]  ;;  %v6099_v46 = vld [vmem:[#allocation60_spill] sm:$0xff] }
 0x3c8   :  { %v2921_v44 = vsel %vm2899_vm11, %v2886_v5, %v2920_v43  ;;  %v2914_v48 = vsel %vm2899_vm11, %v2734_v27, %v2913_v35 }
 0x3c9   :  { %v2923_v26 = vpack.c.b16 %v2921_v44, %v2914_v48 }
 0x3cb   :  { %3310 = vmatmul.mubr.msk.bf16.vlgmr.msra.gmra.mxu1 %vm332_vm0, %v2923_v26 }
 0x48b   :  { %v3311_v36 = vpop.f32.mrf.mxu1 }
 0x48c   :  { %v2993_v45 = vmax.f32 %v3311_v36, 0.0 }
 0x48d   :  { %v2976_v16 = vpop.f32.mrf.mxu1 }
 0x48e   :  { %v2991_v57 = vmax.f32 %v2976_v16, 0.0 }
 0x48f   :  { %v3312_v33 = vpop.f32.mrf.mxu1 }
 0x490   :  { %v2994_v59 = vmax.f32 %v3312_v33, 0.0 }
 0x491   :  { %v2979_v11 = vpop.f32.mrf.mxu1 }
 0x492   :  { %v2992_v53 = vmax.f32 %v2979_v11, 0.0  ;;  %v2996_v18 = vpack.c.bf16 %v2994_v59, %v2993_v45 }
 0x494   :  { %v2995_v22 = vpack.c.bf16 %v2992_v53, %v2991_v57 }
 0x496   :  { %3317 = vmatprep.mubr.msk.bf16.mxu0 %vm332_vm0, %v2995_v22 }
 0x497   :  { %3318 = vmatmul.mubr.msk.bf16.vlgmr.msra.gmra.mxu0 %vm332_vm0, %v2996_v18 }
 0x557   :  { %v3319_v34 = vpop.f32.mrf.mxu0 }
 0x558   :  { %v3069_v56 = vadd.f32 %v3319_v34, %v3280_v54 }
 0x559   :  { %v3060_v25 = vpop.f32.mrf.mxu0 }
 0x55a   :  { %v3077_v6 = vmax.f32 %v3069_v56, 0.0  ;;  %v3061_v47 = vadd.f32 %v3280_v54, %v3060_v25 }
 0x55b   :  { %v3320_v2 = vpop.f32.mrf.mxu0 }
 0x55c   :  { %v3088_v58 = vmul.f32 %v3285_v21, %v3077_v6  ;;  %v3075_v61 = vmax.f32 %v3061_v47, 0.0  ;;  %v3072_v15 = vadd.f32 %v3320_v2, %v3280_v54 }
 0x55d   :  { %v3063_v52 = vpop.f32.mrf.mxu0 }
 0x55e   :  { %v3086_v29 = vmul.f32 %v3285_v21, %v3075_v61  ;;  %v3064_v7 = vadd.f32 %v3280_v54, %v3063_v52  ;;  %v3096_v40 = vsel %vm332_vm0, %v3088_v58, 0.0  ;;  %v3078_v63 = vmax.f32 %v3072_v15, 0.0 }
 0x55f   :  { %3097 = vadd.xlane.f32.xlu0 %v3096_v40 }
 0x560   :  { %v3076_v38 = vmax.f32 %v3064_v7, 0.0  ;;  %v3090_v32 = vsel %vm332_vm0, %v3086_v29, 0.0  ;;  %v3089_v30 = vmul.f32 %v3285_v21, %v3078_v63 }
 0x561   :  { %3091 = vadd.xlane.f32.xlu1 %v3090_v32 }
 0x562   :  { %v3087_v10 = vmul.f32 %v3285_v21, %v3076_v38  ;;  %v3099_v0 = vsel %vm332_vm0, %v3089_v30, 0.0 }
 0x564   :  { %v3093_v14 = vsel %vm332_vm0, %v3087_v10, 0.0 }
 0x565   :  { %3094 = vadd.xlane.f32.xlu0 %v3093_v14 }
 0x569   :  { %3100 = vadd.xlane.f32.xlu0 %v3099_v0 }
 0x5e8   :  { %v3098_v24 = vpop.xlane.xlu0 %3097 }
 0x5e9   :  { %v3106_v12 = vadd.f32 %v3103_v50, %v3098_v24 }
 0x5ea   :  { %v3092_v31 = vpop.xlane.xlu1 %3091 }
 0x5eb   :  { %v3104_v42 = vadd.f32 %v3103_v50, %v3092_v31  ;;  %v3124_v1 = vrot.slane %v3106_v12, %v5245_v19 }
 0x5ed   :  { %v3115_v51 = vrot.slane %v3104_v42, %v5245_v19 }
 0x5ee   :  { %v3095_v17 = vpop.xlane.xlu0 %3094 }
 0x5ef   :  { %v3105_v23 = vadd.f32 %v3103_v50, %v3095_v17 }
 0x5f1   :  { %v3119_v8 = vrot.slane %v3105_v23, %v5242_v62 }
 0x5f2   :  { %v3101_v37 = vpop.xlane.xlu0 %3100 }
 0x5f3   :  { %v3107_v55 = vadd.f32 %v3103_v50, %v3101_v37  ;;  %v3120_v20 = vsel %vm2282_vm2, %v3119_v8, %v3115_v51 }
 0x5f5   :  { %v3128_v39 = vrot.slane %v3107_v55, %v5242_v62 }
 0x5f7   :  { %v3129_v41 = vsel %vm2282_vm2, %v3128_v39, %v3124_v1 }
 0x5f8   :  { %v3130_v60 = vsel %vm2887_vm5, %v3129_v41, %v3120_v20 }
 0x5f9   :  { %v3133_v13 = vsel %vm3132_vm12, %v3130_v60, -inf }
 0x5fa   :  { %3134 = vmax.xlane.f32.xlu1 %v3133_v13 }
 0x683   :  { %v3135_v3 = vpop.xlane.xlu1 %3134 }
 0x684   :  { %v3140_v49 = vrot.slane %v3135_v3, %v6098_v28  ;;  %v3144_v43 = vrot.slane %v3135_v3, %v6099_v46 }
 0x686   :  { %v3147_v5 = vsub.f32 %v3104_v42, %v3140_v49  ;;  %v3148_v35 = vsub.f32 %v3105_v23, %v3140_v49  ;;  %v3149_v27 = vsub.f32 %v3106_v12, %v3144_v43  ;;  %v3150_v26 = vsub.f32 %v3107_v55, %v3144_v43 }
 0x688   :  { %v3151_v44 = vmul.f32 1.442695, %v3147_v5  ;;  %v3153_v48 = vmul.f32 1.442695, %v3148_v35  ;;  %v3155_v9 = vmul.f32 1.442695, %v3149_v27 }
 0x689   :  { %v3157_v4 = vmul.f32 1.442695, %v3150_v26 }
 0x68a   :  { %3343 = vpow2.f32 %v3151_v44 }
 0x68b   :  { %3345 = vpow2.f32 %v3153_v48 }
 0x68c   :  { %3347 = vpow2.f32 %v3155_v9 }
 0x68d   :  { %3349 = vpow2.f32 %v3157_v4 }
 0x697   :  { %v3344_v36 = vpop.eup %3343 }
 0x698   :  { %v3346_v16 = vpop.eup %3345  ;;  %3164 = vperm.xlu0 %3335, %v3344_v36  }
 0x699   :  { %3167 = vperm.xlu1 %3336, %v3346_v16   ;;  %v3348_v33 = vpop.eup %3347 }
 0x69a   :  { %v3350_v59 = vpop.eup %3349 }
 0x69d   :  { %3170 = vperm.xlu1 %3336, %v3348_v33  }
 0x6a1   :  { %3173 = vperm.xlu1 %3336, %v3350_v59  }
 0x713   :  { %v3165_v57 = vpop.permute.xlu0 %3164 }
 0x714   :  { %v3168_v11 = vpop.permute.xlu1 %3167  ;;  %v3178_v22 = vrot.slane %v3165_v57, %v5245_v19 }
 0x715   :  { %v3182_v45 = vrot.slane %v3168_v11, %v5242_v62 }
 0x717   :  { %v3183_v56 = vsel %vm2282_vm2, %v3182_v45, %v3178_v22 }
 0x718   :  { %v3171_v53 = vpop.permute.xlu1 %3170 }
 0x719   :  { %v3187_v54 = vrot.slane %v3171_v53, %v5245_v19 }
 0x71c   :  { %v3174_v18 = vpop.permute.xlu1 %3173 }
 0x71d   :  { %v3191_v34 = vrot.slane %v3174_v18, %v5242_v62 }
 0x71f   :  { %v3192_v21 = vsel %vm2282_vm2, %v3191_v34, %v3187_v54 }
 0x720   :  { %v3193_v25 = vsel %vm2887_vm5, %v3192_v21, %v3183_v56 }
 0x721   :  { %v3195_v6 = vsel %vm3132_vm12, %v3193_v25, 0.0 }
 0x722   :  { %3196 = vadd.xlane.f32.xlu0 %v3195_v6 }
 0x7ab   :  { %v3197_v47 = vpop.xlane.xlu0 %3196 }
 0x7ac   :  { %3351 = vrcp.f32 %v3197_v47 }
 0x7b9   :  { %v3352_v2 = vpop.eup %3351 }
 0x7ba   :  { %v3203_v58 = vrot.slane %v3352_v2, %v6098_v28  ;;  %v3207_v29 = vrot.slane %v3352_v2, %v6099_v46 }
 0x7bc   :  { %v3210_v61 = vmul.f32 %v3344_v36, %v3203_v58  ;;  %v3211_v52 = vmul.f32 %v3346_v16, %v3203_v58  ;;  %v3212_v40 = vmul.f32 %v3348_v33, %v3207_v29  ;;  %v3213_v38 = vmul.f32 %v3350_v59, %v3207_v29 }
 0x7be   :  { %v3214_v15 = vadd.f32 1e-08, %v3210_v61  ;;  %v3215_v7 = vadd.f32 1e-08, %v3211_v52  ;;  %v3216_v63 = vadd.f32 1e-08, %v3212_v40 }
 0x7bf   :  { %v3217_v32 = vadd.f32 1e-08, %v3213_v38 }
 0x7c0   :  { %3223 = vperm.xlu1 %3336, %v3214_v15  }
 0x7c4   :  { %3226 = vperm.xlu1 %3336, %v3215_v7  }
 0x7c8   :  { %3229 = vperm.xlu1 %3336, %v3216_v63  }
 0x7cc   :  { %3232 = vperm.xlu1 %3336, %v3217_v32  }
 0x83b   :  { %v3224_v10 = vpop.permute.xlu1 %3223 }
 0x83c   :  { %v3237_v50 = vrot.slane %v3224_v10, %v5245_v19 }
 0x83f   :  { %v3227_v30 = vpop.permute.xlu1 %3226 }
 0x840   :  { %v3241_v0 = vrot.slane %v3227_v30, %v5242_v62 }
 0x842   :  { %v3242_v23 = vsel %vm2282_vm2, %v3241_v0, %v3237_v50 }
 0x843   :  { %v3230_v14 = vpop.permute.xlu1 %3229 }
 0x844   :  { %v3246_v31 = vrot.slane %v3230_v14, %v5245_v19 }
 0x847   :  { %v3233_v24 = vpop.permute.xlu1 %3232 }
 0x848   :  { %v3250_v17 = vrot.slane %v3233_v24, %v5242_v62 }
 0x84a   :  { %v3251_v12 = vsel %vm2282_vm2, %v3250_v17, %v3246_v31 }
 0x84b   :  { %v3252_v42 = vsel %vm2887_vm5, %v3251_v12, %v3242_v23 }
 0x84c   :  { %3254 = vst.msk [vmem:[#allocation12] sm:$0x3] %vm3132_vm12, %v3252_v42 }
 0x84d   :  { %3464 = shalt.err (!%p3461_p1)
}
 0x84e   :  { %3264 = dma.vmem_to_hbm [thread:$0]  %s3262_s23, 32, %s5735_s10, [#allocation5]  }
 0x84f   :  { %3479 = dma.done.wait [#allocation5], 32  }
 0x850   :  { %3480 = vsyncadd [#allocation5], 4294967264 }
 0x851   :  { %3268 = vsyncpa [#allocation4], 1 }
 0x852   :  { %3269 = vsyncpa [#allocation7], 1 }
 0x853   :  { %3270 = vsyncpa [#allocation10], 1 }
 0x854   :  { %3271 = vsyncpa [#allocation5], 1 }

</bundles_post_ra>
